<compile_context>
chip_gen: v7x
topology: tpu7x:2x2x1
jax: 0.10.0
libtpu: 0.0.40
codegen_flags: <defaults>
</compile_context>

<pallas_src>
import functools

import jax
import jax.numpy as jnp
from jax.experimental import pallas as pl
from jax.experimental.pallas import tpu as pltpu

N_INPUTS = 2                                        # cell_config['n_inputs']
STEPS = 4                                           # steps
N_OPS = 6                                           # len(CNN_operations)
N_STATES = N_INPUTS + STEPS                         # 6
N_EDGES = sum(N_INPUTS + i for i in range(STEPS))   # 14
KS = 5                                              # folded spatial kernel (5x5 envelope)
NTAP = KS * KS                                      # 25 conv taps
KBLK = NTAP + 2                                     # + max-pool + avg-pool tap blocks

# Reference-module edge enumeration, re-grouped by SOURCE state so that all
# edges leaving one state share a single tap build + one MXU matmul:
#   step 0: edges 0,1      (src 0,1)     -> state 2
#   step 1: edges 2,3,4    (src 0,1,2)   -> state 3
#   step 2: edges 5,6,7,8  (src 0..3)    -> state 4
#   step 3: edges 9..13    (src 0..4)    -> state 5
EDGE_ORDER = (0, 2, 5, 9, 1, 3, 6, 10, 4, 7, 11, 8, 12, 13)
SOURCE_DESTS = ((2, 3, 4, 5), (2, 3, 4, 5), (3, 4, 5), (4, 5), (5,))


# --------------------------------------------------------------------------- #
# Fused cell kernel                                                            #
# --------------------------------------------------------------------------- #
def _cell_kernel(mask_ref, x_ref, wpre_ref, wall_ref, o_ref,
                 states_ref, patch_ref, *, W):
    # mask_ref  : (25, HW)               border masks per tap (f32 0/1)
    # x_ref     : (1, N_INPUTS, C_in+1, HW)  raw inputs + ones row (for BN shift)
    # wpre_ref  : (N_INPUTS, C, C_in+1)  1x1 preprocess conv w/ BN scale+shift folded
    # wall_ref  : (N_EDGES*C, 27*C)      alpha-folded weights, edges grouped by source
    # o_ref     : (1, 2, C, HW)          last two states
    # states_ref: VMEM (N_STATES, C, HW) all cell states
    # patch_ref : VMEM (27*C, HW)        tap matrix of the current source state
    C = states_ref.shape[1]
    HW = states_ref.shape[2]

    # ---- preprocess: 1x1 conv, eval-mode BN scale+shift folded into the matmul ----
    for i in range(N_INPUTS):
        states_ref[i] = jnp.dot(wpre_ref[i], x_ref[0, i],
                                preferred_element_type=jnp.float32)

    row = 0     # running sublane-row offset into wall_ref (multiples of 8)
    for src, dests in enumerate(SOURCE_DESTS):
        n_e = len(dests)
        x_src = states_ref[src]                                  # (C, HW)

        # ---- build tap matrix: lane rolls (XLU) + border masks, lane-dense stores ----
        for t in range(NTAP):
            oy, ox = t // KS - 2, t % KS - 2                     # spatial offset
            s = oy * W + ox                                      # flattened lane offset
            if s == 0:
                patch_ref[t * C:(t + 1) * C, :] = x_src
            else:
                shifted = pltpu.roll(x_src, (-s) % HW, axis=1)   # out[p] = x[p+s]
                patch_ref[t * C:(t + 1) * C, :] = shifted * mask_ref[t:t + 1, :]

        # ---- 2x2 stride-1 max/avg pool appended as two extra K blocks --------------
        # windows = taps (0,0),(0,1),(1,0),(1,1) already built above
        t00 = (0 + 2) * KS + (0 + 2)
        t01 = (0 + 2) * KS + (1 + 2)
        t10 = (1 + 2) * KS + (0 + 2)
        t11 = (1 + 2) * KS + (1 + 2)
        p00 = patch_ref[t00 * C:(t00 + 1) * C, :]
        p01 = patch_ref[t01 * C:(t01 + 1) * C, :]
        p10 = patch_ref[t10 * C:(t10 + 1) * C, :]
        p11 = patch_ref[t11 * C:(t11 + 1) * C, :]
        patch_ref[NTAP * C:(NTAP + 1) * C, :] = jnp.maximum(jnp.maximum(p00, p01),
                                                            jnp.maximum(p10, p11))
        patch_ref[(NTAP + 1) * C:(NTAP + 2) * C, :] = (p00 + p01 + p10 + p11) * 0.25

        # ---- one MXU matmul for ALL edges leaving this source ----------------------
        # (conv1x1 + conv3x3 + conv5x5 + depthwise3x3 + max/avg pool, alpha-folded)
        lin = jnp.dot(wall_ref[row:row + n_e * C, :], patch_ref[...],
                      preferred_element_type=jnp.float32)        # (n_e*C, HW)

        # scatter into destination-state accumulators (sublane slices, mult. of 8)
        for k, dest in enumerate(dests):
            contrib = lin[k * C:(k + 1) * C, :]
            if src == 0:     # every dest has an edge from state 0 in this topology
                states_ref[dest] = contrib
            else:
                states_ref[dest] = states_ref[dest] + contrib
        row += n_e * C

    # cell output = channel concat of the last two states (reshape in wrapper)
    o_ref[0, 0] = states_ref[N_STATES - 2]
    o_ref[0, 1] = states_ref[N_STATES - 1]


# --------------------------------------------------------------------------- #
# Wrapper: weight / mask folding + single pallas_call                          #
# --------------------------------------------------------------------------- #
def _make_tap_masks(H, W):
    """(25, H*W) 0/1 masks: tap (dy,dx) valid where the shifted pixel is in-bounds."""
    hh = jnp.arange(H)[:, None]
    ww = jnp.arange(W)[None, :]
    rows = []
    for dy in range(KS):
        for dx in range(KS):
            oy, ox = dy - 2, dx - 2
            valid = ((hh + oy >= 0) & (hh + oy < H) &
                     (ww + ox >= 0) & (ww + ox < W))
            rows.append(valid.reshape(H * W))
    return jnp.stack(rows).astype(jnp.float32)


def _fold_preprocess(pre_params):
    """Fold 1x1 conv + eval-mode BN (scale AND shift) into one (C, C_in+1) matrix."""
    ws = []
    for (w, gamma, beta, mean, var) in pre_params:      # w: (C, C_in, 1, 1) torch layout
        scale = gamma / jnp.sqrt(var + 1e-5)            # (C,)
        w_eff = scale[:, None] * w[:, :, 0, 0]          # (C, C_in)
        shift = beta - scale * mean                     # (C,) multiplies the ones row
        ws.append(jnp.concatenate([w_eff, shift[:, None]], axis=1))
    return jnp.stack(ws)                                # (N_INPUTS, C, C_in+1)


def _fold_edge_weights(alpha, edge_params, C):
    """Fold each edge's 4 linear ops into one 5x5 envelope and its pool alphas into
    2 diagonal blocks; stack edges grouped by source state along the rows."""
    eye = jnp.eye(C, dtype=jnp.float32)
    rows = []
    for e in EDGE_ORDER:
        w1, w3, w5, wd = edge_params[e]   # torch layouts (Cout,Cin,kh,kw); wd (C,1,3,3)
        a = alpha[e * N_OPS:(e + 1) * N_OPS]
        w_eff = a[2] * w5                                               # conv_5x5
        dw_full = eye[:, :, None, None] * wd[:, 0][:, None, :, :]       # depthwise -> diag
        w_eff = w_eff.at[:, :, 1:4, 1:4].add(a[1] * w3 + a[3] * dw_full)  # 3x3 + dw3x3
        w_eff = w_eff.at[:, :, 2, 2].add(a[0] * w1[:, :, 0, 0])           # 1x1 (center)
        # column index = (dy*5+dx)*C + c_in, matching the kernel's tap layout
        lin = jnp.transpose(w_eff, (0, 2, 3, 1)).reshape(C, NTAP * C)
        row = jnp.concatenate([lin, a[4] * eye, a[5] * eye], axis=1)    # + max/avg pool
        rows.append(row)                                                # (C, 27*C)
    return jnp.concatenate(rows, axis=0)                                # (14*C, 27*C)


def cell_forward(inputs, alpha, pre_params, edge_params):
    """Fused forward of the whole Cell: one pallas_call, grid over batch only."""
    N, C_in, H, W = inputs[0].shape
    C = pre_params[0][0].shape[0]
    HW = H * W

    # NCHW -> (N, n_inputs, C_in+1, HW): plain reshape (no transpose) + ones row
    ones = jnp.ones((N, 1, HW), jnp.float32)
    xs = jnp.stack(
        [jnp.concatenate([x.reshape(N, C_in, HW).astype(jnp.float32), ones], axis=1)
         for x in inputs], axis=1)

    wpre = _fold_preprocess(pre_params)                 # (2, C, C_in+1)
    wall = _fold_edge_weights(alpha, edge_params, C)    # (14*C, 27*C)
    masks = _make_tap_masks(H, W)                       # (25, HW)

    out = pl.pallas_call(
        functools.partial(_cell_kernel, W=W),
        out_shape=jax.ShapeDtypeStruct((N, 2, C, HW), jnp.float32),
        grid=(N,),
        in_specs=[
            pl.BlockSpec((NTAP, HW), lambda n: (0, 0)),                       # masks
            pl.BlockSpec((1, N_INPUTS, C_in + 1, HW), lambda n: (n, 0, 0, 0)),  # xs
            pl.BlockSpec((N_INPUTS, C, C_in + 1), lambda n: (0, 0, 0)),       # wpre
            pl.BlockSpec((N_EDGES * C, KBLK * C), lambda n: (0, 0)),          # wall
        ],
        out_specs=pl.BlockSpec((1, 2, C, HW), lambda n: (n, 0, 0, 0)),
        scratch_shapes=[
            pltpu.VMEM((N_STATES, C, HW), jnp.float32),   # cell states (lane-dense)
            pltpu.VMEM((KBLK * C, HW), jnp.float32),      # tap matrix of current source
        ],
        compiler_params=pltpu.CompilerParams(dimension_semantics=("parallel",)),
    )(masks, xs, wpre, wall)

    # (N, 2, C, HW) is already channel-major -> NCHW concat is a pure reshape
    return out.reshape(N, 2 * C, H, W)


# --------------------------------------------------------------------------- #
# Deterministic parameter initialization (synthetic, PyTorch weight layouts)   #
# --------------------------------------------------------------------------- #
def init_cell_params(key, C_in, C_out):
    keys = jax.random.split(key, N_INPUTS + 4 * N_EDGES)

    pre = []
    for i in range(N_INPUTS):
        w = jax.random.normal(keys[i], (C_out, C_in, 1, 1), jnp.float32) * (C_in ** -0.5)
        gamma = jnp.ones((C_out,), jnp.float32)     # fresh BN stats, eval mode
        beta = jnp.zeros((C_out,), jnp.float32)
        mean = jnp.zeros((C_out,), jnp.float32)
        var = jnp.ones((C_out,), jnp.float32)
        pre.append((w, gamma, beta, mean, var))

    edges = []
    kidx = N_INPUTS
    for _ in range(N_EDGES):
        k1, k3, k5, kd = keys[kidx:kidx + 4]
        kidx += 4
        w1 = jax.random.normal(k1, (C_out, C_out, 1, 1), jnp.float32) * (C_out ** -0.5)
        w3 = jax.random.normal(k3, (C_out, C_out, 3, 3), jnp.float32) * ((9 * C_out) ** -0.5)
        w5 = jax.random.normal(k5, (C_out, C_out, 5, 5), jnp.float32) * ((25 * C_out) ** -0.5)
        wd = jax.random.normal(kd, (C_out, 1, 3, 3), jnp.float32) * (9 ** -0.5)
        edges.append((w1, w3, w5, wd))
    return pre, edges


if __name__ == "__main__":
    key = jax.random.PRNGKey(0)
    N, C_in, C_out, H, W = 2, 4, 8, 16, 16
    k_x0, k_x1, k_alpha, k_params = jax.random.split(key, 4)

    x0 = jax.random.normal(k_x0, (N, C_in, H, W), jnp.float32)
    x1 = jax.random.normal(k_x1, (N, C_in, H, W), jnp.float32)

    alpha = jax.random.normal(k_alpha, (N_EDGES * N_OPS,), jnp.float32)

    pre_params, edge_params = init_cell_params(k_params, C_in, C_out)

    out = jax.jit(cell_forward)((x0, x1), alpha, pre_params, edge_params)
    out = jax.block_until_ready(out)

    assert out.shape == (N, N_INPUTS * C_out, H, W), out.shape
    assert bool(jnp.all(jnp.isfinite(out)))
    print("KERNEL_OK")
</pallas_src>

<mosaic_0001>
module attributes {stable_mosaic.version = 11 : i64} {
  func.func @_cell_kernel(%arg0: i32, %arg1: memref<25x256xf32, #tpu.memory_space<vmem>>, %arg2: memref<1x2x5x256xf32, #tpu.memory_space<vmem>>, %arg3: memref<2x8x5xf32, #tpu.memory_space<vmem>>, %arg4: memref<112x216xf32, #tpu.memory_space<vmem>>, %arg5: memref<1x2x8x256xf32, #tpu.memory_space<vmem>>, %arg6: memref<6x8x256xf32, #tpu.memory_space<vmem>>, %arg7: memref<216x256xf32, #tpu.memory_space<vmem>>) attributes {dimension_semantics = [#tpu.dimension_semantics<parallel>], iteration_bounds = array<i64: 2>, scalar_prefetch = 0 : i64, scratch_operands = 2 : i64, tpu.core_type = #tpu.core_type<tc>, window_params = [{pipeline_mode = #tpu.pipeline_mode<synchronous>, transform_indices = @transform_0, window_bounds = array<i64: 25, 256>}, {transform_indices = @transform_1, window_bounds = array<i64: 1, 2, 5, 256>}, {pipeline_mode = #tpu.pipeline_mode<synchronous>, transform_indices = @transform_2, window_bounds = array<i64: 2, 8, 5>}, {pipeline_mode = #tpu.pipeline_mode<synchronous>, transform_indices = @transform_3, window_bounds = array<i64: 112, 216>}, {transform_indices = @transform_4, window_bounds = array<i64: 1, 2, 8, 256>}]} {
    %c0 = arith.constant 0 : index
    %c0_0 = arith.constant 0 : index
    %c0_1 = arith.constant 0 : index
    %0 = vector.load %arg3[%c0, %c0_0, %c0_1] : memref<2x8x5xf32, #tpu.memory_space<vmem>>, vector<1x8x5xf32>
    %1 = vector.shape_cast %0 : vector<1x8x5xf32> to vector<8x5xf32>
    %c0_2 = arith.constant 0 : index
    %c0_3 = arith.constant 0 : index
    %c0_4 = arith.constant 0 : index
    %c0_5 = arith.constant 0 : index
    %2 = vector.load %arg2[%c0_2, %c0_3, %c0_4, %c0_5] : memref<1x2x5x256xf32, #tpu.memory_space<vmem>>, vector<1x1x5x256xf32>
    %3 = vector.shape_cast %2 : vector<1x1x5x256xf32> to vector<5x256xf32>
    %cst = arith.constant dense<0.000000e+00> : vector<8x256xf32>
    %4 = tpu.matmul %1, %3, %cst {dimension_numbers = #tpu.dot_dimension_numbers<[1], [0], [0], [1], [0, 0, 1, 1], [], []>} : vector<8x5xf32>, vector<5x256xf32>, vector<8x256xf32> -> vector<8x256xf32>
    %c0_6 = arith.constant 0 : index
    %c0_7 = arith.constant 0 : index
    %c0_8 = arith.constant 0 : index
    %5 = vector.load %arg6[%c0_6, %c0_7, %c0_8] : memref<6x8x256xf32, #tpu.memory_space<vmem>>, vector<1x8x256xf32>
    %6 = vector.shape_cast %5 : vector<1x8x256xf32> to vector<8x256xf32>
    %7 = vector.shape_cast %4 : vector<8x256xf32> to vector<1x8x256xf32>
    tpu.vector_store %arg6[%c0_6, %c0_7, %c0_8], %7 {strides = array<i32>} : memref<6x8x256xf32, #tpu.memory_space<vmem>>, vector<1x8x256xf32>,
    %c1 = arith.constant 1 : index
    %c0_9 = arith.constant 0 : index
    %c0_10 = arith.constant 0 : index
    %8 = vector.load %arg3[%c1, %c0_9, %c0_10] : memref<2x8x5xf32, #tpu.memory_space<vmem>>, vector<1x8x5xf32>
    %9 = vector.shape_cast %8 : vector<1x8x5xf32> to vector<8x5xf32>
    %c0_11 = arith.constant 0 : index
    %c1_12 = arith.constant 1 : index
    %c0_13 = arith.constant 0 : index
    %c0_14 = arith.constant 0 : index
    %10 = vector.load %arg2[%c0_11, %c1_12, %c0_13, %c0_14] : memref<1x2x5x256xf32, #tpu.memory_space<vmem>>, vector<1x1x5x256xf32>
    %11 = vector.shape_cast %10 : vector<1x1x5x256xf32> to vector<5x256xf32>
    %cst_15 = arith.constant dense<0.000000e+00> : vector<8x256xf32>
    %12 = tpu.matmul %9, %11, %cst_15 {dimension_numbers = #tpu.dot_dimension_numbers<[1], [0], [0], [1], [0, 0, 1, 1], [], []>} : vector<8x5xf32>, vector<5x256xf32>, vector<8x256xf32> -> vector<8x256xf32>
    %c1_16 = arith.constant 1 : index
    %c0_17 = arith.constant 0 : index
    %c0_18 = arith.constant 0 : index
    %13 = vector.load %arg6[%c1_16, %c0_17, %c0_18] : memref<6x8x256xf32, #tpu.memory_space<vmem>>, vector<1x8x256xf32>
    %14 = vector.shape_cast %13 : vector<1x8x256xf32> to vector<8x256xf32>
    %15 = vector.shape_cast %12 : vector<8x256xf32> to vector<1x8x256xf32>
    tpu.vector_store %arg6[%c1_16, %c0_17, %c0_18], %15 {strides = array<i32>} : memref<6x8x256xf32, #tpu.memory_space<vmem>>, vector<1x8x256xf32>,
    %c0_19 = arith.constant 0 : index
    %c0_20 = arith.constant 0 : index
    %c0_21 = arith.constant 0 : index
    %16 = vector.load %arg6[%c0_19, %c0_20, %c0_21] : memref<6x8x256xf32, #tpu.memory_space<vmem>>, vector<1x8x256xf32>
    %17 = vector.shape_cast %16 : vector<1x8x256xf32> to vector<8x256xf32>
    %c34_i32 = arith.constant 34 : i32
    %18 = tpu.dynamic_rotate %17 by %c34_i32 dim 1 : vector<8x256xf32>, i32 -> vector<8x256xf32>
    %c0_22 = arith.constant 0 : index
    %c0_23 = arith.constant 0 : index
    %19 = vector.load %arg1[%c0_22, %c0_23] : memref<25x256xf32, #tpu.memory_space<vmem>>, vector<1x256xf32>
    %20 = vector.broadcast %19 : vector<1x256xf32> to vector<8x256xf32>
    %21 = arith.mulf %18, %20 : vector<8x256xf32>
    %c0_24 = arith.constant 0 : index
    %c0_25 = arith.constant 0 : index
    %22 = vector.load %arg7[%c0_24, %c0_25] : memref<216x256xf32, #tpu.memory_space<vmem>>, vector<8x256xf32>
    tpu.vector_store %arg7[%c0_24, %c0_25], %21 {strides = array<i32>} : memref<216x256xf32, #tpu.memory_space<vmem>>, vector<8x256xf32>,
    %c33_i32 = arith.constant 33 : i32
    %23 = tpu.dynamic_rotate %17 by %c33_i32 dim 1 : vector<8x256xf32>, i32 -> vector<8x256xf32>
    %c1_26 = arith.constant 1 : index
    %c0_27 = arith.constant 0 : index
    %24 = vector.load %arg1[%c1_26, %c0_27] : memref<25x256xf32, #tpu.memory_space<vmem>>, vector<1x256xf32>
    %25 = vector.broadcast %24 : vector<1x256xf32> to vector<8x256xf32>
    %26 = arith.mulf %23, %25 : vector<8x256xf32>
    %c8 = arith.constant 8 : index
    %c0_28 = arith.constant 0 : index
    %27 = vector.load %arg7[%c8, %c0_28] : memref<216x256xf32, #tpu.memory_space<vmem>>, vector<8x256xf32>
    tpu.vector_store %arg7[%c8, %c0_28], %26 {strides = array<i32>} : memref<216x256xf32, #tpu.memory_space<vmem>>, vector<8x256xf32>,
    %c32_i32 = arith.constant 32 : i32
    %28 = tpu.dynamic_rotate %17 by %c32_i32 dim 1 : vector<8x256xf32>, i32 -> vector<8x256xf32>
    %c2 = arith.constant 2 : index
    %c0_29 = arith.constant 0 : index
    %29 = vector.load %arg1[%c2, %c0_29] : memref<25x256xf32, #tpu.memory_space<vmem>>, vector<1x256xf32>
    %30 = vector.broadcast %29 : vector<1x256xf32> to vector<8x256xf32>
    %31 = arith.mulf %28, %30 : vector<8x256xf32>
    %c16 = arith.constant 16 : index
    %c0_30 = arith.constant 0 : index
    %32 = vector.load %arg7[%c16, %c0_30] : memref<216x256xf32, #tpu.memory_space<vmem>>, vector<8x256xf32>
    tpu.vector_store %arg7[%c16, %c0_30], %31 {strides = array<i32>} : memref<216x256xf32, #tpu.memory_space<vmem>>, vector<8x256xf32>,
    %c31_i32 = arith.constant 31 : i32
    %33 = tpu.dynamic_rotate %17 by %c31_i32 dim 1 : vector<8x256xf32>, i32 -> vector<8x256xf32>
    %c3 = arith.constant 3 : index
    %c0_31 = arith.constant 0 : index
    %34 = vector.load %arg1[%c3, %c0_31] : memref<25x256xf32, #tpu.memory_space<vmem>>, vector<1x256xf32>
    %35 = vector.broadcast %34 : vector<1x256xf32> to vector<8x256xf32>
    %36 = arith.mulf %33, %35 : vector<8x256xf32>
    %c24 = arith.constant 24 : index
    %c0_32 = arith.constant 0 : index
    %37 = vector.load %arg7[%c24, %c0_32] : memref<216x256xf32, #tpu.memory_space<vmem>>, vector<8x256xf32>
    tpu.vector_store %arg7[%c24, %c0_32], %36 {strides = array<i32>} : memref<216x256xf32, #tpu.memory_space<vmem>>, vector<8x256xf32>,
    %c30_i32 = arith.constant 30 : i32
    %38 = tpu.dynamic_rotate %17 by %c30_i32 dim 1 : vector<8x256xf32>, i32 -> vector<8x256xf32>
    %c4 = arith.constant 4 : index
    %c0_33 = arith.constant 0 : index
    %39 = vector.load %arg1[%c4, %c0_33] : memref<25x256xf32, #tpu.memory_space<vmem>>, vector<1x256xf32>
    %40 = vector.broadcast %39 : vector<1x256xf32> to vector<8x256xf32>
    %41 = arith.mulf %38, %40 : vector<8x256xf32>
    %c32 = arith.constant 32 : index
    %c0_34 = arith.constant 0 : index
    %42 = vector.load %arg7[%c32, %c0_34] : memref<216x256xf32, #tpu.memory_space<vmem>>, vector<8x256xf32>
    tpu.vector_store %arg7[%c32, %c0_34], %41 {strides = array<i32>} : memref<216x256xf32, #tpu.memory_space<vmem>>, vector<8x256xf32>,
    %c18_i32 = arith.constant 18 : i32
    %43 = tpu.dynamic_rotate %17 by %c18_i32 dim 1 : vector<8x256xf32>, i32 -> vector<8x256xf32>
    %c5 = arith.constant 5 : index
    %c0_35 = arith.constant 0 : index
    %44 = vector.load %arg1[%c5, %c0_35] : memref<25x256xf32, #tpu.memory_space<vmem>>, vector<1x256xf32>
    %45 = vector.broadcast %44 : vector<1x256xf32> to vector<8x256xf32>
    %46 = arith.mulf %43, %45 : vector<8x256xf32>
    %c40 = arith.constant 40 : index
    %c0_36 = arith.constant 0 : index
    %47 = vector.load %arg7[%c40, %c0_36] : memref<216x256xf32, #tpu.memory_space<vmem>>, vector<8x256xf32>
    tpu.vector_store %arg7[%c40, %c0_36], %46 {strides = array<i32>} : memref<216x256xf32, #tpu.memory_space<vmem>>, vector<8x256xf32>,
    %c17_i32 = arith.constant 17 : i32
    %48 = tpu.dynamic_rotate %17 by %c17_i32 dim 1 : vector<8x256xf32>, i32 -> vector<8x256xf32>
    %c6 = arith.constant 6 : index
    %c0_37 = arith.constant 0 : index
    %49 = vector.load %arg1[%c6, %c0_37] : memref<25x256xf32, #tpu.memory_space<vmem>>, vector<1x256xf32>
    %50 = vector.broadcast %49 : vector<1x256xf32> to vector<8x256xf32>
    %51 = arith.mulf %48, %50 : vector<8x256xf32>
    %c48 = arith.constant 48 : index
    %c0_38 = arith.constant 0 : index
    %52 = vector.load %arg7[%c48, %c0_38] : memref<216x256xf32, #tpu.memory_space<vmem>>, vector<8x256xf32>
    tpu.vector_store %arg7[%c48, %c0_38], %51 {strides = array<i32>} : memref<216x256xf32, #tpu.memory_space<vmem>>, vector<8x256xf32>,
    %c16_i32 = arith.constant 16 : i32
    %53 = tpu.dynamic_rotate %17 by %c16_i32 dim 1 : vector<8x256xf32>, i32 -> vector<8x256xf32>
    %c7 = arith.constant 7 : index
    %c0_39 = arith.constant 0 : index
    %54 = vector.load %arg1[%c7, %c0_39] : memref<25x256xf32, #tpu.memory_space<vmem>>, vector<1x256xf32>
    %55 = vector.broadcast %54 : vector<1x256xf32> to vector<8x256xf32>
    %56 = arith.mulf %53, %55 : vector<8x256xf32>
    %c56 = arith.constant 56 : index
    %c0_40 = arith.constant 0 : index
    %57 = vector.load %arg7[%c56, %c0_40] : memref<216x256xf32, #tpu.memory_space<vmem>>, vector<8x256xf32>
    tpu.vector_store %arg7[%c56, %c0_40], %56 {strides = array<i32>} : memref<216x256xf32, #tpu.memory_space<vmem>>, vector<8x256xf32>,
    %c15_i32 = arith.constant 15 : i32
    %58 = tpu.dynamic_rotate %17 by %c15_i32 dim 1 : vector<8x256xf32>, i32 -> vector<8x256xf32>
    %c8_41 = arith.constant 8 : index
    %c0_42 = arith.constant 0 : index
    %59 = vector.load %arg1[%c8_41, %c0_42] : memref<25x256xf32, #tpu.memory_space<vmem>>, vector<1x256xf32>
    %60 = vector.broadcast %59 : vector<1x256xf32> to vector<8x256xf32>
    %61 = arith.mulf %58, %60 : vector<8x256xf32>
    %c64 = arith.constant 64 : index
    %c0_43 = arith.constant 0 : index
    %62 = vector.load %arg7[%c64, %c0_43] : memref<216x256xf32, #tpu.memory_space<vmem>>, vector<8x256xf32>
    tpu.vector_store %arg7[%c64, %c0_43], %61 {strides = array<i32>} : memref<216x256xf32, #tpu.memory_space<vmem>>, vector<8x256xf32>,
    %c14_i32 = arith.constant 14 : i32
    %63 = tpu.dynamic_rotate %17 by %c14_i32 dim 1 : vector<8x256xf32>, i32 -> vector<8x256xf32>
    %c9 = arith.constant 9 : index
    %c0_44 = arith.constant 0 : index
    %64 = vector.load %arg1[%c9, %c0_44] : memref<25x256xf32, #tpu.memory_space<vmem>>, vector<1x256xf32>
    %65 = vector.broadcast %64 : vector<1x256xf32> to vector<8x256xf32>
    %66 = arith.mulf %63, %65 : vector<8x256xf32>
    %c72 = arith.constant 72 : index
    %c0_45 = arith.constant 0 : index
    %67 = vector.load %arg7[%c72, %c0_45] : memref<216x256xf32, #tpu.memory_space<vmem>>, vector<8x256xf32>
    tpu.vector_store %arg7[%c72, %c0_45], %66 {strides = array<i32>} : memref<216x256xf32, #tpu.memory_space<vmem>>, vector<8x256xf32>,
    %c2_i32 = arith.constant 2 : i32
    %68 = tpu.dynamic_rotate %17 by %c2_i32 dim 1 : vector<8x256xf32>, i32 -> vector<8x256xf32>
    %c10 = arith.constant 10 : index
    %c0_46 = arith.constant 0 : index
    %69 = vector.load %arg1[%c10, %c0_46] : memref<25x256xf32, #tpu.memory_space<vmem>>, vector<1x256xf32>
    %70 = vector.broadcast %69 : vector<1x256xf32> to vector<8x256xf32>
    %71 = arith.mulf %68, %70 : vector<8x256xf32>
    %c80 = arith.constant 80 : index
    %c0_47 = arith.constant 0 : index
    %72 = vector.load %arg7[%c80, %c0_47] : memref<216x256xf32, #tpu.memory_space<vmem>>, vector<8x256xf32>
    tpu.vector_store %arg7[%c80, %c0_47], %71 {strides = array<i32>} : memref<216x256xf32, #tpu.memory_space<vmem>>, vector<8x256xf32>,
    %c1_i32 = arith.constant 1 : i32
    %73 = tpu.dynamic_rotate %17 by %c1_i32 dim 1 : vector<8x256xf32>, i32 -> vector<8x256xf32>
    %c11 = arith.constant 11 : index
    %c0_48 = arith.constant 0 : index
    %74 = vector.load %arg1[%c11, %c0_48] : memref<25x256xf32, #tpu.memory_space<vmem>>, vector<1x256xf32>
    %75 = vector.broadcast %74 : vector<1x256xf32> to vector<8x256xf32>
    %76 = arith.mulf %73, %75 : vector<8x256xf32>
    %c88 = arith.constant 88 : index
    %c0_49 = arith.constant 0 : index
    %77 = vector.load %arg7[%c88, %c0_49] : memref<216x256xf32, #tpu.memory_space<vmem>>, vector<8x256xf32>
    tpu.vector_store %arg7[%c88, %c0_49], %76 {strides = array<i32>} : memref<216x256xf32, #tpu.memory_space<vmem>>, vector<8x256xf32>,
    %c96 = arith.constant 96 : index
    %c0_50 = arith.constant 0 : index
    %78 = vector.load %arg7[%c96, %c0_50] : memref<216x256xf32, #tpu.memory_space<vmem>>, vector<8x256xf32>
    tpu.vector_store %arg7[%c96, %c0_50], %17 {strides = array<i32>} : memref<216x256xf32, #tpu.memory_space<vmem>>, vector<8x256xf32>,
    %c255_i32 = arith.constant 255 : i32
    %79 = tpu.dynamic_rotate %17 by %c255_i32 dim 1 : vector<8x256xf32>, i32 -> vector<8x256xf32>
    %c13 = arith.constant 13 : index
    %c0_51 = arith.constant 0 : index
    %80 = vector.load %arg1[%c13, %c0_51] : memref<25x256xf32, #tpu.memory_space<vmem>>, vector<1x256xf32>
    %81 = vector.broadcast %80 : vector<1x256xf32> to vector<8x256xf32>
    %82 = arith.mulf %79, %81 : vector<8x256xf32>
    %c104 = arith.constant 104 : index
    %c0_52 = arith.constant 0 : index
    %83 = vector.load %arg7[%c104, %c0_52] : memref<216x256xf32, #tpu.memory_space<vmem>>, vector<8x256xf32>
    tpu.vector_store %arg7[%c104, %c0_52], %82 {strides = array<i32>} : memref<216x256xf32, #tpu.memory_space<vmem>>, vector<8x256xf32>,
    %c254_i32 = arith.constant 254 : i32
    %84 = tpu.dynamic_rotate %17 by %c254_i32 dim 1 : vector<8x256xf32>, i32 -> vector<8x256xf32>
    %c14 = arith.constant 14 : index
    %c0_53 = arith.constant 0 : index
    %85 = vector.load %arg1[%c14, %c0_53] : memref<25x256xf32, #tpu.memory_space<vmem>>, vector<1x256xf32>
    %86 = vector.broadcast %85 : vector<1x256xf32> to vector<8x256xf32>
    %87 = arith.mulf %84, %86 : vector<8x256xf32>
    %c112 = arith.constant 112 : index
    %c0_54 = arith.constant 0 : index
    %88 = vector.load %arg7[%c112, %c0_54] : memref<216x256xf32, #tpu.memory_space<vmem>>, vector<8x256xf32>
    tpu.vector_store %arg7[%c112, %c0_54], %87 {strides = array<i32>} : memref<216x256xf32, #tpu.memory_space<vmem>>, vector<8x256xf32>,
    %c242_i32 = arith.constant 242 : i32
    %89 = tpu.dynamic_rotate %17 by %c242_i32 dim 1 : vector<8x256xf32>, i32 -> vector<8x256xf32>
    %c15 = arith.constant 15 : index
    %c0_55 = arith.constant 0 : index
    %90 = vector.load %arg1[%c15, %c0_55] : memref<25x256xf32, #tpu.memory_space<vmem>>, vector<1x256xf32>
    %91 = vector.broadcast %90 : vector<1x256xf32> to vector<8x256xf32>
    %92 = arith.mulf %89, %91 : vector<8x256xf32>
    %c120 = arith.constant 120 : index
    %c0_56 = arith.constant 0 : index
    %93 = vector.load %arg7[%c120, %c0_56] : memref<216x256xf32, #tpu.memory_space<vmem>>, vector<8x256xf32>
    tpu.vector_store %arg7[%c120, %c0_56], %92 {strides = array<i32>} : memref<216x256xf32, #tpu.memory_space<vmem>>, vector<8x256xf32>,
    %c241_i32 = arith.constant 241 : i32
    %94 = tpu.dynamic_rotate %17 by %c241_i32 dim 1 : vector<8x256xf32>, i32 -> vector<8x256xf32>
    %c16_57 = arith.constant 16 : index
    %c0_58 = arith.constant 0 : index
    %95 = vector.load %arg1[%c16_57, %c0_58] : memref<25x256xf32, #tpu.memory_space<vmem>>, vector<1x256xf32>
    %96 = vector.broadcast %95 : vector<1x256xf32> to vector<8x256xf32>
    %97 = arith.mulf %94, %96 : vector<8x256xf32>
    %c128 = arith.constant 128 : index
    %c0_59 = arith.constant 0 : index
    %98 = vector.load %arg7[%c128, %c0_59] : memref<216x256xf32, #tpu.memory_space<vmem>>, vector<8x256xf32>
    tpu.vector_store %arg7[%c128, %c0_59], %97 {strides = array<i32>} : memref<216x256xf32, #tpu.memory_space<vmem>>, vector<8x256xf32>,
    %c240_i32 = arith.constant 240 : i32
    %99 = tpu.dynamic_rotate %17 by %c240_i32 dim 1 : vector<8x256xf32>, i32 -> vector<8x256xf32>
    %c17 = arith.constant 17 : index
    %c0_60 = arith.constant 0 : index
    %100 = vector.load %arg1[%c17, %c0_60] : memref<25x256xf32, #tpu.memory_space<vmem>>, vector<1x256xf32>
    %101 = vector.broadcast %100 : vector<1x256xf32> to vector<8x256xf32>
    %102 = arith.mulf %99, %101 : vector<8x256xf32>
    %c136 = arith.constant 136 : index
    %c0_61 = arith.constant 0 : index
    %103 = vector.load %arg7[%c136, %c0_61] : memref<216x256xf32, #tpu.memory_space<vmem>>, vector<8x256xf32>
    tpu.vector_store %arg7[%c136, %c0_61], %102 {strides = array<i32>} : memref<216x256xf32, #tpu.memory_space<vmem>>, vector<8x256xf32>,
    %c239_i32 = arith.constant 239 : i32
    %104 = tpu.dynamic_rotate %17 by %c239_i32 dim 1 : vector<8x256xf32>, i32 -> vector<8x256xf32>
    %c18 = arith.constant 18 : index
    %c0_62 = arith.constant 0 : index
    %105 = vector.load %arg1[%c18, %c0_62] : memref<25x256xf32, #tpu.memory_space<vmem>>, vector<1x256xf32>
    %106 = vector.broadcast %105 : vector<1x256xf32> to vector<8x256xf32>
    %107 = arith.mulf %104, %106 : vector<8x256xf32>
    %c144 = arith.constant 144 : index
    %c0_63 = arith.constant 0 : index
    %108 = vector.load %arg7[%c144, %c0_63] : memref<216x256xf32, #tpu.memory_space<vmem>>, vector<8x256xf32>
    tpu.vector_store %arg7[%c144, %c0_63], %107 {strides = array<i32>} : memref<216x256xf32, #tpu.memory_space<vmem>>, vector<8x256xf32>,
    %c238_i32 = arith.constant 238 : i32
    %109 = tpu.dynamic_rotate %17 by %c238_i32 dim 1 : vector<8x256xf32>, i32 -> vector<8x256xf32>
    %c19 = arith.constant 19 : index
    %c0_64 = arith.constant 0 : index
    %110 = vector.load %arg1[%c19, %c0_64] : memref<25x256xf32, #tpu.memory_space<vmem>>, vector<1x256xf32>
    %111 = vector.broadcast %110 : vector<1x256xf32> to vector<8x256xf32>
    %112 = arith.mulf %109, %111 : vector<8x256xf32>
    %c152 = arith.constant 152 : index
    %c0_65 = arith.constant 0 : index
    %113 = vector.load %arg7[%c152, %c0_65] : memref<216x256xf32, #tpu.memory_space<vmem>>, vector<8x256xf32>
    tpu.vector_store %arg7[%c152, %c0_65], %112 {strides = array<i32>} : memref<216x256xf32, #tpu.memory_space<vmem>>, vector<8x256xf32>,
    %c226_i32 = arith.constant 226 : i32
    %114 = tpu.dynamic_rotate %17 by %c226_i32 dim 1 : vector<8x256xf32>, i32 -> vector<8x256xf32>
    %c20 = arith.constant 20 : index
    %c0_66 = arith.constant 0 : index
    %115 = vector.load %arg1[%c20, %c0_66] : memref<25x256xf32, #tpu.memory_space<vmem>>, vector<1x256xf32>
    %116 = vector.broadcast %115 : vector<1x256xf32> to vector<8x256xf32>
    %117 = arith.mulf %114, %116 : vector<8x256xf32>
    %c160 = arith.constant 160 : index
    %c0_67 = arith.constant 0 : index
    %118 = vector.load %arg7[%c160, %c0_67] : memref<216x256xf32, #tpu.memory_space<vmem>>, vector<8x256xf32>
    tpu.vector_store %arg7[%c160, %c0_67], %117 {strides = array<i32>} : memref<216x256xf32, #tpu.memory_space<vmem>>, vector<8x256xf32>,
    %c225_i32 = arith.constant 225 : i32
    %119 = tpu.dynamic_rotate %17 by %c225_i32 dim 1 : vector<8x256xf32>, i32 -> vector<8x256xf32>
    %c21 = arith.constant 21 : index
    %c0_68 = arith.constant 0 : index
    %120 = vector.load %arg1[%c21, %c0_68] : memref<25x256xf32, #tpu.memory_space<vmem>>, vector<1x256xf32>
    %121 = vector.broadcast %120 : vector<1x256xf32> to vector<8x256xf32>
    %122 = arith.mulf %119, %121 : vector<8x256xf32>
    %c168 = arith.constant 168 : index
    %c0_69 = arith.constant 0 : index
    %123 = vector.load %arg7[%c168, %c0_69] : memref<216x256xf32, #tpu.memory_space<vmem>>, vector<8x256xf32>
    tpu.vector_store %arg7[%c168, %c0_69], %122 {strides = array<i32>} : memref<216x256xf32, #tpu.memory_space<vmem>>, vector<8x256xf32>,
    %c224_i32 = arith.constant 224 : i32
    %124 = tpu.dynamic_rotate %17 by %c224_i32 dim 1 : vector<8x256xf32>, i32 -> vector<8x256xf32>
    %c22 = arith.constant 22 : index
    %c0_70 = arith.constant 0 : index
    %125 = vector.load %arg1[%c22, %c0_70] : memref<25x256xf32, #tpu.memory_space<vmem>>, vector<1x256xf32>
    %126 = vector.broadcast %125 : vector<1x256xf32> to vector<8x256xf32>
    %127 = arith.mulf %124, %126 : vector<8x256xf32>
    %c176 = arith.constant 176 : index
    %c0_71 = arith.constant 0 : index
    %128 = vector.load %arg7[%c176, %c0_71] : memref<216x256xf32, #tpu.memory_space<vmem>>, vector<8x256xf32>
    tpu.vector_store %arg7[%c176, %c0_71], %127 {strides = array<i32>} : memref<216x256xf32, #tpu.memory_space<vmem>>, vector<8x256xf32>,
    %c223_i32 = arith.constant 223 : i32
    %129 = tpu.dynamic_rotate %17 by %c223_i32 dim 1 : vector<8x256xf32>, i32 -> vector<8x256xf32>
    %c23 = arith.constant 23 : index
    %c0_72 = arith.constant 0 : index
    %130 = vector.load %arg1[%c23, %c0_72] : memref<25x256xf32, #tpu.memory_space<vmem>>, vector<1x256xf32>
    %131 = vector.broadcast %130 : vector<1x256xf32> to vector<8x256xf32>
    %132 = arith.mulf %129, %131 : vector<8x256xf32>
    %c184 = arith.constant 184 : index
    %c0_73 = arith.constant 0 : index
    %133 = vector.load %arg7[%c184, %c0_73] : memref<216x256xf32, #tpu.memory_space<vmem>>, vector<8x256xf32>
    tpu.vector_store %arg7[%c184, %c0_73], %132 {strides = array<i32>} : memref<216x256xf32, #tpu.memory_space<vmem>>, vector<8x256xf32>,
    %c222_i32 = arith.constant 222 : i32
    %134 = tpu.dynamic_rotate %17 by %c222_i32 dim 1 : vector<8x256xf32>, i32 -> vector<8x256xf32>
    %c24_74 = arith.constant 24 : index
    %c0_75 = arith.constant 0 : index
    %135 = vector.load %arg1[%c24_74, %c0_75] : memref<25x256xf32, #tpu.memory_space<vmem>>, vector<1x256xf32>
    %136 = vector.broadcast %135 : vector<1x256xf32> to vector<8x256xf32>
    %137 = arith.mulf %134, %136 : vector<8x256xf32>
    %c192 = arith.constant 192 : index
    %c0_76 = arith.constant 0 : index
    %138 = vector.load %arg7[%c192, %c0_76] : memref<216x256xf32, #tpu.memory_space<vmem>>, vector<8x256xf32>
    tpu.vector_store %arg7[%c192, %c0_76], %137 {strides = array<i32>} : memref<216x256xf32, #tpu.memory_space<vmem>>, vector<8x256xf32>,
    %c96_77 = arith.constant 96 : index
    %c0_78 = arith.constant 0 : index
    %139 = vector.load %arg7[%c96_77, %c0_78] : memref<216x256xf32, #tpu.memory_space<vmem>>, vector<8x256xf32>
    %c104_79 = arith.constant 104 : index
    %c0_80 = arith.constant 0 : index
    %140 = vector.load %arg7[%c104_79, %c0_80] : memref<216x256xf32, #tpu.memory_space<vmem>>, vector<8x256xf32>
    %c136_81 = arith.constant 136 : index
    %c0_82 = arith.constant 0 : index
    %141 = vector.load %arg7[%c136_81, %c0_82] : memref<216x256xf32, #tpu.memory_space<vmem>>, vector<8x256xf32>
    %c144_83 = arith.constant 144 : index
    %c0_84 = arith.constant 0 : index
    %142 = vector.load %arg7[%c144_83, %c0_84] : memref<216x256xf32, #tpu.memory_space<vmem>>, vector<8x256xf32>
    %143 = arith.maximumf %139, %140 : vector<8x256xf32>
    %144 = arith.maximumf %141, %142 : vector<8x256xf32>
    %145 = arith.maximumf %143, %144 : vector<8x256xf32>
    %c200 = arith.constant 200 : index
    %c0_85 = arith.constant 0 : index
    %146 = vector.load %arg7[%c200, %c0_85] : memref<216x256xf32, #tpu.memory_space<vmem>>, vector<8x256xf32>
    tpu.vector_store %arg7[%c200, %c0_85], %145 {strides = array<i32>} : memref<216x256xf32, #tpu.memory_space<vmem>>, vector<8x256xf32>,
    %147 = arith.addf %139, %140 : vector<8x256xf32>
    %148 = arith.addf %147, %141 : vector<8x256xf32>
    %149 = arith.addf %148, %142 : vector<8x256xf32>
    %cst_86 = arith.constant 2.500000e-01 : f32
    %150 = vector.broadcast %cst_86 : f32 to vector<8x256xf32>
    %151 = arith.mulf %149, %150 : vector<8x256xf32>
    %c208 = arith.constant 208 : index
    %c0_87 = arith.constant 0 : index
    %152 = vector.load %arg7[%c208, %c0_87] : memref<216x256xf32, #tpu.memory_space<vmem>>, vector<8x256xf32>
    tpu.vector_store %arg7[%c208, %c0_87], %151 {strides = array<i32>} : memref<216x256xf32, #tpu.memory_space<vmem>>, vector<8x256xf32>,
    %c0_88 = arith.constant 0 : index
    %c0_89 = arith.constant 0 : index
    %153 = vector.load %arg4[%c0_88, %c0_89] : memref<112x216xf32, #tpu.memory_space<vmem>>, vector<32x216xf32>
    %c0_90 = arith.constant 0 : index
    %c0_91 = arith.constant 0 : index
    %154 = vector.load %arg7[%c0_90, %c0_91] : memref<216x256xf32, #tpu.memory_space<vmem>>, vector<216x256xf32>
    %cst_92 = arith.constant dense<0.000000e+00> : vector<32x256xf32>
    %155 = tpu.matmul %153, %154, %cst_92 {dimension_numbers = #tpu.dot_dimension_numbers<[1], [0], [0], [1], [0, 0, 1, 1], [], []>} : vector<32x216xf32>, vector<216x256xf32>, vector<32x256xf32> -> vector<32x256xf32>
    %156 = vector.extract_strided_slice %155 {offsets = [0, 0], sizes = [8, 256], strides = [1, 1]} : vector<32x256xf32> to vector<8x256xf32>
    %c2_93 = arith.constant 2 : index
    %c0_94 = arith.constant 0 : index
    %c0_95 = arith.constant 0 : index
    %157 = vector.load %arg6[%c2_93, %c0_94, %c0_95] : memref<6x8x256xf32, #tpu.memory_space<vmem>>, vector<1x8x256xf32>
    %158 = vector.shape_cast %157 : vector<1x8x256xf32> to vector<8x256xf32>
    %159 = vector.shape_cast %156 : vector<8x256xf32> to vector<1x8x256xf32>
    tpu.vector_store %arg6[%c2_93, %c0_94, %c0_95], %159 {strides = array<i32>} : memref<6x8x256xf32, #tpu.memory_space<vmem>>, vector<1x8x256xf32>,
    %160 = vector.extract_strided_slice %155 {offsets = [8, 0], sizes = [8, 256], strides = [1, 1]} : vector<32x256xf32> to vector<8x256xf32>
    %c3_96 = arith.constant 3 : index
    %c0_97 = arith.constant 0 : index
    %c0_98 = arith.constant 0 : index
    %161 = vector.load %arg6[%c3_96, %c0_97, %c0_98] : memref<6x8x256xf32, #tpu.memory_space<vmem>>, vector<1x8x256xf32>
    %162 = vector.shape_cast %161 : vector<1x8x256xf32> to vector<8x256xf32>
    %163 = vector.shape_cast %160 : vector<8x256xf32> to vector<1x8x256xf32>
    tpu.vector_store %arg6[%c3_96, %c0_97, %c0_98], %163 {strides = array<i32>} : memref<6x8x256xf32, #tpu.memory_space<vmem>>, vector<1x8x256xf32>,
    %164 = vector.extract_strided_slice %155 {offsets = [16, 0], sizes = [8, 256], strides = [1, 1]} : vector<32x256xf32> to vector<8x256xf32>
    %c4_99 = arith.constant 4 : index
    %c0_100 = arith.constant 0 : index
    %c0_101 = arith.constant 0 : index
    %165 = vector.load %arg6[%c4_99, %c0_100, %c0_101] : memref<6x8x256xf32, #tpu.memory_space<vmem>>, vector<1x8x256xf32>
    %166 = vector.shape_cast %165 : vector<1x8x256xf32> to vector<8x256xf32>
    %167 = vector.shape_cast %164 : vector<8x256xf32> to vector<1x8x256xf32>
    tpu.vector_store %arg6[%c4_99, %c0_100, %c0_101], %167 {strides = array<i32>} : memref<6x8x256xf32, #tpu.memory_space<vmem>>, vector<1x8x256xf32>,
    %168 = vector.extract_strided_slice %155 {offsets = [24, 0], sizes = [8, 256], strides = [1, 1]} : vector<32x256xf32> to vector<8x256xf32>
    %c5_102 = arith.constant 5 : index
    %c0_103 = arith.constant 0 : index
    %c0_104 = arith.constant 0 : index
    %169 = vector.load %arg6[%c5_102, %c0_103, %c0_104] : memref<6x8x256xf32, #tpu.memory_space<vmem>>, vector<1x8x256xf32>
    %170 = vector.shape_cast %169 : vector<1x8x256xf32> to vector<8x256xf32>
    %171 = vector.shape_cast %168 : vector<8x256xf32> to vector<1x8x256xf32>
    tpu.vector_store %arg6[%c5_102, %c0_103, %c0_104], %171 {strides = array<i32>} : memref<6x8x256xf32, #tpu.memory_space<vmem>>, vector<1x8x256xf32>,
    %c1_105 = arith.constant 1 : index
    %c0_106 = arith.constant 0 : index
    %c0_107 = arith.constant 0 : index
    %172 = vector.load %arg6[%c1_105, %c0_106, %c0_107] : memref<6x8x256xf32, #tpu.memory_space<vmem>>, vector<1x8x256xf32>
    %173 = vector.shape_cast %172 : vector<1x8x256xf32> to vector<8x256xf32>
    %c34_i32_108 = arith.constant 34 : i32
    %174 = tpu.dynamic_rotate %173 by %c34_i32_108 dim 1 : vector<8x256xf32>, i32 -> vector<8x256xf32>
    %c0_109 = arith.constant 0 : index
    %c0_110 = arith.constant 0 : index
    %175 = vector.load %arg1[%c0_109, %c0_110] : memref<25x256xf32, #tpu.memory_space<vmem>>, vector<1x256xf32>
    %176 = vector.broadcast %175 : vector<1x256xf32> to vector<8x256xf32>
    %177 = arith.mulf %174, %176 : vector<8x256xf32>
    %c0_111 = arith.constant 0 : index
    %c0_112 = arith.constant 0 : index
    %178 = vector.load %arg7[%c0_111, %c0_112] : memref<216x256xf32, #tpu.memory_space<vmem>>, vector<8x256xf32>
    tpu.vector_store %arg7[%c0_111, %c0_112], %177 {strides = array<i32>} : memref<216x256xf32, #tpu.memory_space<vmem>>, vector<8x256xf32>,
    %c33_i32_113 = arith.constant 33 : i32
    %179 = tpu.dynamic_rotate %173 by %c33_i32_113 dim 1 : vector<8x256xf32>, i32 -> vector<8x256xf32>
    %c1_114 = arith.constant 1 : index
    %c0_115 = arith.constant 0 : index
    %180 = vector.load %arg1[%c1_114, %c0_115] : memref<25x256xf32, #tpu.memory_space<vmem>>, vector<1x256xf32>
    %181 = vector.broadcast %180 : vector<1x256xf32> to vector<8x256xf32>
    %182 = arith.mulf %179, %181 : vector<8x256xf32>
    %c8_116 = arith.constant 8 : index
    %c0_117 = arith.constant 0 : index
    %183 = vector.load %arg7[%c8_116, %c0_117] : memref<216x256xf32, #tpu.memory_space<vmem>>, vector<8x256xf32>
    tpu.vector_store %arg7[%c8_116, %c0_117], %182 {strides = array<i32>} : memref<216x256xf32, #tpu.memory_space<vmem>>, vector<8x256xf32>,
    %c32_i32_118 = arith.constant 32 : i32
    %184 = tpu.dynamic_rotate %173 by %c32_i32_118 dim 1 : vector<8x256xf32>, i32 -> vector<8x256xf32>
    %c2_119 = arith.constant 2 : index
    %c0_120 = arith.constant 0 : index
    %185 = vector.load %arg1[%c2_119, %c0_120] : memref<25x256xf32, #tpu.memory_space<vmem>>, vector<1x256xf32>
    %186 = vector.broadcast %185 : vector<1x256xf32> to vector<8x256xf32>
    %187 = arith.mulf %184, %186 : vector<8x256xf32>
    %c16_121 = arith.constant 16 : index
    %c0_122 = arith.constant 0 : index
    %188 = vector.load %arg7[%c16_121, %c0_122] : memref<216x256xf32, #tpu.memory_space<vmem>>, vector<8x256xf32>
    tpu.vector_store %arg7[%c16_121, %c0_122], %187 {strides = array<i32>} : memref<216x256xf32, #tpu.memory_space<vmem>>, vector<8x256xf32>,
    %c31_i32_123 = arith.constant 31 : i32
    %189 = tpu.dynamic_rotate %173 by %c31_i32_123 dim 1 : vector<8x256xf32>, i32 -> vector<8x256xf32>
    %c3_124 = arith.constant 3 : index
    %c0_125 = arith.constant 0 : index
    %190 = vector.load %arg1[%c3_124, %c0_125] : memref<25x256xf32, #tpu.memory_space<vmem>>, vector<1x256xf32>
    %191 = vector.broadcast %190 : vector<1x256xf32> to vector<8x256xf32>
    %192 = arith.mulf %189, %191 : vector<8x256xf32>
    %c24_126 = arith.constant 24 : index
    %c0_127 = arith.constant 0 : index
    %193 = vector.load %arg7[%c24_126, %c0_127] : memref<216x256xf32, #tpu.memory_space<vmem>>, vector<8x256xf32>
    tpu.vector_store %arg7[%c24_126, %c0_127], %192 {strides = array<i32>} : memref<216x256xf32, #tpu.memory_space<vmem>>, vector<8x256xf32>,
    %c30_i32_128 = arith.constant 30 : i32
    %194 = tpu.dynamic_rotate %173 by %c30_i32_128 dim 1 : vector<8x256xf32>, i32 -> vector<8x256xf32>
    %c4_129 = arith.constant 4 : index
    %c0_130 = arith.constant 0 : index
    %195 = vector.load %arg1[%c4_129, %c0_130] : memref<25x256xf32, #tpu.memory_space<vmem>>, vector<1x256xf32>
    %196 = vector.broadcast %195 : vector<1x256xf32> to vector<8x256xf32>
    %197 = arith.mulf %194, %196 : vector<8x256xf32>
    %c32_131 = arith.constant 32 : index
    %c0_132 = arith.constant 0 : index
    %198 = vector.load %arg7[%c32_131, %c0_132] : memref<216x256xf32, #tpu.memory_space<vmem>>, vector<8x256xf32>
    tpu.vector_store %arg7[%c32_131, %c0_132], %197 {strides = array<i32>} : memref<216x256xf32, #tpu.memory_space<vmem>>, vector<8x256xf32>,
    %c18_i32_133 = arith.constant 18 : i32
    %199 = tpu.dynamic_rotate %173 by %c18_i32_133 dim 1 : vector<8x256xf32>, i32 -> vector<8x256xf32>
    %c5_134 = arith.constant 5 : index
    %c0_135 = arith.constant 0 : index
    %200 = vector.load %arg1[%c5_134, %c0_135] : memref<25x256xf32, #tpu.memory_space<vmem>>, vector<1x256xf32>
    %201 = vector.broadcast %200 : vector<1x256xf32> to vector<8x256xf32>
    %202 = arith.mulf %199, %201 : vector<8x256xf32>
    %c40_136 = arith.constant 40 : index
    %c0_137 = arith.constant 0 : index
    %203 = vector.load %arg7[%c40_136, %c0_137] : memref<216x256xf32, #tpu.memory_space<vmem>>, vector<8x256xf32>
    tpu.vector_store %arg7[%c40_136, %c0_137], %202 {strides = array<i32>} : memref<216x256xf32, #tpu.memory_space<vmem>>, vector<8x256xf32>,
    %c17_i32_138 = arith.constant 17 : i32
    %204 = tpu.dynamic_rotate %173 by %c17_i32_138 dim 1 : vector<8x256xf32>, i32 -> vector<8x256xf32>
    %c6_139 = arith.constant 6 : index
    %c0_140 = arith.constant 0 : index
    %205 = vector.load %arg1[%c6_139, %c0_140] : memref<25x256xf32, #tpu.memory_space<vmem>>, vector<1x256xf32>
    %206 = vector.broadcast %205 : vector<1x256xf32> to vector<8x256xf32>
    %207 = arith.mulf %204, %206 : vector<8x256xf32>
    %c48_141 = arith.constant 48 : index
    %c0_142 = arith.constant 0 : index
    %208 = vector.load %arg7[%c48_141, %c0_142] : memref<216x256xf32, #tpu.memory_space<vmem>>, vector<8x256xf32>
    tpu.vector_store %arg7[%c48_141, %c0_142], %207 {strides = array<i32>} : memref<216x256xf32, #tpu.memory_space<vmem>>, vector<8x256xf32>,
    %c16_i32_143 = arith.constant 16 : i32
    %209 = tpu.dynamic_rotate %173 by %c16_i32_143 dim 1 : vector<8x256xf32>, i32 -> vector<8x256xf32>
    %c7_144 = arith.constant 7 : index
    %c0_145 = arith.constant 0 : index
    %210 = vector.load %arg1[%c7_144, %c0_145] : memref<25x256xf32, #tpu.memory_space<vmem>>, vector<1x256xf32>
    %211 = vector.broadcast %210 : vector<1x256xf32> to vector<8x256xf32>
    %212 = arith.mulf %209, %211 : vector<8x256xf32>
    %c56_146 = arith.constant 56 : index
    %c0_147 = arith.constant 0 : index
    %213 = vector.load %arg7[%c56_146, %c0_147] : memref<216x256xf32, #tpu.memory_space<vmem>>, vector<8x256xf32>
    tpu.vector_store %arg7[%c56_146, %c0_147], %212 {strides = array<i32>} : memref<216x256xf32, #tpu.memory_space<vmem>>, vector<8x256xf32>,
    %c15_i32_148 = arith.constant 15 : i32
    %214 = tpu.dynamic_rotate %173 by %c15_i32_148 dim 1 : vector<8x256xf32>, i32 -> vector<8x256xf32>
    %c8_149 = arith.constant 8 : index
    %c0_150 = arith.constant 0 : index
    %215 = vector.load %arg1[%c8_149, %c0_150] : memref<25x256xf32, #tpu.memory_space<vmem>>, vector<1x256xf32>
    %216 = vector.broadcast %215 : vector<1x256xf32> to vector<8x256xf32>
    %217 = arith.mulf %214, %216 : vector<8x256xf32>
    %c64_151 = arith.constant 64 : index
    %c0_152 = arith.constant 0 : index
    %218 = vector.load %arg7[%c64_151, %c0_152] : memref<216x256xf32, #tpu.memory_space<vmem>>, vector<8x256xf32>
    tpu.vector_store %arg7[%c64_151, %c0_152], %217 {strides = array<i32>} : memref<216x256xf32, #tpu.memory_space<vmem>>, vector<8x256xf32>,
    %c14_i32_153 = arith.constant 14 : i32
    %219 = tpu.dynamic_rotate %173 by %c14_i32_153 dim 1 : vector<8x256xf32>, i32 -> vector<8x256xf32>
    %c9_154 = arith.constant 9 : index
    %c0_155 = arith.constant 0 : index
    %220 = vector.load %arg1[%c9_154, %c0_155] : memref<25x256xf32, #tpu.memory_space<vmem>>, vector<1x256xf32>
    %221 = vector.broadcast %220 : vector<1x256xf32> to vector<8x256xf32>
    %222 = arith.mulf %219, %221 : vector<8x256xf32>
    %c72_156 = arith.constant 72 : index
    %c0_157 = arith.constant 0 : index
    %223 = vector.load %arg7[%c72_156, %c0_157] : memref<216x256xf32, #tpu.memory_space<vmem>>, vector<8x256xf32>
    tpu.vector_store %arg7[%c72_156, %c0_157], %222 {strides = array<i32>} : memref<216x256xf32, #tpu.memory_space<vmem>>, vector<8x256xf32>,
    %c2_i32_158 = arith.constant 2 : i32
    %224 = tpu.dynamic_rotate %173 by %c2_i32_158 dim 1 : vector<8x256xf32>, i32 -> vector<8x256xf32>
    %c10_159 = arith.constant 10 : index
    %c0_160 = arith.constant 0 : index
    %225 = vector.load %arg1[%c10_159, %c0_160] : memref<25x256xf32, #tpu.memory_space<vmem>>, vector<1x256xf32>
    %226 = vector.broadcast %225 : vector<1x256xf32> to vector<8x256xf32>
    %227 = arith.mulf %224, %226 : vector<8x256xf32>
    %c80_161 = arith.constant 80 : index
    %c0_162 = arith.constant 0 : index
    %228 = vector.load %arg7[%c80_161, %c0_162] : memref<216x256xf32, #tpu.memory_space<vmem>>, vector<8x256xf32>
    tpu.vector_store %arg7[%c80_161, %c0_162], %227 {strides = array<i32>} : memref<216x256xf32, #tpu.memory_space<vmem>>, vector<8x256xf32>,
    %c1_i32_163 = arith.constant 1 : i32
    %229 = tpu.dynamic_rotate %173 by %c1_i32_163 dim 1 : vector<8x256xf32>, i32 -> vector<8x256xf32>
    %c11_164 = arith.constant 11 : index
    %c0_165 = arith.constant 0 : index
    %230 = vector.load %arg1[%c11_164, %c0_165] : memref<25x256xf32, #tpu.memory_space<vmem>>, vector<1x256xf32>
    %231 = vector.broadcast %230 : vector<1x256xf32> to vector<8x256xf32>
    %232 = arith.mulf %229, %231 : vector<8x256xf32>
    %c88_166 = arith.constant 88 : index
    %c0_167 = arith.constant 0 : index
    %233 = vector.load %arg7[%c88_166, %c0_167] : memref<216x256xf32, #tpu.memory_space<vmem>>, vector<8x256xf32>
    tpu.vector_store %arg7[%c88_166, %c0_167], %232 {strides = array<i32>} : memref<216x256xf32, #tpu.memory_space<vmem>>, vector<8x256xf32>,
    %c96_168 = arith.constant 96 : index
    %c0_169 = arith.constant 0 : index
    %234 = vector.load %arg7[%c96_168, %c0_169] : memref<216x256xf32, #tpu.memory_space<vmem>>, vector<8x256xf32>
    tpu.vector_store %arg7[%c96_168, %c0_169], %173 {strides = array<i32>} : memref<216x256xf32, #tpu.memory_space<vmem>>, vector<8x256xf32>,
    %c255_i32_170 = arith.constant 255 : i32
    %235 = tpu.dynamic_rotate %173 by %c255_i32_170 dim 1 : vector<8x256xf32>, i32 -> vector<8x256xf32>
    %c13_171 = arith.constant 13 : index
    %c0_172 = arith.constant 0 : index
    %236 = vector.load %arg1[%c13_171, %c0_172] : memref<25x256xf32, #tpu.memory_space<vmem>>, vector<1x256xf32>
    %237 = vector.broadcast %236 : vector<1x256xf32> to vector<8x256xf32>
    %238 = arith.mulf %235, %237 : vector<8x256xf32>
    %c104_173 = arith.constant 104 : index
    %c0_174 = arith.constant 0 : index
    %239 = vector.load %arg7[%c104_173, %c0_174] : memref<216x256xf32, #tpu.memory_space<vmem>>, vector<8x256xf32>
    tpu.vector_store %arg7[%c104_173, %c0_174], %238 {strides = array<i32>} : memref<216x256xf32, #tpu.memory_space<vmem>>, vector<8x256xf32>,
    %c254_i32_175 = arith.constant 254 : i32
    %240 = tpu.dynamic_rotate %173 by %c254_i32_175 dim 1 : vector<8x256xf32>, i32 -> vector<8x256xf32>
    %c14_176 = arith.constant 14 : index
    %c0_177 = arith.constant 0 : index
    %241 = vector.load %arg1[%c14_176, %c0_177] : memref<25x256xf32, #tpu.memory_space<vmem>>, vector<1x256xf32>
    %242 = vector.broadcast %241 : vector<1x256xf32> to vector<8x256xf32>
    %243 = arith.mulf %240, %242 : vector<8x256xf32>
    %c112_178 = arith.constant 112 : index
    %c0_179 = arith.constant 0 : index
    %244 = vector.load %arg7[%c112_178, %c0_179] : memref<216x256xf32, #tpu.memory_space<vmem>>, vector<8x256xf32>
    tpu.vector_store %arg7[%c112_178, %c0_179], %243 {strides = array<i32>} : memref<216x256xf32, #tpu.memory_space<vmem>>, vector<8x256xf32>,
    %c242_i32_180 = arith.constant 242 : i32
    %245 = tpu.dynamic_rotate %173 by %c242_i32_180 dim 1 : vector<8x256xf32>, i32 -> vector<8x256xf32>
    %c15_181 = arith.constant 15 : index
    %c0_182 = arith.constant 0 : index
    %246 = vector.load %arg1[%c15_181, %c0_182] : memref<25x256xf32, #tpu.memory_space<vmem>>, vector<1x256xf32>
    %247 = vector.broadcast %246 : vector<1x256xf32> to vector<8x256xf32>
    %248 = arith.mulf %245, %247 : vector<8x256xf32>
    %c120_183 = arith.constant 120 : index
    %c0_184 = arith.constant 0 : index
    %249 = vector.load %arg7[%c120_183, %c0_184] : memref<216x256xf32, #tpu.memory_space<vmem>>, vector<8x256xf32>
    tpu.vector_store %arg7[%c120_183, %c0_184], %248 {strides = array<i32>} : memref<216x256xf32, #tpu.memory_space<vmem>>, vector<8x256xf32>,
    %c241_i32_185 = arith.constant 241 : i32
    %250 = tpu.dynamic_rotate %173 by %c241_i32_185 dim 1 : vector<8x256xf32>, i32 -> vector<8x256xf32>
    %c16_186 = arith.constant 16 : index
    %c0_187 = arith.constant 0 : index
    %251 = vector.load %arg1[%c16_186, %c0_187] : memref<25x256xf32, #tpu.memory_space<vmem>>, vector<1x256xf32>
    %252 = vector.broadcast %251 : vector<1x256xf32> to vector<8x256xf32>
    %253 = arith.mulf %250, %252 : vector<8x256xf32>
    %c128_188 = arith.constant 128 : index
    %c0_189 = arith.constant 0 : index
    %254 = vector.load %arg7[%c128_188, %c0_189] : memref<216x256xf32, #tpu.memory_space<vmem>>, vector<8x256xf32>
    tpu.vector_store %arg7[%c128_188, %c0_189], %253 {strides = array<i32>} : memref<216x256xf32, #tpu.memory_space<vmem>>, vector<8x256xf32>,
    %c240_i32_190 = arith.constant 240 : i32
    %255 = tpu.dynamic_rotate %173 by %c240_i32_190 dim 1 : vector<8x256xf32>, i32 -> vector<8x256xf32>
    %c17_191 = arith.constant 17 : index
    %c0_192 = arith.constant 0 : index
    %256 = vector.load %arg1[%c17_191, %c0_192] : memref<25x256xf32, #tpu.memory_space<vmem>>, vector<1x256xf32>
    %257 = vector.broadcast %256 : vector<1x256xf32> to vector<8x256xf32>
    %258 = arith.mulf %255, %257 : vector<8x256xf32>
    %c136_193 = arith.constant 136 : index
    %c0_194 = arith.constant 0 : index
    %259 = vector.load %arg7[%c136_193, %c0_194] : memref<216x256xf32, #tpu.memory_space<vmem>>, vector<8x256xf32>
    tpu.vector_store %arg7[%c136_193, %c0_194], %258 {strides = array<i32>} : memref<216x256xf32, #tpu.memory_space<vmem>>, vector<8x256xf32>,
    %c239_i32_195 = arith.constant 239 : i32
    %260 = tpu.dynamic_rotate %173 by %c239_i32_195 dim 1 : vector<8x256xf32>, i32 -> vector<8x256xf32>
    %c18_196 = arith.constant 18 : index
    %c0_197 = arith.constant 0 : index
    %261 = vector.load %arg1[%c18_196, %c0_197] : memref<25x256xf32, #tpu.memory_space<vmem>>, vector<1x256xf32>
    %262 = vector.broadcast %261 : vector<1x256xf32> to vector<8x256xf32>
    %263 = arith.mulf %260, %262 : vector<8x256xf32>
    %c144_198 = arith.constant 144 : index
    %c0_199 = arith.constant 0 : index
    %264 = vector.load %arg7[%c144_198, %c0_199] : memref<216x256xf32, #tpu.memory_space<vmem>>, vector<8x256xf32>
    tpu.vector_store %arg7[%c144_198, %c0_199], %263 {strides = array<i32>} : memref<216x256xf32, #tpu.memory_space<vmem>>, vector<8x256xf32>,
    %c238_i32_200 = arith.constant 238 : i32
    %265 = tpu.dynamic_rotate %173 by %c238_i32_200 dim 1 : vector<8x256xf32>, i32 -> vector<8x256xf32>
    %c19_201 = arith.constant 19 : index
    %c0_202 = arith.constant 0 : index
    %266 = vector.load %arg1[%c19_201, %c0_202] : memref<25x256xf32, #tpu.memory_space<vmem>>, vector<1x256xf32>
    %267 = vector.broadcast %266 : vector<1x256xf32> to vector<8x256xf32>
    %268 = arith.mulf %265, %267 : vector<8x256xf32>
    %c152_203 = arith.constant 152 : index
    %c0_204 = arith.constant 0 : index
    %269 = vector.load %arg7[%c152_203, %c0_204] : memref<216x256xf32, #tpu.memory_space<vmem>>, vector<8x256xf32>
    tpu.vector_store %arg7[%c152_203, %c0_204], %268 {strides = array<i32>} : memref<216x256xf32, #tpu.memory_space<vmem>>, vector<8x256xf32>,
    %c226_i32_205 = arith.constant 226 : i32
    %270 = tpu.dynamic_rotate %173 by %c226_i32_205 dim 1 : vector<8x256xf32>, i32 -> vector<8x256xf32>
    %c20_206 = arith.constant 20 : index
    %c0_207 = arith.constant 0 : index
    %271 = vector.load %arg1[%c20_206, %c0_207] : memref<25x256xf32, #tpu.memory_space<vmem>>, vector<1x256xf32>
    %272 = vector.broadcast %271 : vector<1x256xf32> to vector<8x256xf32>
    %273 = arith.mulf %270, %272 : vector<8x256xf32>
    %c160_208 = arith.constant 160 : index
    %c0_209 = arith.constant 0 : index
    %274 = vector.load %arg7[%c160_208, %c0_209] : memref<216x256xf32, #tpu.memory_space<vmem>>, vector<8x256xf32>
    tpu.vector_store %arg7[%c160_208, %c0_209], %273 {strides = array<i32>} : memref<216x256xf32, #tpu.memory_space<vmem>>, vector<8x256xf32>,
    %c225_i32_210 = arith.constant 225 : i32
    %275 = tpu.dynamic_rotate %173 by %c225_i32_210 dim 1 : vector<8x256xf32>, i32 -> vector<8x256xf32>
    %c21_211 = arith.constant 21 : index
    %c0_212 = arith.constant 0 : index
    %276 = vector.load %arg1[%c21_211, %c0_212] : memref<25x256xf32, #tpu.memory_space<vmem>>, vector<1x256xf32>
    %277 = vector.broadcast %276 : vector<1x256xf32> to vector<8x256xf32>
    %278 = arith.mulf %275, %277 : vector<8x256xf32>
    %c168_213 = arith.constant 168 : index
    %c0_214 = arith.constant 0 : index
    %279 = vector.load %arg7[%c168_213, %c0_214] : memref<216x256xf32, #tpu.memory_space<vmem>>, vector<8x256xf32>
    tpu.vector_store %arg7[%c168_213, %c0_214], %278 {strides = array<i32>} : memref<216x256xf32, #tpu.memory_space<vmem>>, vector<8x256xf32>,
    %c224_i32_215 = arith.constant 224 : i32
    %280 = tpu.dynamic_rotate %173 by %c224_i32_215 dim 1 : vector<8x256xf32>, i32 -> vector<8x256xf32>
    %c22_216 = arith.constant 22 : index
    %c0_217 = arith.constant 0 : index
    %281 = vector.load %arg1[%c22_216, %c0_217] : memref<25x256xf32, #tpu.memory_space<vmem>>, vector<1x256xf32>
    %282 = vector.broadcast %281 : vector<1x256xf32> to vector<8x256xf32>
    %283 = arith.mulf %280, %282 : vector<8x256xf32>
    %c176_218 = arith.constant 176 : index
    %c0_219 = arith.constant 0 : index
    %284 = vector.load %arg7[%c176_218, %c0_219] : memref<216x256xf32, #tpu.memory_space<vmem>>, vector<8x256xf32>
    tpu.vector_store %arg7[%c176_218, %c0_219], %283 {strides = array<i32>} : memref<216x256xf32, #tpu.memory_space<vmem>>, vector<8x256xf32>,
    %c223_i32_220 = arith.constant 223 : i32
    %285 = tpu.dynamic_rotate %173 by %c223_i32_220 dim 1 : vector<8x256xf32>, i32 -> vector<8x256xf32>
    %c23_221 = arith.constant 23 : index
    %c0_222 = arith.constant 0 : index
    %286 = vector.load %arg1[%c23_221, %c0_222] : memref<25x256xf32, #tpu.memory_space<vmem>>, vector<1x256xf32>
    %287 = vector.broadcast %286 : vector<1x256xf32> to vector<8x256xf32>
    %288 = arith.mulf %285, %287 : vector<8x256xf32>
    %c184_223 = arith.constant 184 : index
    %c0_224 = arith.constant 0 : index
    %289 = vector.load %arg7[%c184_223, %c0_224] : memref<216x256xf32, #tpu.memory_space<vmem>>, vector<8x256xf32>
    tpu.vector_store %arg7[%c184_223, %c0_224], %288 {strides = array<i32>} : memref<216x256xf32, #tpu.memory_space<vmem>>, vector<8x256xf32>,
    %c222_i32_225 = arith.constant 222 : i32
    %290 = tpu.dynamic_rotate %173 by %c222_i32_225 dim 1 : vector<8x256xf32>, i32 -> vector<8x256xf32>
    %c24_226 = arith.constant 24 : index
    %c0_227 = arith.constant 0 : index
    %291 = vector.load %arg1[%c24_226, %c0_227] : memref<25x256xf32, #tpu.memory_space<vmem>>, vector<1x256xf32>
    %292 = vector.broadcast %291 : vector<1x256xf32> to vector<8x256xf32>
    %293 = arith.mulf %290, %292 : vector<8x256xf32>
    %c192_228 = arith.constant 192 : index
    %c0_229 = arith.constant 0 : index
    %294 = vector.load %arg7[%c192_228, %c0_229] : memref<216x256xf32, #tpu.memory_space<vmem>>, vector<8x256xf32>
    tpu.vector_store %arg7[%c192_228, %c0_229], %293 {strides = array<i32>} : memref<216x256xf32, #tpu.memory_space<vmem>>, vector<8x256xf32>,
    %c96_230 = arith.constant 96 : index
    %c0_231 = arith.constant 0 : index
    %295 = vector.load %arg7[%c96_230, %c0_231] : memref<216x256xf32, #tpu.memory_space<vmem>>, vector<8x256xf32>
    %c104_232 = arith.constant 104 : index
    %c0_233 = arith.constant 0 : index
    %296 = vector.load %arg7[%c104_232, %c0_233] : memref<216x256xf32, #tpu.memory_space<vmem>>, vector<8x256xf32>
    %c136_234 = arith.constant 136 : index
    %c0_235 = arith.constant 0 : index
    %297 = vector.load %arg7[%c136_234, %c0_235] : memref<216x256xf32, #tpu.memory_space<vmem>>, vector<8x256xf32>
    %c144_236 = arith.constant 144 : index
    %c0_237 = arith.constant 0 : index
    %298 = vector.load %arg7[%c144_236, %c0_237] : memref<216x256xf32, #tpu.memory_space<vmem>>, vector<8x256xf32>
    %299 = arith.maximumf %295, %296 : vector<8x256xf32>
    %300 = arith.maximumf %297, %298 : vector<8x256xf32>
    %301 = arith.maximumf %299, %300 : vector<8x256xf32>
    %c200_238 = arith.constant 200 : index
    %c0_239 = arith.constant 0 : index
    %302 = vector.load %arg7[%c200_238, %c0_239] : memref<216x256xf32, #tpu.memory_space<vmem>>, vector<8x256xf32>
    tpu.vector_store %arg7[%c200_238, %c0_239], %301 {strides = array<i32>} : memref<216x256xf32, #tpu.memory_space<vmem>>, vector<8x256xf32>,
    %303 = arith.addf %295, %296 : vector<8x256xf32>
    %304 = arith.addf %303, %297 : vector<8x256xf32>
    %305 = arith.addf %304, %298 : vector<8x256xf32>
    %cst_240 = arith.constant 2.500000e-01 : f32
    %306 = vector.broadcast %cst_240 : f32 to vector<8x256xf32>
    %307 = arith.mulf %305, %306 : vector<8x256xf32>
    %c208_241 = arith.constant 208 : index
    %c0_242 = arith.constant 0 : index
    %308 = vector.load %arg7[%c208_241, %c0_242] : memref<216x256xf32, #tpu.memory_space<vmem>>, vector<8x256xf32>
    tpu.vector_store %arg7[%c208_241, %c0_242], %307 {strides = array<i32>} : memref<216x256xf32, #tpu.memory_space<vmem>>, vector<8x256xf32>,
    %c32_243 = arith.constant 32 : index
    %c0_244 = arith.constant 0 : index
    %309 = vector.load %arg4[%c32_243, %c0_244] : memref<112x216xf32, #tpu.memory_space<vmem>>, vector<32x216xf32>
    %c0_245 = arith.constant 0 : index
    %c0_246 = arith.constant 0 : index
    %310 = vector.load %arg7[%c0_245, %c0_246] : memref<216x256xf32, #tpu.memory_space<vmem>>, vector<216x256xf32>
    %cst_247 = arith.constant dense<0.000000e+00> : vector<32x256xf32>
    %311 = tpu.matmul %309, %310, %cst_247 {dimension_numbers = #tpu.dot_dimension_numbers<[1], [0], [0], [1], [0, 0, 1, 1], [], []>} : vector<32x216xf32>, vector<216x256xf32>, vector<32x256xf32> -> vector<32x256xf32>
    %312 = vector.extract_strided_slice %311 {offsets = [0, 0], sizes = [8, 256], strides = [1, 1]} : vector<32x256xf32> to vector<8x256xf32>
    %c2_248 = arith.constant 2 : index
    %c0_249 = arith.constant 0 : index
    %c0_250 = arith.constant 0 : index
    %313 = vector.load %arg6[%c2_248, %c0_249, %c0_250] : memref<6x8x256xf32, #tpu.memory_space<vmem>>, vector<1x8x256xf32>
    %314 = vector.shape_cast %313 : vector<1x8x256xf32> to vector<8x256xf32>
    %315 = arith.addf %314, %312 : vector<8x256xf32>
    %c2_251 = arith.constant 2 : index
    %c0_252 = arith.constant 0 : index
    %c0_253 = arith.constant 0 : index
    %316 = vector.load %arg6[%c2_251, %c0_252, %c0_253] : memref<6x8x256xf32, #tpu.memory_space<vmem>>, vector<1x8x256xf32>
    %317 = vector.shape_cast %316 : vector<1x8x256xf32> to vector<8x256xf32>
    %318 = vector.shape_cast %315 : vector<8x256xf32> to vector<1x8x256xf32>
    tpu.vector_store %arg6[%c2_251, %c0_252, %c0_253], %318 {strides = array<i32>} : memref<6x8x256xf32, #tpu.memory_space<vmem>>, vector<1x8x256xf32>,
    %319 = vector.extract_strided_slice %311 {offsets = [8, 0], sizes = [8, 256], strides = [1, 1]} : vector<32x256xf32> to vector<8x256xf32>
    %c3_254 = arith.constant 3 : index
    %c0_255 = arith.constant 0 : index
    %c0_256 = arith.constant 0 : index
    %320 = vector.load %arg6[%c3_254, %c0_255, %c0_256] : memref<6x8x256xf32, #tpu.memory_space<vmem>>, vector<1x8x256xf32>
    %321 = vector.shape_cast %320 : vector<1x8x256xf32> to vector<8x256xf32>
    %322 = arith.addf %321, %319 : vector<8x256xf32>
    %c3_257 = arith.constant 3 : index
    %c0_258 = arith.constant 0 : index
    %c0_259 = arith.constant 0 : index
    %323 = vector.load %arg6[%c3_257, %c0_258, %c0_259] : memref<6x8x256xf32, #tpu.memory_space<vmem>>, vector<1x8x256xf32>
    %324 = vector.shape_cast %323 : vector<1x8x256xf32> to vector<8x256xf32>
    %325 = vector.shape_cast %322 : vector<8x256xf32> to vector<1x8x256xf32>
    tpu.vector_store %arg6[%c3_257, %c0_258, %c0_259], %325 {strides = array<i32>} : memref<6x8x256xf32, #tpu.memory_space<vmem>>, vector<1x8x256xf32>,
    %326 = vector.extract_strided_slice %311 {offsets = [16, 0], sizes = [8, 256], strides = [1, 1]} : vector<32x256xf32> to vector<8x256xf32>
    %c4_260 = arith.constant 4 : index
    %c0_261 = arith.constant 0 : index
    %c0_262 = arith.constant 0 : index
    %327 = vector.load %arg6[%c4_260, %c0_261, %c0_262] : memref<6x8x256xf32, #tpu.memory_space<vmem>>, vector<1x8x256xf32>
    %328 = vector.shape_cast %327 : vector<1x8x256xf32> to vector<8x256xf32>
    %329 = arith.addf %328, %326 : vector<8x256xf32>
    %c4_263 = arith.constant 4 : index
    %c0_264 = arith.constant 0 : index
    %c0_265 = arith.constant 0 : index
    %330 = vector.load %arg6[%c4_263, %c0_264, %c0_265] : memref<6x8x256xf32, #tpu.memory_space<vmem>>, vector<1x8x256xf32>
    %331 = vector.shape_cast %330 : vector<1x8x256xf32> to vector<8x256xf32>
    %332 = vector.shape_cast %329 : vector<8x256xf32> to vector<1x8x256xf32>
    tpu.vector_store %arg6[%c4_263, %c0_264, %c0_265], %332 {strides = array<i32>} : memref<6x8x256xf32, #tpu.memory_space<vmem>>, vector<1x8x256xf32>,
    %333 = vector.extract_strided_slice %311 {offsets = [24, 0], sizes = [8, 256], strides = [1, 1]} : vector<32x256xf32> to vector<8x256xf32>
    %c5_266 = arith.constant 5 : index
    %c0_267 = arith.constant 0 : index
    %c0_268 = arith.constant 0 : index
    %334 = vector.load %arg6[%c5_266, %c0_267, %c0_268] : memref<6x8x256xf32, #tpu.memory_space<vmem>>, vector<1x8x256xf32>
    %335 = vector.shape_cast %334 : vector<1x8x256xf32> to vector<8x256xf32>
    %336 = arith.addf %335, %333 : vector<8x256xf32>
    %c5_269 = arith.constant 5 : index
    %c0_270 = arith.constant 0 : index
    %c0_271 = arith.constant 0 : index
    %337 = vector.load %arg6[%c5_269, %c0_270, %c0_271] : memref<6x8x256xf32, #tpu.memory_space<vmem>>, vector<1x8x256xf32>
    %338 = vector.shape_cast %337 : vector<1x8x256xf32> to vector<8x256xf32>
    %339 = vector.shape_cast %336 : vector<8x256xf32> to vector<1x8x256xf32>
    tpu.vector_store %arg6[%c5_269, %c0_270, %c0_271], %339 {strides = array<i32>} : memref<6x8x256xf32, #tpu.memory_space<vmem>>, vector<1x8x256xf32>,
    %c2_272 = arith.constant 2 : index
    %c0_273 = arith.constant 0 : index
    %c0_274 = arith.constant 0 : index
    %340 = vector.load %arg6[%c2_272, %c0_273, %c0_274] : memref<6x8x256xf32, #tpu.memory_space<vmem>>, vector<1x8x256xf32>
    %341 = vector.shape_cast %340 : vector<1x8x256xf32> to vector<8x256xf32>
    %c34_i32_275 = arith.constant 34 : i32
    %342 = tpu.dynamic_rotate %341 by %c34_i32_275 dim 1 : vector<8x256xf32>, i32 -> vector<8x256xf32>
    %c0_276 = arith.constant 0 : index
    %c0_277 = arith.constant 0 : index
    %343 = vector.load %arg1[%c0_276, %c0_277] : memref<25x256xf32, #tpu.memory_space<vmem>>, vector<1x256xf32>
    %344 = vector.broadcast %343 : vector<1x256xf32> to vector<8x256xf32>
    %345 = arith.mulf %342, %344 : vector<8x256xf32>
    %c0_278 = arith.constant 0 : index
    %c0_279 = arith.constant 0 : index
    %346 = vector.load %arg7[%c0_278, %c0_279] : memref<216x256xf32, #tpu.memory_space<vmem>>, vector<8x256xf32>
    tpu.vector_store %arg7[%c0_278, %c0_279], %345 {strides = array<i32>} : memref<216x256xf32, #tpu.memory_space<vmem>>, vector<8x256xf32>,
    %c33_i32_280 = arith.constant 33 : i32
    %347 = tpu.dynamic_rotate %341 by %c33_i32_280 dim 1 : vector<8x256xf32>, i32 -> vector<8x256xf32>
    %c1_281 = arith.constant 1 : index
    %c0_282 = arith.constant 0 : index
    %348 = vector.load %arg1[%c1_281, %c0_282] : memref<25x256xf32, #tpu.memory_space<vmem>>, vector<1x256xf32>
    %349 = vector.broadcast %348 : vector<1x256xf32> to vector<8x256xf32>
    %350 = arith.mulf %347, %349 : vector<8x256xf32>
    %c8_283 = arith.constant 8 : index
    %c0_284 = arith.constant 0 : index
    %351 = vector.load %arg7[%c8_283, %c0_284] : memref<216x256xf32, #tpu.memory_space<vmem>>, vector<8x256xf32>
    tpu.vector_store %arg7[%c8_283, %c0_284], %350 {strides = array<i32>} : memref<216x256xf32, #tpu.memory_space<vmem>>, vector<8x256xf32>,
    %c32_i32_285 = arith.constant 32 : i32
    %352 = tpu.dynamic_rotate %341 by %c32_i32_285 dim 1 : vector<8x256xf32>, i32 -> vector<8x256xf32>
    %c2_286 = arith.constant 2 : index
    %c0_287 = arith.constant 0 : index
    %353 = vector.load %arg1[%c2_286, %c0_287] : memref<25x256xf32, #tpu.memory_space<vmem>>, vector<1x256xf32>
    %354 = vector.broadcast %353 : vector<1x256xf32> to vector<8x256xf32>
    %355 = arith.mulf %352, %354 : vector<8x256xf32>
    %c16_288 = arith.constant 16 : index
    %c0_289 = arith.constant 0 : index
    %356 = vector.load %arg7[%c16_288, %c0_289] : memref<216x256xf32, #tpu.memory_space<vmem>>, vector<8x256xf32>
    tpu.vector_store %arg7[%c16_288, %c0_289], %355 {strides = array<i32>} : memref<216x256xf32, #tpu.memory_space<vmem>>, vector<8x256xf32>,
    %c31_i32_290 = arith.constant 31 : i32
    %357 = tpu.dynamic_rotate %341 by %c31_i32_290 dim 1 : vector<8x256xf32>, i32 -> vector<8x256xf32>
    %c3_291 = arith.constant 3 : index
    %c0_292 = arith.constant 0 : index
    %358 = vector.load %arg1[%c3_291, %c0_292] : memref<25x256xf32, #tpu.memory_space<vmem>>, vector<1x256xf32>
    %359 = vector.broadcast %358 : vector<1x256xf32> to vector<8x256xf32>
    %360 = arith.mulf %357, %359 : vector<8x256xf32>
    %c24_293 = arith.constant 24 : index
    %c0_294 = arith.constant 0 : index
    %361 = vector.load %arg7[%c24_293, %c0_294] : memref<216x256xf32, #tpu.memory_space<vmem>>, vector<8x256xf32>
    tpu.vector_store %arg7[%c24_293, %c0_294], %360 {strides = array<i32>} : memref<216x256xf32, #tpu.memory_space<vmem>>, vector<8x256xf32>,
    %c30_i32_295 = arith.constant 30 : i32
    %362 = tpu.dynamic_rotate %341 by %c30_i32_295 dim 1 : vector<8x256xf32>, i32 -> vector<8x256xf32>
    %c4_296 = arith.constant 4 : index
    %c0_297 = arith.constant 0 : index
    %363 = vector.load %arg1[%c4_296, %c0_297] : memref<25x256xf32, #tpu.memory_space<vmem>>, vector<1x256xf32>
    %364 = vector.broadcast %363 : vector<1x256xf32> to vector<8x256xf32>
    %365 = arith.mulf %362, %364 : vector<8x256xf32>
    %c32_298 = arith.constant 32 : index
    %c0_299 = arith.constant 0 : index
    %366 = vector.load %arg7[%c32_298, %c0_299] : memref<216x256xf32, #tpu.memory_space<vmem>>, vector<8x256xf32>
    tpu.vector_store %arg7[%c32_298, %c0_299], %365 {strides = array<i32>} : memref<216x256xf32, #tpu.memory_space<vmem>>, vector<8x256xf32>,
    %c18_i32_300 = arith.constant 18 : i32
    %367 = tpu.dynamic_rotate %341 by %c18_i32_300 dim 1 : vector<8x256xf32>, i32 -> vector<8x256xf32>
    %c5_301 = arith.constant 5 : index
    %c0_302 = arith.constant 0 : index
    %368 = vector.load %arg1[%c5_301, %c0_302] : memref<25x256xf32, #tpu.memory_space<vmem>>, vector<1x256xf32>
    %369 = vector.broadcast %368 : vector<1x256xf32> to vector<8x256xf32>
    %370 = arith.mulf %367, %369 : vector<8x256xf32>
    %c40_303 = arith.constant 40 : index
    %c0_304 = arith.constant 0 : index
    %371 = vector.load %arg7[%c40_303, %c0_304] : memref<216x256xf32, #tpu.memory_space<vmem>>, vector<8x256xf32>
    tpu.vector_store %arg7[%c40_303, %c0_304], %370 {strides = array<i32>} : memref<216x256xf32, #tpu.memory_space<vmem>>, vector<8x256xf32>,
    %c17_i32_305 = arith.constant 17 : i32
    %372 = tpu.dynamic_rotate %341 by %c17_i32_305 dim 1 : vector<8x256xf32>, i32 -> vector<8x256xf32>
    %c6_306 = arith.constant 6 : index
    %c0_307 = arith.constant 0 : index
    %373 = vector.load %arg1[%c6_306, %c0_307] : memref<25x256xf32, #tpu.memory_space<vmem>>, vector<1x256xf32>
    %374 = vector.broadcast %373 : vector<1x256xf32> to vector<8x256xf32>
    %375 = arith.mulf %372, %374 : vector<8x256xf32>
    %c48_308 = arith.constant 48 : index
    %c0_309 = arith.constant 0 : index
    %376 = vector.load %arg7[%c48_308, %c0_309] : memref<216x256xf32, #tpu.memory_space<vmem>>, vector<8x256xf32>
    tpu.vector_store %arg7[%c48_308, %c0_309], %375 {strides = array<i32>} : memref<216x256xf32, #tpu.memory_space<vmem>>, vector<8x256xf32>,
    %c16_i32_310 = arith.constant 16 : i32
    %377 = tpu.dynamic_rotate %341 by %c16_i32_310 dim 1 : vector<8x256xf32>, i32 -> vector<8x256xf32>
    %c7_311 = arith.constant 7 : index
    %c0_312 = arith.constant 0 : index
    %378 = vector.load %arg1[%c7_311, %c0_312] : memref<25x256xf32, #tpu.memory_space<vmem>>, vector<1x256xf32>
    %379 = vector.broadcast %378 : vector<1x256xf32> to vector<8x256xf32>
    %380 = arith.mulf %377, %379 : vector<8x256xf32>
    %c56_313 = arith.constant 56 : index
    %c0_314 = arith.constant 0 : index
    %381 = vector.load %arg7[%c56_313, %c0_314] : memref<216x256xf32, #tpu.memory_space<vmem>>, vector<8x256xf32>
    tpu.vector_store %arg7[%c56_313, %c0_314], %380 {strides = array<i32>} : memref<216x256xf32, #tpu.memory_space<vmem>>, vector<8x256xf32>,
    %c15_i32_315 = arith.constant 15 : i32
    %382 = tpu.dynamic_rotate %341 by %c15_i32_315 dim 1 : vector<8x256xf32>, i32 -> vector<8x256xf32>
    %c8_316 = arith.constant 8 : index
    %c0_317 = arith.constant 0 : index
    %383 = vector.load %arg1[%c8_316, %c0_317] : memref<25x256xf32, #tpu.memory_space<vmem>>, vector<1x256xf32>
    %384 = vector.broadcast %383 : vector<1x256xf32> to vector<8x256xf32>
    %385 = arith.mulf %382, %384 : vector<8x256xf32>
    %c64_318 = arith.constant 64 : index
    %c0_319 = arith.constant 0 : index
    %386 = vector.load %arg7[%c64_318, %c0_319] : memref<216x256xf32, #tpu.memory_space<vmem>>, vector<8x256xf32>
    tpu.vector_store %arg7[%c64_318, %c0_319], %385 {strides = array<i32>} : memref<216x256xf32, #tpu.memory_space<vmem>>, vector<8x256xf32>,
    %c14_i32_320 = arith.constant 14 : i32
    %387 = tpu.dynamic_rotate %341 by %c14_i32_320 dim 1 : vector<8x256xf32>, i32 -> vector<8x256xf32>
    %c9_321 = arith.constant 9 : index
    %c0_322 = arith.constant 0 : index
    %388 = vector.load %arg1[%c9_321, %c0_322] : memref<25x256xf32, #tpu.memory_space<vmem>>, vector<1x256xf32>
    %389 = vector.broadcast %388 : vector<1x256xf32> to vector<8x256xf32>
    %390 = arith.mulf %387, %389 : vector<8x256xf32>
    %c72_323 = arith.constant 72 : index
    %c0_324 = arith.constant 0 : index
    %391 = vector.load %arg7[%c72_323, %c0_324] : memref<216x256xf32, #tpu.memory_space<vmem>>, vector<8x256xf32>
    tpu.vector_store %arg7[%c72_323, %c0_324], %390 {strides = array<i32>} : memref<216x256xf32, #tpu.memory_space<vmem>>, vector<8x256xf32>,
    %c2_i32_325 = arith.constant 2 : i32
    %392 = tpu.dynamic_rotate %341 by %c2_i32_325 dim 1 : vector<8x256xf32>, i32 -> vector<8x256xf32>
    %c10_326 = arith.constant 10 : index
    %c0_327 = arith.constant 0 : index
    %393 = vector.load %arg1[%c10_326, %c0_327] : memref<25x256xf32, #tpu.memory_space<vmem>>, vector<1x256xf32>
    %394 = vector.broadcast %393 : vector<1x256xf32> to vector<8x256xf32>
    %395 = arith.mulf %392, %394 : vector<8x256xf32>
    %c80_328 = arith.constant 80 : index
    %c0_329 = arith.constant 0 : index
    %396 = vector.load %arg7[%c80_328, %c0_329] : memref<216x256xf32, #tpu.memory_space<vmem>>, vector<8x256xf32>
    tpu.vector_store %arg7[%c80_328, %c0_329], %395 {strides = array<i32>} : memref<216x256xf32, #tpu.memory_space<vmem>>, vector<8x256xf32>,
    %c1_i32_330 = arith.constant 1 : i32
    %397 = tpu.dynamic_rotate %341 by %c1_i32_330 dim 1 : vector<8x256xf32>, i32 -> vector<8x256xf32>
    %c11_331 = arith.constant 11 : index
    %c0_332 = arith.constant 0 : index
    %398 = vector.load %arg1[%c11_331, %c0_332] : memref<25x256xf32, #tpu.memory_space<vmem>>, vector<1x256xf32>
    %399 = vector.broadcast %398 : vector<1x256xf32> to vector<8x256xf32>
    %400 = arith.mulf %397, %399 : vector<8x256xf32>
    %c88_333 = arith.constant 88 : index
    %c0_334 = arith.constant 0 : index
    %401 = vector.load %arg7[%c88_333, %c0_334] : memref<216x256xf32, #tpu.memory_space<vmem>>, vector<8x256xf32>
    tpu.vector_store %arg7[%c88_333, %c0_334], %400 {strides = array<i32>} : memref<216x256xf32, #tpu.memory_space<vmem>>, vector<8x256xf32>,
    %c96_335 = arith.constant 96 : index
    %c0_336 = arith.constant 0 : index
    %402 = vector.load %arg7[%c96_335, %c0_336] : memref<216x256xf32, #tpu.memory_space<vmem>>, vector<8x256xf32>
    tpu.vector_store %arg7[%c96_335, %c0_336], %341 {strides = array<i32>} : memref<216x256xf32, #tpu.memory_space<vmem>>, vector<8x256xf32>,
    %c255_i32_337 = arith.constant 255 : i32
    %403 = tpu.dynamic_rotate %341 by %c255_i32_337 dim 1 : vector<8x256xf32>, i32 -> vector<8x256xf32>
    %c13_338 = arith.constant 13 : index
    %c0_339 = arith.constant 0 : index
    %404 = vector.load %arg1[%c13_338, %c0_339] : memref<25x256xf32, #tpu.memory_space<vmem>>, vector<1x256xf32>
    %405 = vector.broadcast %404 : vector<1x256xf32> to vector<8x256xf32>
    %406 = arith.mulf %403, %405 : vector<8x256xf32>
    %c104_340 = arith.constant 104 : index
    %c0_341 = arith.constant 0 : index
    %407 = vector.load %arg7[%c104_340, %c0_341] : memref<216x256xf32, #tpu.memory_space<vmem>>, vector<8x256xf32>
    tpu.vector_store %arg7[%c104_340, %c0_341], %406 {strides = array<i32>} : memref<216x256xf32, #tpu.memory_space<vmem>>, vector<8x256xf32>,
    %c254_i32_342 = arith.constant 254 : i32
    %408 = tpu.dynamic_rotate %341 by %c254_i32_342 dim 1 : vector<8x256xf32>, i32 -> vector<8x256xf32>
    %c14_343 = arith.constant 14 : index
    %c0_344 = arith.constant 0 : index
    %409 = vector.load %arg1[%c14_343, %c0_344] : memref<25x256xf32, #tpu.memory_space<vmem>>, vector<1x256xf32>
    %410 = vector.broadcast %409 : vector<1x256xf32> to vector<8x256xf32>
    %411 = arith.mulf %408, %410 : vector<8x256xf32>
    %c112_345 = arith.constant 112 : index
    %c0_346 = arith.constant 0 : index
    %412 = vector.load %arg7[%c112_345, %c0_346] : memref<216x256xf32, #tpu.memory_space<vmem>>, vector<8x256xf32>
    tpu.vector_store %arg7[%c112_345, %c0_346], %411 {strides = array<i32>} : memref<216x256xf32, #tpu.memory_space<vmem>>, vector<8x256xf32>,
    %c242_i32_347 = arith.constant 242 : i32
    %413 = tpu.dynamic_rotate %341 by %c242_i32_347 dim 1 : vector<8x256xf32>, i32 -> vector<8x256xf32>
    %c15_348 = arith.constant 15 : index
    %c0_349 = arith.constant 0 : index
    %414 = vector.load %arg1[%c15_348, %c0_349] : memref<25x256xf32, #tpu.memory_space<vmem>>, vector<1x256xf32>
    %415 = vector.broadcast %414 : vector<1x256xf32> to vector<8x256xf32>
    %416 = arith.mulf %413, %415 : vector<8x256xf32>
    %c120_350 = arith.constant 120 : index
    %c0_351 = arith.constant 0 : index
    %417 = vector.load %arg7[%c120_350, %c0_351] : memref<216x256xf32, #tpu.memory_space<vmem>>, vector<8x256xf32>
    tpu.vector_store %arg7[%c120_350, %c0_351], %416 {strides = array<i32>} : memref<216x256xf32, #tpu.memory_space<vmem>>, vector<8x256xf32>,
    %c241_i32_352 = arith.constant 241 : i32
    %418 = tpu.dynamic_rotate %341 by %c241_i32_352 dim 1 : vector<8x256xf32>, i32 -> vector<8x256xf32>
    %c16_353 = arith.constant 16 : index
    %c0_354 = arith.constant 0 : index
    %419 = vector.load %arg1[%c16_353, %c0_354] : memref<25x256xf32, #tpu.memory_space<vmem>>, vector<1x256xf32>
    %420 = vector.broadcast %419 : vector<1x256xf32> to vector<8x256xf32>
    %421 = arith.mulf %418, %420 : vector<8x256xf32>
    %c128_355 = arith.constant 128 : index
    %c0_356 = arith.constant 0 : index
    %422 = vector.load %arg7[%c128_355, %c0_356] : memref<216x256xf32, #tpu.memory_space<vmem>>, vector<8x256xf32>
    tpu.vector_store %arg7[%c128_355, %c0_356], %421 {strides = array<i32>} : memref<216x256xf32, #tpu.memory_space<vmem>>, vector<8x256xf32>,
    %c240_i32_357 = arith.constant 240 : i32
    %423 = tpu.dynamic_rotate %341 by %c240_i32_357 dim 1 : vector<8x256xf32>, i32 -> vector<8x256xf32>
    %c17_358 = arith.constant 17 : index
    %c0_359 = arith.constant 0 : index
    %424 = vector.load %arg1[%c17_358, %c0_359] : memref<25x256xf32, #tpu.memory_space<vmem>>, vector<1x256xf32>
    %425 = vector.broadcast %424 : vector<1x256xf32> to vector<8x256xf32>
    %426 = arith.mulf %423, %425 : vector<8x256xf32>
    %c136_360 = arith.constant 136 : index
    %c0_361 = arith.constant 0 : index
    %427 = vector.load %arg7[%c136_360, %c0_361] : memref<216x256xf32, #tpu.memory_space<vmem>>, vector<8x256xf32>
    tpu.vector_store %arg7[%c136_360, %c0_361], %426 {strides = array<i32>} : memref<216x256xf32, #tpu.memory_space<vmem>>, vector<8x256xf32>,
    %c239_i32_362 = arith.constant 239 : i32
    %428 = tpu.dynamic_rotate %341 by %c239_i32_362 dim 1 : vector<8x256xf32>, i32 -> vector<8x256xf32>
    %c18_363 = arith.constant 18 : index
    %c0_364 = arith.constant 0 : index
    %429 = vector.load %arg1[%c18_363, %c0_364] : memref<25x256xf32, #tpu.memory_space<vmem>>, vector<1x256xf32>
    %430 = vector.broadcast %429 : vector<1x256xf32> to vector<8x256xf32>
    %431 = arith.mulf %428, %430 : vector<8x256xf32>
    %c144_365 = arith.constant 144 : index
    %c0_366 = arith.constant 0 : index
    %432 = vector.load %arg7[%c144_365, %c0_366] : memref<216x256xf32, #tpu.memory_space<vmem>>, vector<8x256xf32>
    tpu.vector_store %arg7[%c144_365, %c0_366], %431 {strides = array<i32>} : memref<216x256xf32, #tpu.memory_space<vmem>>, vector<8x256xf32>,
    %c238_i32_367 = arith.constant 238 : i32
    %433 = tpu.dynamic_rotate %341 by %c238_i32_367 dim 1 : vector<8x256xf32>, i32 -> vector<8x256xf32>
    %c19_368 = arith.constant 19 : index
    %c0_369 = arith.constant 0 : index
    %434 = vector.load %arg1[%c19_368, %c0_369] : memref<25x256xf32, #tpu.memory_space<vmem>>, vector<1x256xf32>
    %435 = vector.broadcast %434 : vector<1x256xf32> to vector<8x256xf32>
    %436 = arith.mulf %433, %435 : vector<8x256xf32>
    %c152_370 = arith.constant 152 : index
    %c0_371 = arith.constant 0 : index
    %437 = vector.load %arg7[%c152_370, %c0_371] : memref<216x256xf32, #tpu.memory_space<vmem>>, vector<8x256xf32>
    tpu.vector_store %arg7[%c152_370, %c0_371], %436 {strides = array<i32>} : memref<216x256xf32, #tpu.memory_space<vmem>>, vector<8x256xf32>,
    %c226_i32_372 = arith.constant 226 : i32
    %438 = tpu.dynamic_rotate %341 by %c226_i32_372 dim 1 : vector<8x256xf32>, i32 -> vector<8x256xf32>
    %c20_373 = arith.constant 20 : index
    %c0_374 = arith.constant 0 : index
    %439 = vector.load %arg1[%c20_373, %c0_374] : memref<25x256xf32, #tpu.memory_space<vmem>>, vector<1x256xf32>
    %440 = vector.broadcast %439 : vector<1x256xf32> to vector<8x256xf32>
    %441 = arith.mulf %438, %440 : vector<8x256xf32>
    %c160_375 = arith.constant 160 : index
    %c0_376 = arith.constant 0 : index
    %442 = vector.load %arg7[%c160_375, %c0_376] : memref<216x256xf32, #tpu.memory_space<vmem>>, vector<8x256xf32>
    tpu.vector_store %arg7[%c160_375, %c0_376], %441 {strides = array<i32>} : memref<216x256xf32, #tpu.memory_space<vmem>>, vector<8x256xf32>,
    %c225_i32_377 = arith.constant 225 : i32
    %443 = tpu.dynamic_rotate %341 by %c225_i32_377 dim 1 : vector<8x256xf32>, i32 -> vector<8x256xf32>
    %c21_378 = arith.constant 21 : index
    %c0_379 = arith.constant 0 : index
    %444 = vector.load %arg1[%c21_378, %c0_379] : memref<25x256xf32, #tpu.memory_space<vmem>>, vector<1x256xf32>
    %445 = vector.broadcast %444 : vector<1x256xf32> to vector<8x256xf32>
    %446 = arith.mulf %443, %445 : vector<8x256xf32>
    %c168_380 = arith.constant 168 : index
    %c0_381 = arith.constant 0 : index
    %447 = vector.load %arg7[%c168_380, %c0_381] : memref<216x256xf32, #tpu.memory_space<vmem>>, vector<8x256xf32>
    tpu.vector_store %arg7[%c168_380, %c0_381], %446 {strides = array<i32>} : memref<216x256xf32, #tpu.memory_space<vmem>>, vector<8x256xf32>,
    %c224_i32_382 = arith.constant 224 : i32
    %448 = tpu.dynamic_rotate %341 by %c224_i32_382 dim 1 : vector<8x256xf32>, i32 -> vector<8x256xf32>
    %c22_383 = arith.constant 22 : index
    %c0_384 = arith.constant 0 : index
    %449 = vector.load %arg1[%c22_383, %c0_384] : memref<25x256xf32, #tpu.memory_space<vmem>>, vector<1x256xf32>
    %450 = vector.broadcast %449 : vector<1x256xf32> to vector<8x256xf32>
    %451 = arith.mulf %448, %450 : vector<8x256xf32>
    %c176_385 = arith.constant 176 : index
    %c0_386 = arith.constant 0 : index
    %452 = vector.load %arg7[%c176_385, %c0_386] : memref<216x256xf32, #tpu.memory_space<vmem>>, vector<8x256xf32>
    tpu.vector_store %arg7[%c176_385, %c0_386], %451 {strides = array<i32>} : memref<216x256xf32, #tpu.memory_space<vmem>>, vector<8x256xf32>,
    %c223_i32_387 = arith.constant 223 : i32
    %453 = tpu.dynamic_rotate %341 by %c223_i32_387 dim 1 : vector<8x256xf32>, i32 -> vector<8x256xf32>
    %c23_388 = arith.constant 23 : index
    %c0_389 = arith.constant 0 : index
    %454 = vector.load %arg1[%c23_388, %c0_389] : memref<25x256xf32, #tpu.memory_space<vmem>>, vector<1x256xf32>
    %455 = vector.broadcast %454 : vector<1x256xf32> to vector<8x256xf32>
    %456 = arith.mulf %453, %455 : vector<8x256xf32>
    %c184_390 = arith.constant 184 : index
    %c0_391 = arith.constant 0 : index
    %457 = vector.load %arg7[%c184_390, %c0_391] : memref<216x256xf32, #tpu.memory_space<vmem>>, vector<8x256xf32>
    tpu.vector_store %arg7[%c184_390, %c0_391], %456 {strides = array<i32>} : memref<216x256xf32, #tpu.memory_space<vmem>>, vector<8x256xf32>,
    %c222_i32_392 = arith.constant 222 : i32
    %458 = tpu.dynamic_rotate %341 by %c222_i32_392 dim 1 : vector<8x256xf32>, i32 -> vector<8x256xf32>
    %c24_393 = arith.constant 24 : index
    %c0_394 = arith.constant 0 : index
    %459 = vector.load %arg1[%c24_393, %c0_394] : memref<25x256xf32, #tpu.memory_space<vmem>>, vector<1x256xf32>
    %460 = vector.broadcast %459 : vector<1x256xf32> to vector<8x256xf32>
    %461 = arith.mulf %458, %460 : vector<8x256xf32>
    %c192_395 = arith.constant 192 : index
    %c0_396 = arith.constant 0 : index
    %462 = vector.load %arg7[%c192_395, %c0_396] : memref<216x256xf32, #tpu.memory_space<vmem>>, vector<8x256xf32>
    tpu.vector_store %arg7[%c192_395, %c0_396], %461 {strides = array<i32>} : memref<216x256xf32, #tpu.memory_space<vmem>>, vector<8x256xf32>,
    %c96_397 = arith.constant 96 : index
    %c0_398 = arith.constant 0 : index
    %463 = vector.load %arg7[%c96_397, %c0_398] : memref<216x256xf32, #tpu.memory_space<vmem>>, vector<8x256xf32>
    %c104_399 = arith.constant 104 : index
    %c0_400 = arith.constant 0 : index
    %464 = vector.load %arg7[%c104_399, %c0_400] : memref<216x256xf32, #tpu.memory_space<vmem>>, vector<8x256xf32>
    %c136_401 = arith.constant 136 : index
    %c0_402 = arith.constant 0 : index
    %465 = vector.load %arg7[%c136_401, %c0_402] : memref<216x256xf32, #tpu.memory_space<vmem>>, vector<8x256xf32>
    %c144_403 = arith.constant 144 : index
    %c0_404 = arith.constant 0 : index
    %466 = vector.load %arg7[%c144_403, %c0_404] : memref<216x256xf32, #tpu.memory_space<vmem>>, vector<8x256xf32>
    %467 = arith.maximumf %463, %464 : vector<8x256xf32>
    %468 = arith.maximumf %465, %466 : vector<8x256xf32>
    %469 = arith.maximumf %467, %468 : vector<8x256xf32>
    %c200_405 = arith.constant 200 : index
    %c0_406 = arith.constant 0 : index
    %470 = vector.load %arg7[%c200_405, %c0_406] : memref<216x256xf32, #tpu.memory_space<vmem>>, vector<8x256xf32>
    tpu.vector_store %arg7[%c200_405, %c0_406], %469 {strides = array<i32>} : memref<216x256xf32, #tpu.memory_space<vmem>>, vector<8x256xf32>,
    %471 = arith.addf %463, %464 : vector<8x256xf32>
    %472 = arith.addf %471, %465 : vector<8x256xf32>
    %473 = arith.addf %472, %466 : vector<8x256xf32>
    %cst_407 = arith.constant 2.500000e-01 : f32
    %474 = vector.broadcast %cst_407 : f32 to vector<8x256xf32>
    %475 = arith.mulf %473, %474 : vector<8x256xf32>
    %c208_408 = arith.constant 208 : index
    %c0_409 = arith.constant 0 : index
    %476 = vector.load %arg7[%c208_408, %c0_409] : memref<216x256xf32, #tpu.memory_space<vmem>>, vector<8x256xf32>
    tpu.vector_store %arg7[%c208_408, %c0_409], %475 {strides = array<i32>} : memref<216x256xf32, #tpu.memory_space<vmem>>, vector<8x256xf32>,
    %c64_410 = arith.constant 64 : index
    %c0_411 = arith.constant 0 : index
    %477 = vector.load %arg4[%c64_410, %c0_411] : memref<112x216xf32, #tpu.memory_space<vmem>>, vector<24x216xf32>
    %c0_412 = arith.constant 0 : index
    %c0_413 = arith.constant 0 : index
    %478 = vector.load %arg7[%c0_412, %c0_413] : memref<216x256xf32, #tpu.memory_space<vmem>>, vector<216x256xf32>
    %cst_414 = arith.constant dense<0.000000e+00> : vector<24x256xf32>
    %479 = tpu.matmul %477, %478, %cst_414 {dimension_numbers = #tpu.dot_dimension_numbers<[1], [0], [0], [1], [0, 0, 1, 1], [], []>} : vector<24x216xf32>, vector<216x256xf32>, vector<24x256xf32> -> vector<24x256xf32>
    %480 = vector.extract_strided_slice %479 {offsets = [0, 0], sizes = [8, 256], strides = [1, 1]} : vector<24x256xf32> to vector<8x256xf32>
    %c3_415 = arith.constant 3 : index
    %c0_416 = arith.constant 0 : index
    %c0_417 = arith.constant 0 : index
    %481 = vector.load %arg6[%c3_415, %c0_416, %c0_417] : memref<6x8x256xf32, #tpu.memory_space<vmem>>, vector<1x8x256xf32>
    %482 = vector.shape_cast %481 : vector<1x8x256xf32> to vector<8x256xf32>
    %483 = arith.addf %482, %480 : vector<8x256xf32>
    %c3_418 = arith.constant 3 : index
    %c0_419 = arith.constant 0 : index
    %c0_420 = arith.constant 0 : index
    %484 = vector.load %arg6[%c3_418, %c0_419, %c0_420] : memref<6x8x256xf32, #tpu.memory_space<vmem>>, vector<1x8x256xf32>
    %485 = vector.shape_cast %484 : vector<1x8x256xf32> to vector<8x256xf32>
    %486 = vector.shape_cast %483 : vector<8x256xf32> to vector<1x8x256xf32>
    tpu.vector_store %arg6[%c3_418, %c0_419, %c0_420], %486 {strides = array<i32>} : memref<6x8x256xf32, #tpu.memory_space<vmem>>, vector<1x8x256xf32>,
    %487 = vector.extract_strided_slice %479 {offsets = [8, 0], sizes = [8, 256], strides = [1, 1]} : vector<24x256xf32> to vector<8x256xf32>
    %c4_421 = arith.constant 4 : index
    %c0_422 = arith.constant 0 : index
    %c0_423 = arith.constant 0 : index
    %488 = vector.load %arg6[%c4_421, %c0_422, %c0_423] : memref<6x8x256xf32, #tpu.memory_space<vmem>>, vector<1x8x256xf32>
    %489 = vector.shape_cast %488 : vector<1x8x256xf32> to vector<8x256xf32>
    %490 = arith.addf %489, %487 : vector<8x256xf32>
    %c4_424 = arith.constant 4 : index
    %c0_425 = arith.constant 0 : index
    %c0_426 = arith.constant 0 : index
    %491 = vector.load %arg6[%c4_424, %c0_425, %c0_426] : memref<6x8x256xf32, #tpu.memory_space<vmem>>, vector<1x8x256xf32>
    %492 = vector.shape_cast %491 : vector<1x8x256xf32> to vector<8x256xf32>
    %493 = vector.shape_cast %490 : vector<8x256xf32> to vector<1x8x256xf32>
    tpu.vector_store %arg6[%c4_424, %c0_425, %c0_426], %493 {strides = array<i32>} : memref<6x8x256xf32, #tpu.memory_space<vmem>>, vector<1x8x256xf32>,
    %494 = vector.extract_strided_slice %479 {offsets = [16, 0], sizes = [8, 256], strides = [1, 1]} : vector<24x256xf32> to vector<8x256xf32>
    %c5_427 = arith.constant 5 : index
    %c0_428 = arith.constant 0 : index
    %c0_429 = arith.constant 0 : index
    %495 = vector.load %arg6[%c5_427, %c0_428, %c0_429] : memref<6x8x256xf32, #tpu.memory_space<vmem>>, vector<1x8x256xf32>
    %496 = vector.shape_cast %495 : vector<1x8x256xf32> to vector<8x256xf32>
    %497 = arith.addf %496, %494 : vector<8x256xf32>
    %c5_430 = arith.constant 5 : index
    %c0_431 = arith.constant 0 : index
    %c0_432 = arith.constant 0 : index
    %498 = vector.load %arg6[%c5_430, %c0_431, %c0_432] : memref<6x8x256xf32, #tpu.memory_space<vmem>>, vector<1x8x256xf32>
    %499 = vector.shape_cast %498 : vector<1x8x256xf32> to vector<8x256xf32>
    %500 = vector.shape_cast %497 : vector<8x256xf32> to vector<1x8x256xf32>
    tpu.vector_store %arg6[%c5_430, %c0_431, %c0_432], %500 {strides = array<i32>} : memref<6x8x256xf32, #tpu.memory_space<vmem>>, vector<1x8x256xf32>,
    %c3_433 = arith.constant 3 : index
    %c0_434 = arith.constant 0 : index
    %c0_435 = arith.constant 0 : index
    %501 = vector.load %arg6[%c3_433, %c0_434, %c0_435] : memref<6x8x256xf32, #tpu.memory_space<vmem>>, vector<1x8x256xf32>
    %502 = vector.shape_cast %501 : vector<1x8x256xf32> to vector<8x256xf32>
    %c34_i32_436 = arith.constant 34 : i32
    %503 = tpu.dynamic_rotate %502 by %c34_i32_436 dim 1 : vector<8x256xf32>, i32 -> vector<8x256xf32>
    %c0_437 = arith.constant 0 : index
    %c0_438 = arith.constant 0 : index
    %504 = vector.load %arg1[%c0_437, %c0_438] : memref<25x256xf32, #tpu.memory_space<vmem>>, vector<1x256xf32>
    %505 = vector.broadcast %504 : vector<1x256xf32> to vector<8x256xf32>
    %506 = arith.mulf %503, %505 : vector<8x256xf32>
    %c0_439 = arith.constant 0 : index
    %c0_440 = arith.constant 0 : index
    %507 = vector.load %arg7[%c0_439, %c0_440] : memref<216x256xf32, #tpu.memory_space<vmem>>, vector<8x256xf32>
    tpu.vector_store %arg7[%c0_439, %c0_440], %506 {strides = array<i32>} : memref<216x256xf32, #tpu.memory_space<vmem>>, vector<8x256xf32>,
    %c33_i32_441 = arith.constant 33 : i32
    %508 = tpu.dynamic_rotate %502 by %c33_i32_441 dim 1 : vector<8x256xf32>, i32 -> vector<8x256xf32>
    %c1_442 = arith.constant 1 : index
    %c0_443 = arith.constant 0 : index
    %509 = vector.load %arg1[%c1_442, %c0_443] : memref<25x256xf32, #tpu.memory_space<vmem>>, vector<1x256xf32>
    %510 = vector.broadcast %509 : vector<1x256xf32> to vector<8x256xf32>
    %511 = arith.mulf %508, %510 : vector<8x256xf32>
    %c8_444 = arith.constant 8 : index
    %c0_445 = arith.constant 0 : index
    %512 = vector.load %arg7[%c8_444, %c0_445] : memref<216x256xf32, #tpu.memory_space<vmem>>, vector<8x256xf32>
    tpu.vector_store %arg7[%c8_444, %c0_445], %511 {strides = array<i32>} : memref<216x256xf32, #tpu.memory_space<vmem>>, vector<8x256xf32>,
    %c32_i32_446 = arith.constant 32 : i32
    %513 = tpu.dynamic_rotate %502 by %c32_i32_446 dim 1 : vector<8x256xf32>, i32 -> vector<8x256xf32>
    %c2_447 = arith.constant 2 : index
    %c0_448 = arith.constant 0 : index
    %514 = vector.load %arg1[%c2_447, %c0_448] : memref<25x256xf32, #tpu.memory_space<vmem>>, vector<1x256xf32>
    %515 = vector.broadcast %514 : vector<1x256xf32> to vector<8x256xf32>
    %516 = arith.mulf %513, %515 : vector<8x256xf32>
    %c16_449 = arith.constant 16 : index
    %c0_450 = arith.constant 0 : index
    %517 = vector.load %arg7[%c16_449, %c0_450] : memref<216x256xf32, #tpu.memory_space<vmem>>, vector<8x256xf32>
    tpu.vector_store %arg7[%c16_449, %c0_450], %516 {strides = array<i32>} : memref<216x256xf32, #tpu.memory_space<vmem>>, vector<8x256xf32>,
    %c31_i32_451 = arith.constant 31 : i32
    %518 = tpu.dynamic_rotate %502 by %c31_i32_451 dim 1 : vector<8x256xf32>, i32 -> vector<8x256xf32>
    %c3_452 = arith.constant 3 : index
    %c0_453 = arith.constant 0 : index
    %519 = vector.load %arg1[%c3_452, %c0_453] : memref<25x256xf32, #tpu.memory_space<vmem>>, vector<1x256xf32>
    %520 = vector.broadcast %519 : vector<1x256xf32> to vector<8x256xf32>
    %521 = arith.mulf %518, %520 : vector<8x256xf32>
    %c24_454 = arith.constant 24 : index
    %c0_455 = arith.constant 0 : index
    %522 = vector.load %arg7[%c24_454, %c0_455] : memref<216x256xf32, #tpu.memory_space<vmem>>, vector<8x256xf32>
    tpu.vector_store %arg7[%c24_454, %c0_455], %521 {strides = array<i32>} : memref<216x256xf32, #tpu.memory_space<vmem>>, vector<8x256xf32>,
    %c30_i32_456 = arith.constant 30 : i32
    %523 = tpu.dynamic_rotate %502 by %c30_i32_456 dim 1 : vector<8x256xf32>, i32 -> vector<8x256xf32>
    %c4_457 = arith.constant 4 : index
    %c0_458 = arith.constant 0 : index
    %524 = vector.load %arg1[%c4_457, %c0_458] : memref<25x256xf32, #tpu.memory_space<vmem>>, vector<1x256xf32>
    %525 = vector.broadcast %524 : vector<1x256xf32> to vector<8x256xf32>
    %526 = arith.mulf %523, %525 : vector<8x256xf32>
    %c32_459 = arith.constant 32 : index
    %c0_460 = arith.constant 0 : index
    %527 = vector.load %arg7[%c32_459, %c0_460] : memref<216x256xf32, #tpu.memory_space<vmem>>, vector<8x256xf32>
    tpu.vector_store %arg7[%c32_459, %c0_460], %526 {strides = array<i32>} : memref<216x256xf32, #tpu.memory_space<vmem>>, vector<8x256xf32>,
    %c18_i32_461 = arith.constant 18 : i32
    %528 = tpu.dynamic_rotate %502 by %c18_i32_461 dim 1 : vector<8x256xf32>, i32 -> vector<8x256xf32>
    %c5_462 = arith.constant 5 : index
    %c0_463 = arith.constant 0 : index
    %529 = vector.load %arg1[%c5_462, %c0_463] : memref<25x256xf32, #tpu.memory_space<vmem>>, vector<1x256xf32>
    %530 = vector.broadcast %529 : vector<1x256xf32> to vector<8x256xf32>
    %531 = arith.mulf %528, %530 : vector<8x256xf32>
    %c40_464 = arith.constant 40 : index
    %c0_465 = arith.constant 0 : index
    %532 = vector.load %arg7[%c40_464, %c0_465] : memref<216x256xf32, #tpu.memory_space<vmem>>, vector<8x256xf32>
    tpu.vector_store %arg7[%c40_464, %c0_465], %531 {strides = array<i32>} : memref<216x256xf32, #tpu.memory_space<vmem>>, vector<8x256xf32>,
    %c17_i32_466 = arith.constant 17 : i32
    %533 = tpu.dynamic_rotate %502 by %c17_i32_466 dim 1 : vector<8x256xf32>, i32 -> vector<8x256xf32>
    %c6_467 = arith.constant 6 : index
    %c0_468 = arith.constant 0 : index
    %534 = vector.load %arg1[%c6_467, %c0_468] : memref<25x256xf32, #tpu.memory_space<vmem>>, vector<1x256xf32>
    %535 = vector.broadcast %534 : vector<1x256xf32> to vector<8x256xf32>
    %536 = arith.mulf %533, %535 : vector<8x256xf32>
    %c48_469 = arith.constant 48 : index
    %c0_470 = arith.constant 0 : index
    %537 = vector.load %arg7[%c48_469, %c0_470] : memref<216x256xf32, #tpu.memory_space<vmem>>, vector<8x256xf32>
    tpu.vector_store %arg7[%c48_469, %c0_470], %536 {strides = array<i32>} : memref<216x256xf32, #tpu.memory_space<vmem>>, vector<8x256xf32>,
    %c16_i32_471 = arith.constant 16 : i32
    %538 = tpu.dynamic_rotate %502 by %c16_i32_471 dim 1 : vector<8x256xf32>, i32 -> vector<8x256xf32>
    %c7_472 = arith.constant 7 : index
    %c0_473 = arith.constant 0 : index
    %539 = vector.load %arg1[%c7_472, %c0_473] : memref<25x256xf32, #tpu.memory_space<vmem>>, vector<1x256xf32>
    %540 = vector.broadcast %539 : vector<1x256xf32> to vector<8x256xf32>
    %541 = arith.mulf %538, %540 : vector<8x256xf32>
    %c56_474 = arith.constant 56 : index
    %c0_475 = arith.constant 0 : index
    %542 = vector.load %arg7[%c56_474, %c0_475] : memref<216x256xf32, #tpu.memory_space<vmem>>, vector<8x256xf32>
    tpu.vector_store %arg7[%c56_474, %c0_475], %541 {strides = array<i32>} : memref<216x256xf32, #tpu.memory_space<vmem>>, vector<8x256xf32>,
    %c15_i32_476 = arith.constant 15 : i32
    %543 = tpu.dynamic_rotate %502 by %c15_i32_476 dim 1 : vector<8x256xf32>, i32 -> vector<8x256xf32>
    %c8_477 = arith.constant 8 : index
    %c0_478 = arith.constant 0 : index
    %544 = vector.load %arg1[%c8_477, %c0_478] : memref<25x256xf32, #tpu.memory_space<vmem>>, vector<1x256xf32>
    %545 = vector.broadcast %544 : vector<1x256xf32> to vector<8x256xf32>
    %546 = arith.mulf %543, %545 : vector<8x256xf32>
    %c64_479 = arith.constant 64 : index
    %c0_480 = arith.constant 0 : index
    %547 = vector.load %arg7[%c64_479, %c0_480] : memref<216x256xf32, #tpu.memory_space<vmem>>, vector<8x256xf32>
    tpu.vector_store %arg7[%c64_479, %c0_480], %546 {strides = array<i32>} : memref<216x256xf32, #tpu.memory_space<vmem>>, vector<8x256xf32>,
    %c14_i32_481 = arith.constant 14 : i32
    %548 = tpu.dynamic_rotate %502 by %c14_i32_481 dim 1 : vector<8x256xf32>, i32 -> vector<8x256xf32>
    %c9_482 = arith.constant 9 : index
    %c0_483 = arith.constant 0 : index
    %549 = vector.load %arg1[%c9_482, %c0_483] : memref<25x256xf32, #tpu.memory_space<vmem>>, vector<1x256xf32>
    %550 = vector.broadcast %549 : vector<1x256xf32> to vector<8x256xf32>
    %551 = arith.mulf %548, %550 : vector<8x256xf32>
    %c72_484 = arith.constant 72 : index
    %c0_485 = arith.constant 0 : index
    %552 = vector.load %arg7[%c72_484, %c0_485] : memref<216x256xf32, #tpu.memory_space<vmem>>, vector<8x256xf32>
    tpu.vector_store %arg7[%c72_484, %c0_485], %551 {strides = array<i32>} : memref<216x256xf32, #tpu.memory_space<vmem>>, vector<8x256xf32>,
    %c2_i32_486 = arith.constant 2 : i32
    %553 = tpu.dynamic_rotate %502 by %c2_i32_486 dim 1 : vector<8x256xf32>, i32 -> vector<8x256xf32>
    %c10_487 = arith.constant 10 : index
    %c0_488 = arith.constant 0 : index
    %554 = vector.load %arg1[%c10_487, %c0_488] : memref<25x256xf32, #tpu.memory_space<vmem>>, vector<1x256xf32>
    %555 = vector.broadcast %554 : vector<1x256xf32> to vector<8x256xf32>
    %556 = arith.mulf %553, %555 : vector<8x256xf32>
    %c80_489 = arith.constant 80 : index
    %c0_490 = arith.constant 0 : index
    %557 = vector.load %arg7[%c80_489, %c0_490] : memref<216x256xf32, #tpu.memory_space<vmem>>, vector<8x256xf32>
    tpu.vector_store %arg7[%c80_489, %c0_490], %556 {strides = array<i32>} : memref<216x256xf32, #tpu.memory_space<vmem>>, vector<8x256xf32>,
    %c1_i32_491 = arith.constant 1 : i32
    %558 = tpu.dynamic_rotate %502 by %c1_i32_491 dim 1 : vector<8x256xf32>, i32 -> vector<8x256xf32>
    %c11_492 = arith.constant 11 : index
    %c0_493 = arith.constant 0 : index
    %559 = vector.load %arg1[%c11_492, %c0_493] : memref<25x256xf32, #tpu.memory_space<vmem>>, vector<1x256xf32>
    %560 = vector.broadcast %559 : vector<1x256xf32> to vector<8x256xf32>
    %561 = arith.mulf %558, %560 : vector<8x256xf32>
    %c88_494 = arith.constant 88 : index
    %c0_495 = arith.constant 0 : index
    %562 = vector.load %arg7[%c88_494, %c0_495] : memref<216x256xf32, #tpu.memory_space<vmem>>, vector<8x256xf32>
    tpu.vector_store %arg7[%c88_494, %c0_495], %561 {strides = array<i32>} : memref<216x256xf32, #tpu.memory_space<vmem>>, vector<8x256xf32>,
    %c96_496 = arith.constant 96 : index
    %c0_497 = arith.constant 0 : index
    %563 = vector.load %arg7[%c96_496, %c0_497] : memref<216x256xf32, #tpu.memory_space<vmem>>, vector<8x256xf32>
    tpu.vector_store %arg7[%c96_496, %c0_497], %502 {strides = array<i32>} : memref<216x256xf32, #tpu.memory_space<vmem>>, vector<8x256xf32>,
    %c255_i32_498 = arith.constant 255 : i32
    %564 = tpu.dynamic_rotate %502 by %c255_i32_498 dim 1 : vector<8x256xf32>, i32 -> vector<8x256xf32>
    %c13_499 = arith.constant 13 : index
    %c0_500 = arith.constant 0 : index
    %565 = vector.load %arg1[%c13_499, %c0_500] : memref<25x256xf32, #tpu.memory_space<vmem>>, vector<1x256xf32>
    %566 = vector.broadcast %565 : vector<1x256xf32> to vector<8x256xf32>
    %567 = arith.mulf %564, %566 : vector<8x256xf32>
    %c104_501 = arith.constant 104 : index
    %c0_502 = arith.constant 0 : index
    %568 = vector.load %arg7[%c104_501, %c0_502] : memref<216x256xf32, #tpu.memory_space<vmem>>, vector<8x256xf32>
    tpu.vector_store %arg7[%c104_501, %c0_502], %567 {strides = array<i32>} : memref<216x256xf32, #tpu.memory_space<vmem>>, vector<8x256xf32>,
    %c254_i32_503 = arith.constant 254 : i32
    %569 = tpu.dynamic_rotate %502 by %c254_i32_503 dim 1 : vector<8x256xf32>, i32 -> vector<8x256xf32>
    %c14_504 = arith.constant 14 : index
    %c0_505 = arith.constant 0 : index
    %570 = vector.load %arg1[%c14_504, %c0_505] : memref<25x256xf32, #tpu.memory_space<vmem>>, vector<1x256xf32>
    %571 = vector.broadcast %570 : vector<1x256xf32> to vector<8x256xf32>
    %572 = arith.mulf %569, %571 : vector<8x256xf32>
    %c112_506 = arith.constant 112 : index
    %c0_507 = arith.constant 0 : index
    %573 = vector.load %arg7[%c112_506, %c0_507] : memref<216x256xf32, #tpu.memory_space<vmem>>, vector<8x256xf32>
    tpu.vector_store %arg7[%c112_506, %c0_507], %572 {strides = array<i32>} : memref<216x256xf32, #tpu.memory_space<vmem>>, vector<8x256xf32>,
    %c242_i32_508 = arith.constant 242 : i32
    %574 = tpu.dynamic_rotate %502 by %c242_i32_508 dim 1 : vector<8x256xf32>, i32 -> vector<8x256xf32>
    %c15_509 = arith.constant 15 : index
    %c0_510 = arith.constant 0 : index
    %575 = vector.load %arg1[%c15_509, %c0_510] : memref<25x256xf32, #tpu.memory_space<vmem>>, vector<1x256xf32>
    %576 = vector.broadcast %575 : vector<1x256xf32> to vector<8x256xf32>
    %577 = arith.mulf %574, %576 : vector<8x256xf32>
    %c120_511 = arith.constant 120 : index
    %c0_512 = arith.constant 0 : index
    %578 = vector.load %arg7[%c120_511, %c0_512] : memref<216x256xf32, #tpu.memory_space<vmem>>, vector<8x256xf32>
    tpu.vector_store %arg7[%c120_511, %c0_512], %577 {strides = array<i32>} : memref<216x256xf32, #tpu.memory_space<vmem>>, vector<8x256xf32>,
    %c241_i32_513 = arith.constant 241 : i32
    %579 = tpu.dynamic_rotate %502 by %c241_i32_513 dim 1 : vector<8x256xf32>, i32 -> vector<8x256xf32>
    %c16_514 = arith.constant 16 : index
    %c0_515 = arith.constant 0 : index
    %580 = vector.load %arg1[%c16_514, %c0_515] : memref<25x256xf32, #tpu.memory_space<vmem>>, vector<1x256xf32>
    %581 = vector.broadcast %580 : vector<1x256xf32> to vector<8x256xf32>
    %582 = arith.mulf %579, %581 : vector<8x256xf32>
    %c128_516 = arith.constant 128 : index
    %c0_517 = arith.constant 0 : index
    %583 = vector.load %arg7[%c128_516, %c0_517] : memref<216x256xf32, #tpu.memory_space<vmem>>, vector<8x256xf32>
    tpu.vector_store %arg7[%c128_516, %c0_517], %582 {strides = array<i32>} : memref<216x256xf32, #tpu.memory_space<vmem>>, vector<8x256xf32>,
    %c240_i32_518 = arith.constant 240 : i32
    %584 = tpu.dynamic_rotate %502 by %c240_i32_518 dim 1 : vector<8x256xf32>, i32 -> vector<8x256xf32>
    %c17_519 = arith.constant 17 : index
    %c0_520 = arith.constant 0 : index
    %585 = vector.load %arg1[%c17_519, %c0_520] : memref<25x256xf32, #tpu.memory_space<vmem>>, vector<1x256xf32>
    %586 = vector.broadcast %585 : vector<1x256xf32> to vector<8x256xf32>
    %587 = arith.mulf %584, %586 : vector<8x256xf32>
    %c136_521 = arith.constant 136 : index
    %c0_522 = arith.constant 0 : index
    %588 = vector.load %arg7[%c136_521, %c0_522] : memref<216x256xf32, #tpu.memory_space<vmem>>, vector<8x256xf32>
    tpu.vector_store %arg7[%c136_521, %c0_522], %587 {strides = array<i32>} : memref<216x256xf32, #tpu.memory_space<vmem>>, vector<8x256xf32>,
    %c239_i32_523 = arith.constant 239 : i32
    %589 = tpu.dynamic_rotate %502 by %c239_i32_523 dim 1 : vector<8x256xf32>, i32 -> vector<8x256xf32>
    %c18_524 = arith.constant 18 : index
    %c0_525 = arith.constant 0 : index
    %590 = vector.load %arg1[%c18_524, %c0_525] : memref<25x256xf32, #tpu.memory_space<vmem>>, vector<1x256xf32>
    %591 = vector.broadcast %590 : vector<1x256xf32> to vector<8x256xf32>
    %592 = arith.mulf %589, %591 : vector<8x256xf32>
    %c144_526 = arith.constant 144 : index
    %c0_527 = arith.constant 0 : index
    %593 = vector.load %arg7[%c144_526, %c0_527] : memref<216x256xf32, #tpu.memory_space<vmem>>, vector<8x256xf32>
    tpu.vector_store %arg7[%c144_526, %c0_527], %592 {strides = array<i32>} : memref<216x256xf32, #tpu.memory_space<vmem>>, vector<8x256xf32>,
    %c238_i32_528 = arith.constant 238 : i32
    %594 = tpu.dynamic_rotate %502 by %c238_i32_528 dim 1 : vector<8x256xf32>, i32 -> vector<8x256xf32>
    %c19_529 = arith.constant 19 : index
    %c0_530 = arith.constant 0 : index
    %595 = vector.load %arg1[%c19_529, %c0_530] : memref<25x256xf32, #tpu.memory_space<vmem>>, vector<1x256xf32>
    %596 = vector.broadcast %595 : vector<1x256xf32> to vector<8x256xf32>
    %597 = arith.mulf %594, %596 : vector<8x256xf32>
    %c152_531 = arith.constant 152 : index
    %c0_532 = arith.constant 0 : index
    %598 = vector.load %arg7[%c152_531, %c0_532] : memref<216x256xf32, #tpu.memory_space<vmem>>, vector<8x256xf32>
    tpu.vector_store %arg7[%c152_531, %c0_532], %597 {strides = array<i32>} : memref<216x256xf32, #tpu.memory_space<vmem>>, vector<8x256xf32>,
    %c226_i32_533 = arith.constant 226 : i32
    %599 = tpu.dynamic_rotate %502 by %c226_i32_533 dim 1 : vector<8x256xf32>, i32 -> vector<8x256xf32>
    %c20_534 = arith.constant 20 : index
    %c0_535 = arith.constant 0 : index
    %600 = vector.load %arg1[%c20_534, %c0_535] : memref<25x256xf32, #tpu.memory_space<vmem>>, vector<1x256xf32>
    %601 = vector.broadcast %600 : vector<1x256xf32> to vector<8x256xf32>
    %602 = arith.mulf %599, %601 : vector<8x256xf32>
    %c160_536 = arith.constant 160 : index
    %c0_537 = arith.constant 0 : index
    %603 = vector.load %arg7[%c160_536, %c0_537] : memref<216x256xf32, #tpu.memory_space<vmem>>, vector<8x256xf32>
    tpu.vector_store %arg7[%c160_536, %c0_537], %602 {strides = array<i32>} : memref<216x256xf32, #tpu.memory_space<vmem>>, vector<8x256xf32>,
    %c225_i32_538 = arith.constant 225 : i32
    %604 = tpu.dynamic_rotate %502 by %c225_i32_538 dim 1 : vector<8x256xf32>, i32 -> vector<8x256xf32>
    %c21_539 = arith.constant 21 : index
    %c0_540 = arith.constant 0 : index
    %605 = vector.load %arg1[%c21_539, %c0_540] : memref<25x256xf32, #tpu.memory_space<vmem>>, vector<1x256xf32>
    %606 = vector.broadcast %605 : vector<1x256xf32> to vector<8x256xf32>
    %607 = arith.mulf %604, %606 : vector<8x256xf32>
    %c168_541 = arith.constant 168 : index
    %c0_542 = arith.constant 0 : index
    %608 = vector.load %arg7[%c168_541, %c0_542] : memref<216x256xf32, #tpu.memory_space<vmem>>, vector<8x256xf32>
    tpu.vector_store %arg7[%c168_541, %c0_542], %607 {strides = array<i32>} : memref<216x256xf32, #tpu.memory_space<vmem>>, vector<8x256xf32>,
    %c224_i32_543 = arith.constant 224 : i32
    %609 = tpu.dynamic_rotate %502 by %c224_i32_543 dim 1 : vector<8x256xf32>, i32 -> vector<8x256xf32>
    %c22_544 = arith.constant 22 : index
    %c0_545 = arith.constant 0 : index
    %610 = vector.load %arg1[%c22_544, %c0_545] : memref<25x256xf32, #tpu.memory_space<vmem>>, vector<1x256xf32>
    %611 = vector.broadcast %610 : vector<1x256xf32> to vector<8x256xf32>
    %612 = arith.mulf %609, %611 : vector<8x256xf32>
    %c176_546 = arith.constant 176 : index
    %c0_547 = arith.constant 0 : index
    %613 = vector.load %arg7[%c176_546, %c0_547] : memref<216x256xf32, #tpu.memory_space<vmem>>, vector<8x256xf32>
    tpu.vector_store %arg7[%c176_546, %c0_547], %612 {strides = array<i32>} : memref<216x256xf32, #tpu.memory_space<vmem>>, vector<8x256xf32>,
    %c223_i32_548 = arith.constant 223 : i32
    %614 = tpu.dynamic_rotate %502 by %c223_i32_548 dim 1 : vector<8x256xf32>, i32 -> vector<8x256xf32>
    %c23_549 = arith.constant 23 : index
    %c0_550 = arith.constant 0 : index
    %615 = vector.load %arg1[%c23_549, %c0_550] : memref<25x256xf32, #tpu.memory_space<vmem>>, vector<1x256xf32>
    %616 = vector.broadcast %615 : vector<1x256xf32> to vector<8x256xf32>
    %617 = arith.mulf %614, %616 : vector<8x256xf32>
    %c184_551 = arith.constant 184 : index
    %c0_552 = arith.constant 0 : index
    %618 = vector.load %arg7[%c184_551, %c0_552] : memref<216x256xf32, #tpu.memory_space<vmem>>, vector<8x256xf32>
    tpu.vector_store %arg7[%c184_551, %c0_552], %617 {strides = array<i32>} : memref<216x256xf32, #tpu.memory_space<vmem>>, vector<8x256xf32>,
    %c222_i32_553 = arith.constant 222 : i32
    %619 = tpu.dynamic_rotate %502 by %c222_i32_553 dim 1 : vector<8x256xf32>, i32 -> vector<8x256xf32>
    %c24_554 = arith.constant 24 : index
    %c0_555 = arith.constant 0 : index
    %620 = vector.load %arg1[%c24_554, %c0_555] : memref<25x256xf32, #tpu.memory_space<vmem>>, vector<1x256xf32>
    %621 = vector.broadcast %620 : vector<1x256xf32> to vector<8x256xf32>
    %622 = arith.mulf %619, %621 : vector<8x256xf32>
    %c192_556 = arith.constant 192 : index
    %c0_557 = arith.constant 0 : index
    %623 = vector.load %arg7[%c192_556, %c0_557] : memref<216x256xf32, #tpu.memory_space<vmem>>, vector<8x256xf32>
    tpu.vector_store %arg7[%c192_556, %c0_557], %622 {strides = array<i32>} : memref<216x256xf32, #tpu.memory_space<vmem>>, vector<8x256xf32>,
    %c96_558 = arith.constant 96 : index
    %c0_559 = arith.constant 0 : index
    %624 = vector.load %arg7[%c96_558, %c0_559] : memref<216x256xf32, #tpu.memory_space<vmem>>, vector<8x256xf32>
    %c104_560 = arith.constant 104 : index
    %c0_561 = arith.constant 0 : index
    %625 = vector.load %arg7[%c104_560, %c0_561] : memref<216x256xf32, #tpu.memory_space<vmem>>, vector<8x256xf32>
    %c136_562 = arith.constant 136 : index
    %c0_563 = arith.constant 0 : index
    %626 = vector.load %arg7[%c136_562, %c0_563] : memref<216x256xf32, #tpu.memory_space<vmem>>, vector<8x256xf32>
    %c144_564 = arith.constant 144 : index
    %c0_565 = arith.constant 0 : index
    %627 = vector.load %arg7[%c144_564, %c0_565] : memref<216x256xf32, #tpu.memory_space<vmem>>, vector<8x256xf32>
    %628 = arith.maximumf %624, %625 : vector<8x256xf32>
    %629 = arith.maximumf %626, %627 : vector<8x256xf32>
    %630 = arith.maximumf %628, %629 : vector<8x256xf32>
    %c200_566 = arith.constant 200 : index
    %c0_567 = arith.constant 0 : index
    %631 = vector.load %arg7[%c200_566, %c0_567] : memref<216x256xf32, #tpu.memory_space<vmem>>, vector<8x256xf32>
    tpu.vector_store %arg7[%c200_566, %c0_567], %630 {strides = array<i32>} : memref<216x256xf32, #tpu.memory_space<vmem>>, vector<8x256xf32>,
    %632 = arith.addf %624, %625 : vector<8x256xf32>
    %633 = arith.addf %632, %626 : vector<8x256xf32>
    %634 = arith.addf %633, %627 : vector<8x256xf32>
    %cst_568 = arith.constant 2.500000e-01 : f32
    %635 = vector.broadcast %cst_568 : f32 to vector<8x256xf32>
    %636 = arith.mulf %634, %635 : vector<8x256xf32>
    %c208_569 = arith.constant 208 : index
    %c0_570 = arith.constant 0 : index
    %637 = vector.load %arg7[%c208_569, %c0_570] : memref<216x256xf32, #tpu.memory_space<vmem>>, vector<8x256xf32>
    tpu.vector_store %arg7[%c208_569, %c0_570], %636 {strides = array<i32>} : memref<216x256xf32, #tpu.memory_space<vmem>>, vector<8x256xf32>,
    %c88_571 = arith.constant 88 : index
    %c0_572 = arith.constant 0 : index
    %638 = vector.load %arg4[%c88_571, %c0_572] : memref<112x216xf32, #tpu.memory_space<vmem>>, vector<16x216xf32>
    %c0_573 = arith.constant 0 : index
    %c0_574 = arith.constant 0 : index
    %639 = vector.load %arg7[%c0_573, %c0_574] : memref<216x256xf32, #tpu.memory_space<vmem>>, vector<216x256xf32>
    %cst_575 = arith.constant dense<0.000000e+00> : vector<16x256xf32>
    %640 = tpu.matmul %638, %639, %cst_575 {dimension_numbers = #tpu.dot_dimension_numbers<[1], [0], [0], [1], [0, 0, 1, 1], [], []>} : vector<16x216xf32>, vector<216x256xf32>, vector<16x256xf32> -> vector<16x256xf32>
    %641 = vector.extract_strided_slice %640 {offsets = [0, 0], sizes = [8, 256], strides = [1, 1]} : vector<16x256xf32> to vector<8x256xf32>
    %c4_576 = arith.constant 4 : index
    %c0_577 = arith.constant 0 : index
    %c0_578 = arith.constant 0 : index
    %642 = vector.load %arg6[%c4_576, %c0_577, %c0_578] : memref<6x8x256xf32, #tpu.memory_space<vmem>>, vector<1x8x256xf32>
    %643 = vector.shape_cast %642 : vector<1x8x256xf32> to vector<8x256xf32>
    %644 = arith.addf %643, %641 : vector<8x256xf32>
    %c4_579 = arith.constant 4 : index
    %c0_580 = arith.constant 0 : index
    %c0_581 = arith.constant 0 : index
    %645 = vector.load %arg6[%c4_579, %c0_580, %c0_581] : memref<6x8x256xf32, #tpu.memory_space<vmem>>, vector<1x8x256xf32>
    %646 = vector.shape_cast %645 : vector<1x8x256xf32> to vector<8x256xf32>
    %647 = vector.shape_cast %644 : vector<8x256xf32> to vector<1x8x256xf32>
    tpu.vector_store %arg6[%c4_579, %c0_580, %c0_581], %647 {strides = array<i32>} : memref<6x8x256xf32, #tpu.memory_space<vmem>>, vector<1x8x256xf32>,
    %648 = vector.extract_strided_slice %640 {offsets = [8, 0], sizes = [8, 256], strides = [1, 1]} : vector<16x256xf32> to vector<8x256xf32>
    %c5_582 = arith.constant 5 : index
    %c0_583 = arith.constant 0 : index
    %c0_584 = arith.constant 0 : index
    %649 = vector.load %arg6[%c5_582, %c0_583, %c0_584] : memref<6x8x256xf32, #tpu.memory_space<vmem>>, vector<1x8x256xf32>
    %650 = vector.shape_cast %649 : vector<1x8x256xf32> to vector<8x256xf32>
    %651 = arith.addf %650, %648 : vector<8x256xf32>
    %c5_585 = arith.constant 5 : index
    %c0_586 = arith.constant 0 : index
    %c0_587 = arith.constant 0 : index
    %652 = vector.load %arg6[%c5_585, %c0_586, %c0_587] : memref<6x8x256xf32, #tpu.memory_space<vmem>>, vector<1x8x256xf32>
    %653 = vector.shape_cast %652 : vector<1x8x256xf32> to vector<8x256xf32>
    %654 = vector.shape_cast %651 : vector<8x256xf32> to vector<1x8x256xf32>
    tpu.vector_store %arg6[%c5_585, %c0_586, %c0_587], %654 {strides = array<i32>} : memref<6x8x256xf32, #tpu.memory_space<vmem>>, vector<1x8x256xf32>,
    %c4_588 = arith.constant 4 : index
    %c0_589 = arith.constant 0 : index
    %c0_590 = arith.constant 0 : index
    %655 = vector.load %arg6[%c4_588, %c0_589, %c0_590] : memref<6x8x256xf32, #tpu.memory_space<vmem>>, vector<1x8x256xf32>
    %656 = vector.shape_cast %655 : vector<1x8x256xf32> to vector<8x256xf32>
    %c34_i32_591 = arith.constant 34 : i32
    %657 = tpu.dynamic_rotate %656 by %c34_i32_591 dim 1 : vector<8x256xf32>, i32 -> vector<8x256xf32>
    %c0_592 = arith.constant 0 : index
    %c0_593 = arith.constant 0 : index
    %658 = vector.load %arg1[%c0_592, %c0_593] : memref<25x256xf32, #tpu.memory_space<vmem>>, vector<1x256xf32>
    %659 = vector.broadcast %658 : vector<1x256xf32> to vector<8x256xf32>
    %660 = arith.mulf %657, %659 : vector<8x256xf32>
    %c0_594 = arith.constant 0 : index
    %c0_595 = arith.constant 0 : index
    %661 = vector.load %arg7[%c0_594, %c0_595] : memref<216x256xf32, #tpu.memory_space<vmem>>, vector<8x256xf32>
    tpu.vector_store %arg7[%c0_594, %c0_595], %660 {strides = array<i32>} : memref<216x256xf32, #tpu.memory_space<vmem>>, vector<8x256xf32>,
    %c33_i32_596 = arith.constant 33 : i32
    %662 = tpu.dynamic_rotate %656 by %c33_i32_596 dim 1 : vector<8x256xf32>, i32 -> vector<8x256xf32>
    %c1_597 = arith.constant 1 : index
    %c0_598 = arith.constant 0 : index
    %663 = vector.load %arg1[%c1_597, %c0_598] : memref<25x256xf32, #tpu.memory_space<vmem>>, vector<1x256xf32>
    %664 = vector.broadcast %663 : vector<1x256xf32> to vector<8x256xf32>
    %665 = arith.mulf %662, %664 : vector<8x256xf32>
    %c8_599 = arith.constant 8 : index
    %c0_600 = arith.constant 0 : index
    %666 = vector.load %arg7[%c8_599, %c0_600] : memref<216x256xf32, #tpu.memory_space<vmem>>, vector<8x256xf32>
    tpu.vector_store %arg7[%c8_599, %c0_600], %665 {strides = array<i32>} : memref<216x256xf32, #tpu.memory_space<vmem>>, vector<8x256xf32>,
    %c32_i32_601 = arith.constant 32 : i32
    %667 = tpu.dynamic_rotate %656 by %c32_i32_601 dim 1 : vector<8x256xf32>, i32 -> vector<8x256xf32>
    %c2_602 = arith.constant 2 : index
    %c0_603 = arith.constant 0 : index
    %668 = vector.load %arg1[%c2_602, %c0_603] : memref<25x256xf32, #tpu.memory_space<vmem>>, vector<1x256xf32>
    %669 = vector.broadcast %668 : vector<1x256xf32> to vector<8x256xf32>
    %670 = arith.mulf %667, %669 : vector<8x256xf32>
    %c16_604 = arith.constant 16 : index
    %c0_605 = arith.constant 0 : index
    %671 = vector.load %arg7[%c16_604, %c0_605] : memref<216x256xf32, #tpu.memory_space<vmem>>, vector<8x256xf32>
    tpu.vector_store %arg7[%c16_604, %c0_605], %670 {strides = array<i32>} : memref<216x256xf32, #tpu.memory_space<vmem>>, vector<8x256xf32>,
    %c31_i32_606 = arith.constant 31 : i32
    %672 = tpu.dynamic_rotate %656 by %c31_i32_606 dim 1 : vector<8x256xf32>, i32 -> vector<8x256xf32>
    %c3_607 = arith.constant 3 : index
    %c0_608 = arith.constant 0 : index
    %673 = vector.load %arg1[%c3_607, %c0_608] : memref<25x256xf32, #tpu.memory_space<vmem>>, vector<1x256xf32>
    %674 = vector.broadcast %673 : vector<1x256xf32> to vector<8x256xf32>
    %675 = arith.mulf %672, %674 : vector<8x256xf32>
    %c24_609 = arith.constant 24 : index
    %c0_610 = arith.constant 0 : index
    %676 = vector.load %arg7[%c24_609, %c0_610] : memref<216x256xf32, #tpu.memory_space<vmem>>, vector<8x256xf32>
    tpu.vector_store %arg7[%c24_609, %c0_610], %675 {strides = array<i32>} : memref<216x256xf32, #tpu.memory_space<vmem>>, vector<8x256xf32>,
    %c30_i32_611 = arith.constant 30 : i32
    %677 = tpu.dynamic_rotate %656 by %c30_i32_611 dim 1 : vector<8x256xf32>, i32 -> vector<8x256xf32>
    %c4_612 = arith.constant 4 : index
    %c0_613 = arith.constant 0 : index
    %678 = vector.load %arg1[%c4_612, %c0_613] : memref<25x256xf32, #tpu.memory_space<vmem>>, vector<1x256xf32>
    %679 = vector.broadcast %678 : vector<1x256xf32> to vector<8x256xf32>
    %680 = arith.mulf %677, %679 : vector<8x256xf32>
    %c32_614 = arith.constant 32 : index
    %c0_615 = arith.constant 0 : index
    %681 = vector.load %arg7[%c32_614, %c0_615] : memref<216x256xf32, #tpu.memory_space<vmem>>, vector<8x256xf32>
    tpu.vector_store %arg7[%c32_614, %c0_615], %680 {strides = array<i32>} : memref<216x256xf32, #tpu.memory_space<vmem>>, vector<8x256xf32>,
    %c18_i32_616 = arith.constant 18 : i32
    %682 = tpu.dynamic_rotate %656 by %c18_i32_616 dim 1 : vector<8x256xf32>, i32 -> vector<8x256xf32>
    %c5_617 = arith.constant 5 : index
    %c0_618 = arith.constant 0 : index
    %683 = vector.load %arg1[%c5_617, %c0_618] : memref<25x256xf32, #tpu.memory_space<vmem>>, vector<1x256xf32>
    %684 = vector.broadcast %683 : vector<1x256xf32> to vector<8x256xf32>
    %685 = arith.mulf %682, %684 : vector<8x256xf32>
    %c40_619 = arith.constant 40 : index
    %c0_620 = arith.constant 0 : index
    %686 = vector.load %arg7[%c40_619, %c0_620] : memref<216x256xf32, #tpu.memory_space<vmem>>, vector<8x256xf32>
    tpu.vector_store %arg7[%c40_619, %c0_620], %685 {strides = array<i32>} : memref<216x256xf32, #tpu.memory_space<vmem>>, vector<8x256xf32>,
    %c17_i32_621 = arith.constant 17 : i32
    %687 = tpu.dynamic_rotate %656 by %c17_i32_621 dim 1 : vector<8x256xf32>, i32 -> vector<8x256xf32>
    %c6_622 = arith.constant 6 : index
    %c0_623 = arith.constant 0 : index
    %688 = vector.load %arg1[%c6_622, %c0_623] : memref<25x256xf32, #tpu.memory_space<vmem>>, vector<1x256xf32>
    %689 = vector.broadcast %688 : vector<1x256xf32> to vector<8x256xf32>
    %690 = arith.mulf %687, %689 : vector<8x256xf32>
    %c48_624 = arith.constant 48 : index
    %c0_625 = arith.constant 0 : index
    %691 = vector.load %arg7[%c48_624, %c0_625] : memref<216x256xf32, #tpu.memory_space<vmem>>, vector<8x256xf32>
    tpu.vector_store %arg7[%c48_624, %c0_625], %690 {strides = array<i32>} : memref<216x256xf32, #tpu.memory_space<vmem>>, vector<8x256xf32>,
    %c16_i32_626 = arith.constant 16 : i32
    %692 = tpu.dynamic_rotate %656 by %c16_i32_626 dim 1 : vector<8x256xf32>, i32 -> vector<8x256xf32>
    %c7_627 = arith.constant 7 : index
    %c0_628 = arith.constant 0 : index
    %693 = vector.load %arg1[%c7_627, %c0_628] : memref<25x256xf32, #tpu.memory_space<vmem>>, vector<1x256xf32>
    %694 = vector.broadcast %693 : vector<1x256xf32> to vector<8x256xf32>
    %695 = arith.mulf %692, %694 : vector<8x256xf32>
    %c56_629 = arith.constant 56 : index
    %c0_630 = arith.constant 0 : index
    %696 = vector.load %arg7[%c56_629, %c0_630] : memref<216x256xf32, #tpu.memory_space<vmem>>, vector<8x256xf32>
    tpu.vector_store %arg7[%c56_629, %c0_630], %695 {strides = array<i32>} : memref<216x256xf32, #tpu.memory_space<vmem>>, vector<8x256xf32>,
    %c15_i32_631 = arith.constant 15 : i32
    %697 = tpu.dynamic_rotate %656 by %c15_i32_631 dim 1 : vector<8x256xf32>, i32 -> vector<8x256xf32>
    %c8_632 = arith.constant 8 : index
    %c0_633 = arith.constant 0 : index
    %698 = vector.load %arg1[%c8_632, %c0_633] : memref<25x256xf32, #tpu.memory_space<vmem>>, vector<1x256xf32>
    %699 = vector.broadcast %698 : vector<1x256xf32> to vector<8x256xf32>
    %700 = arith.mulf %697, %699 : vector<8x256xf32>
    %c64_634 = arith.constant 64 : index
    %c0_635 = arith.constant 0 : index
    %701 = vector.load %arg7[%c64_634, %c0_635] : memref<216x256xf32, #tpu.memory_space<vmem>>, vector<8x256xf32>
    tpu.vector_store %arg7[%c64_634, %c0_635], %700 {strides = array<i32>} : memref<216x256xf32, #tpu.memory_space<vmem>>, vector<8x256xf32>,
    %c14_i32_636 = arith.constant 14 : i32
    %702 = tpu.dynamic_rotate %656 by %c14_i32_636 dim 1 : vector<8x256xf32>, i32 -> vector<8x256xf32>
    %c9_637 = arith.constant 9 : index
    %c0_638 = arith.constant 0 : index
    %703 = vector.load %arg1[%c9_637, %c0_638] : memref<25x256xf32, #tpu.memory_space<vmem>>, vector<1x256xf32>
    %704 = vector.broadcast %703 : vector<1x256xf32> to vector<8x256xf32>
    %705 = arith.mulf %702, %704 : vector<8x256xf32>
    %c72_639 = arith.constant 72 : index
    %c0_640 = arith.constant 0 : index
    %706 = vector.load %arg7[%c72_639, %c0_640] : memref<216x256xf32, #tpu.memory_space<vmem>>, vector<8x256xf32>
    tpu.vector_store %arg7[%c72_639, %c0_640], %705 {strides = array<i32>} : memref<216x256xf32, #tpu.memory_space<vmem>>, vector<8x256xf32>,
    %c2_i32_641 = arith.constant 2 : i32
    %707 = tpu.dynamic_rotate %656 by %c2_i32_641 dim 1 : vector<8x256xf32>, i32 -> vector<8x256xf32>
    %c10_642 = arith.constant 10 : index
    %c0_643 = arith.constant 0 : index
    %708 = vector.load %arg1[%c10_642, %c0_643] : memref<25x256xf32, #tpu.memory_space<vmem>>, vector<1x256xf32>
    %709 = vector.broadcast %708 : vector<1x256xf32> to vector<8x256xf32>
    %710 = arith.mulf %707, %709 : vector<8x256xf32>
    %c80_644 = arith.constant 80 : index
    %c0_645 = arith.constant 0 : index
    %711 = vector.load %arg7[%c80_644, %c0_645] : memref<216x256xf32, #tpu.memory_space<vmem>>, vector<8x256xf32>
    tpu.vector_store %arg7[%c80_644, %c0_645], %710 {strides = array<i32>} : memref<216x256xf32, #tpu.memory_space<vmem>>, vector<8x256xf32>,
    %c1_i32_646 = arith.constant 1 : i32
    %712 = tpu.dynamic_rotate %656 by %c1_i32_646 dim 1 : vector<8x256xf32>, i32 -> vector<8x256xf32>
    %c11_647 = arith.constant 11 : index
    %c0_648 = arith.constant 0 : index
    %713 = vector.load %arg1[%c11_647, %c0_648] : memref<25x256xf32, #tpu.memory_space<vmem>>, vector<1x256xf32>
    %714 = vector.broadcast %713 : vector<1x256xf32> to vector<8x256xf32>
    %715 = arith.mulf %712, %714 : vector<8x256xf32>
    %c88_649 = arith.constant 88 : index
    %c0_650 = arith.constant 0 : index
    %716 = vector.load %arg7[%c88_649, %c0_650] : memref<216x256xf32, #tpu.memory_space<vmem>>, vector<8x256xf32>
    tpu.vector_store %arg7[%c88_649, %c0_650], %715 {strides = array<i32>} : memref<216x256xf32, #tpu.memory_space<vmem>>, vector<8x256xf32>,
    %c96_651 = arith.constant 96 : index
    %c0_652 = arith.constant 0 : index
    %717 = vector.load %arg7[%c96_651, %c0_652] : memref<216x256xf32, #tpu.memory_space<vmem>>, vector<8x256xf32>
    tpu.vector_store %arg7[%c96_651, %c0_652], %656 {strides = array<i32>} : memref<216x256xf32, #tpu.memory_space<vmem>>, vector<8x256xf32>,
    %c255_i32_653 = arith.constant 255 : i32
    %718 = tpu.dynamic_rotate %656 by %c255_i32_653 dim 1 : vector<8x256xf32>, i32 -> vector<8x256xf32>
    %c13_654 = arith.constant 13 : index
    %c0_655 = arith.constant 0 : index
    %719 = vector.load %arg1[%c13_654, %c0_655] : memref<25x256xf32, #tpu.memory_space<vmem>>, vector<1x256xf32>
    %720 = vector.broadcast %719 : vector<1x256xf32> to vector<8x256xf32>
    %721 = arith.mulf %718, %720 : vector<8x256xf32>
    %c104_656 = arith.constant 104 : index
    %c0_657 = arith.constant 0 : index
    %722 = vector.load %arg7[%c104_656, %c0_657] : memref<216x256xf32, #tpu.memory_space<vmem>>, vector<8x256xf32>
    tpu.vector_store %arg7[%c104_656, %c0_657], %721 {strides = array<i32>} : memref<216x256xf32, #tpu.memory_space<vmem>>, vector<8x256xf32>,
    %c254_i32_658 = arith.constant 254 : i32
    %723 = tpu.dynamic_rotate %656 by %c254_i32_658 dim 1 : vector<8x256xf32>, i32 -> vector<8x256xf32>
    %c14_659 = arith.constant 14 : index
    %c0_660 = arith.constant 0 : index
    %724 = vector.load %arg1[%c14_659, %c0_660] : memref<25x256xf32, #tpu.memory_space<vmem>>, vector<1x256xf32>
    %725 = vector.broadcast %724 : vector<1x256xf32> to vector<8x256xf32>
    %726 = arith.mulf %723, %725 : vector<8x256xf32>
    %c112_661 = arith.constant 112 : index
    %c0_662 = arith.constant 0 : index
    %727 = vector.load %arg7[%c112_661, %c0_662] : memref<216x256xf32, #tpu.memory_space<vmem>>, vector<8x256xf32>
    tpu.vector_store %arg7[%c112_661, %c0_662], %726 {strides = array<i32>} : memref<216x256xf32, #tpu.memory_space<vmem>>, vector<8x256xf32>,
    %c242_i32_663 = arith.constant 242 : i32
    %728 = tpu.dynamic_rotate %656 by %c242_i32_663 dim 1 : vector<8x256xf32>, i32 -> vector<8x256xf32>
    %c15_664 = arith.constant 15 : index
    %c0_665 = arith.constant 0 : index
    %729 = vector.load %arg1[%c15_664, %c0_665] : memref<25x256xf32, #tpu.memory_space<vmem>>, vector<1x256xf32>
    %730 = vector.broadcast %729 : vector<1x256xf32> to vector<8x256xf32>
    %731 = arith.mulf %728, %730 : vector<8x256xf32>
    %c120_666 = arith.constant 120 : index
    %c0_667 = arith.constant 0 : index
    %732 = vector.load %arg7[%c120_666, %c0_667] : memref<216x256xf32, #tpu.memory_space<vmem>>, vector<8x256xf32>
    tpu.vector_store %arg7[%c120_666, %c0_667], %731 {strides = array<i32>} : memref<216x256xf32, #tpu.memory_space<vmem>>, vector<8x256xf32>,
    %c241_i32_668 = arith.constant 241 : i32
    %733 = tpu.dynamic_rotate %656 by %c241_i32_668 dim 1 : vector<8x256xf32>, i32 -> vector<8x256xf32>
    %c16_669 = arith.constant 16 : index
    %c0_670 = arith.constant 0 : index
    %734 = vector.load %arg1[%c16_669, %c0_670] : memref<25x256xf32, #tpu.memory_space<vmem>>, vector<1x256xf32>
    %735 = vector.broadcast %734 : vector<1x256xf32> to vector<8x256xf32>
    %736 = arith.mulf %733, %735 : vector<8x256xf32>
    %c128_671 = arith.constant 128 : index
    %c0_672 = arith.constant 0 : index
    %737 = vector.load %arg7[%c128_671, %c0_672] : memref<216x256xf32, #tpu.memory_space<vmem>>, vector<8x256xf32>
    tpu.vector_store %arg7[%c128_671, %c0_672], %736 {strides = array<i32>} : memref<216x256xf32, #tpu.memory_space<vmem>>, vector<8x256xf32>,
    %c240_i32_673 = arith.constant 240 : i32
    %738 = tpu.dynamic_rotate %656 by %c240_i32_673 dim 1 : vector<8x256xf32>, i32 -> vector<8x256xf32>
    %c17_674 = arith.constant 17 : index
    %c0_675 = arith.constant 0 : index
    %739 = vector.load %arg1[%c17_674, %c0_675] : memref<25x256xf32, #tpu.memory_space<vmem>>, vector<1x256xf32>
    %740 = vector.broadcast %739 : vector<1x256xf32> to vector<8x256xf32>
    %741 = arith.mulf %738, %740 : vector<8x256xf32>
    %c136_676 = arith.constant 136 : index
    %c0_677 = arith.constant 0 : index
    %742 = vector.load %arg7[%c136_676, %c0_677] : memref<216x256xf32, #tpu.memory_space<vmem>>, vector<8x256xf32>
    tpu.vector_store %arg7[%c136_676, %c0_677], %741 {strides = array<i32>} : memref<216x256xf32, #tpu.memory_space<vmem>>, vector<8x256xf32>,
    %c239_i32_678 = arith.constant 239 : i32
    %743 = tpu.dynamic_rotate %656 by %c239_i32_678 dim 1 : vector<8x256xf32>, i32 -> vector<8x256xf32>
    %c18_679 = arith.constant 18 : index
    %c0_680 = arith.constant 0 : index
    %744 = vector.load %arg1[%c18_679, %c0_680] : memref<25x256xf32, #tpu.memory_space<vmem>>, vector<1x256xf32>
    %745 = vector.broadcast %744 : vector<1x256xf32> to vector<8x256xf32>
    %746 = arith.mulf %743, %745 : vector<8x256xf32>
    %c144_681 = arith.constant 144 : index
    %c0_682 = arith.constant 0 : index
    %747 = vector.load %arg7[%c144_681, %c0_682] : memref<216x256xf32, #tpu.memory_space<vmem>>, vector<8x256xf32>
    tpu.vector_store %arg7[%c144_681, %c0_682], %746 {strides = array<i32>} : memref<216x256xf32, #tpu.memory_space<vmem>>, vector<8x256xf32>,
    %c238_i32_683 = arith.constant 238 : i32
    %748 = tpu.dynamic_rotate %656 by %c238_i32_683 dim 1 : vector<8x256xf32>, i32 -> vector<8x256xf32>
    %c19_684 = arith.constant 19 : index
    %c0_685 = arith.constant 0 : index
    %749 = vector.load %arg1[%c19_684, %c0_685] : memref<25x256xf32, #tpu.memory_space<vmem>>, vector<1x256xf32>
    %750 = vector.broadcast %749 : vector<1x256xf32> to vector<8x256xf32>
    %751 = arith.mulf %748, %750 : vector<8x256xf32>
    %c152_686 = arith.constant 152 : index
    %c0_687 = arith.constant 0 : index
    %752 = vector.load %arg7[%c152_686, %c0_687] : memref<216x256xf32, #tpu.memory_space<vmem>>, vector<8x256xf32>
    tpu.vector_store %arg7[%c152_686, %c0_687], %751 {strides = array<i32>} : memref<216x256xf32, #tpu.memory_space<vmem>>, vector<8x256xf32>,
    %c226_i32_688 = arith.constant 226 : i32
    %753 = tpu.dynamic_rotate %656 by %c226_i32_688 dim 1 : vector<8x256xf32>, i32 -> vector<8x256xf32>
    %c20_689 = arith.constant 20 : index
    %c0_690 = arith.constant 0 : index
    %754 = vector.load %arg1[%c20_689, %c0_690] : memref<25x256xf32, #tpu.memory_space<vmem>>, vector<1x256xf32>
    %755 = vector.broadcast %754 : vector<1x256xf32> to vector<8x256xf32>
    %756 = arith.mulf %753, %755 : vector<8x256xf32>
    %c160_691 = arith.constant 160 : index
    %c0_692 = arith.constant 0 : index
    %757 = vector.load %arg7[%c160_691, %c0_692] : memref<216x256xf32, #tpu.memory_space<vmem>>, vector<8x256xf32>
    tpu.vector_store %arg7[%c160_691, %c0_692], %756 {strides = array<i32>} : memref<216x256xf32, #tpu.memory_space<vmem>>, vector<8x256xf32>,
    %c225_i32_693 = arith.constant 225 : i32
    %758 = tpu.dynamic_rotate %656 by %c225_i32_693 dim 1 : vector<8x256xf32>, i32 -> vector<8x256xf32>
    %c21_694 = arith.constant 21 : index
    %c0_695 = arith.constant 0 : index
    %759 = vector.load %arg1[%c21_694, %c0_695] : memref<25x256xf32, #tpu.memory_space<vmem>>, vector<1x256xf32>
    %760 = vector.broadcast %759 : vector<1x256xf32> to vector<8x256xf32>
    %761 = arith.mulf %758, %760 : vector<8x256xf32>
    %c168_696 = arith.constant 168 : index
    %c0_697 = arith.constant 0 : index
    %762 = vector.load %arg7[%c168_696, %c0_697] : memref<216x256xf32, #tpu.memory_space<vmem>>, vector<8x256xf32>
    tpu.vector_store %arg7[%c168_696, %c0_697], %761 {strides = array<i32>} : memref<216x256xf32, #tpu.memory_space<vmem>>, vector<8x256xf32>,
    %c224_i32_698 = arith.constant 224 : i32
    %763 = tpu.dynamic_rotate %656 by %c224_i32_698 dim 1 : vector<8x256xf32>, i32 -> vector<8x256xf32>
    %c22_699 = arith.constant 22 : index
    %c0_700 = arith.constant 0 : index
    %764 = vector.load %arg1[%c22_699, %c0_700] : memref<25x256xf32, #tpu.memory_space<vmem>>, vector<1x256xf32>
    %765 = vector.broadcast %764 : vector<1x256xf32> to vector<8x256xf32>
    %766 = arith.mulf %763, %765 : vector<8x256xf32>
    %c176_701 = arith.constant 176 : index
    %c0_702 = arith.constant 0 : index
    %767 = vector.load %arg7[%c176_701, %c0_702] : memref<216x256xf32, #tpu.memory_space<vmem>>, vector<8x256xf32>
    tpu.vector_store %arg7[%c176_701, %c0_702], %766 {strides = array<i32>} : memref<216x256xf32, #tpu.memory_space<vmem>>, vector<8x256xf32>,
    %c223_i32_703 = arith.constant 223 : i32
    %768 = tpu.dynamic_rotate %656 by %c223_i32_703 dim 1 : vector<8x256xf32>, i32 -> vector<8x256xf32>
    %c23_704 = arith.constant 23 : index
    %c0_705 = arith.constant 0 : index
    %769 = vector.load %arg1[%c23_704, %c0_705] : memref<25x256xf32, #tpu.memory_space<vmem>>, vector<1x256xf32>
    %770 = vector.broadcast %769 : vector<1x256xf32> to vector<8x256xf32>
    %771 = arith.mulf %768, %770 : vector<8x256xf32>
    %c184_706 = arith.constant 184 : index
    %c0_707 = arith.constant 0 : index
    %772 = vector.load %arg7[%c184_706, %c0_707] : memref<216x256xf32, #tpu.memory_space<vmem>>, vector<8x256xf32>
    tpu.vector_store %arg7[%c184_706, %c0_707], %771 {strides = array<i32>} : memref<216x256xf32, #tpu.memory_space<vmem>>, vector<8x256xf32>,
    %c222_i32_708 = arith.constant 222 : i32
    %773 = tpu.dynamic_rotate %656 by %c222_i32_708 dim 1 : vector<8x256xf32>, i32 -> vector<8x256xf32>
    %c24_709 = arith.constant 24 : index
    %c0_710 = arith.constant 0 : index
    %774 = vector.load %arg1[%c24_709, %c0_710] : memref<25x256xf32, #tpu.memory_space<vmem>>, vector<1x256xf32>
    %775 = vector.broadcast %774 : vector<1x256xf32> to vector<8x256xf32>
    %776 = arith.mulf %773, %775 : vector<8x256xf32>
    %c192_711 = arith.constant 192 : index
    %c0_712 = arith.constant 0 : index
    %777 = vector.load %arg7[%c192_711, %c0_712] : memref<216x256xf32, #tpu.memory_space<vmem>>, vector<8x256xf32>
    tpu.vector_store %arg7[%c192_711, %c0_712], %776 {strides = array<i32>} : memref<216x256xf32, #tpu.memory_space<vmem>>, vector<8x256xf32>,
    %c96_713 = arith.constant 96 : index
    %c0_714 = arith.constant 0 : index
    %778 = vector.load %arg7[%c96_713, %c0_714] : memref<216x256xf32, #tpu.memory_space<vmem>>, vector<8x256xf32>
    %c104_715 = arith.constant 104 : index
    %c0_716 = arith.constant 0 : index
    %779 = vector.load %arg7[%c104_715, %c0_716] : memref<216x256xf32, #tpu.memory_space<vmem>>, vector<8x256xf32>
    %c136_717 = arith.constant 136 : index
    %c0_718 = arith.constant 0 : index
    %780 = vector.load %arg7[%c136_717, %c0_718] : memref<216x256xf32, #tpu.memory_space<vmem>>, vector<8x256xf32>
    %c144_719 = arith.constant 144 : index
    %c0_720 = arith.constant 0 : index
    %781 = vector.load %arg7[%c144_719, %c0_720] : memref<216x256xf32, #tpu.memory_space<vmem>>, vector<8x256xf32>
    %782 = arith.maximumf %778, %779 : vector<8x256xf32>
    %783 = arith.maximumf %780, %781 : vector<8x256xf32>
    %784 = arith.maximumf %782, %783 : vector<8x256xf32>
    %c200_721 = arith.constant 200 : index
    %c0_722 = arith.constant 0 : index
    %785 = vector.load %arg7[%c200_721, %c0_722] : memref<216x256xf32, #tpu.memory_space<vmem>>, vector<8x256xf32>
    tpu.vector_store %arg7[%c200_721, %c0_722], %784 {strides = array<i32>} : memref<216x256xf32, #tpu.memory_space<vmem>>, vector<8x256xf32>,
    %786 = arith.addf %778, %779 : vector<8x256xf32>
    %787 = arith.addf %786, %780 : vector<8x256xf32>
    %788 = arith.addf %787, %781 : vector<8x256xf32>
    %cst_723 = arith.constant 2.500000e-01 : f32
    %789 = vector.broadcast %cst_723 : f32 to vector<8x256xf32>
    %790 = arith.mulf %788, %789 : vector<8x256xf32>
    %c208_724 = arith.constant 208 : index
    %c0_725 = arith.constant 0 : index
    %791 = vector.load %arg7[%c208_724, %c0_725] : memref<216x256xf32, #tpu.memory_space<vmem>>, vector<8x256xf32>
    tpu.vector_store %arg7[%c208_724, %c0_725], %790 {strides = array<i32>} : memref<216x256xf32, #tpu.memory_space<vmem>>, vector<8x256xf32>,
    %c104_726 = arith.constant 104 : index
    %c0_727 = arith.constant 0 : index
    %792 = vector.load %arg4[%c104_726, %c0_727] : memref<112x216xf32, #tpu.memory_space<vmem>>, vector<8x216xf32>
    %c0_728 = arith.constant 0 : index
    %c0_729 = arith.constant 0 : index
    %793 = vector.load %arg7[%c0_728, %c0_729] : memref<216x256xf32, #tpu.memory_space<vmem>>, vector<216x256xf32>
    %cst_730 = arith.constant dense<0.000000e+00> : vector<8x256xf32>
    %794 = tpu.matmul %792, %793, %cst_730 {dimension_numbers = #tpu.dot_dimension_numbers<[1], [0], [0], [1], [0, 0, 1, 1], [], []>} : vector<8x216xf32>, vector<216x256xf32>, vector<8x256xf32> -> vector<8x256xf32>
    %c5_731 = arith.constant 5 : index
    %c0_732 = arith.constant 0 : index
    %c0_733 = arith.constant 0 : index
    %795 = vector.load %arg6[%c5_731, %c0_732, %c0_733] : memref<6x8x256xf32, #tpu.memory_space<vmem>>, vector<1x8x256xf32>
    %796 = vector.shape_cast %795 : vector<1x8x256xf32> to vector<8x256xf32>
    %797 = arith.addf %796, %794 : vector<8x256xf32>
    %c5_734 = arith.constant 5 : index
    %c0_735 = arith.constant 0 : index
    %c0_736 = arith.constant 0 : index
    %798 = vector.load %arg6[%c5_734, %c0_735, %c0_736] : memref<6x8x256xf32, #tpu.memory_space<vmem>>, vector<1x8x256xf32>
    %799 = vector.shape_cast %798 : vector<1x8x256xf32> to vector<8x256xf32>
    %800 = vector.shape_cast %797 : vector<8x256xf32> to vector<1x8x256xf32>
    tpu.vector_store %arg6[%c5_734, %c0_735, %c0_736], %800 {strides = array<i32>} : memref<6x8x256xf32, #tpu.memory_space<vmem>>, vector<1x8x256xf32>,
    %c4_737 = arith.constant 4 : index
    %c0_738 = arith.constant 0 : index
    %c0_739 = arith.constant 0 : index
    %801 = vector.load %arg6[%c4_737, %c0_738, %c0_739] : memref<6x8x256xf32, #tpu.memory_space<vmem>>, vector<1x8x256xf32>
    %802 = vector.shape_cast %801 : vector<1x8x256xf32> to vector<8x256xf32>
    %c0_740 = arith.constant 0 : index
    %c0_741 = arith.constant 0 : index
    %c0_742 = arith.constant 0 : index
    %c0_743 = arith.constant 0 : index
    %803 = vector.load %arg5[%c0_740, %c0_741, %c0_742, %c0_743] : memref<1x2x8x256xf32, #tpu.memory_space<vmem>>, vector<1x1x8x256xf32>
    %804 = vector.shape_cast %803 : vector<1x1x8x256xf32> to vector<8x256xf32>
    %805 = vector.shape_cast %802 : vector<8x256xf32> to vector<1x1x8x256xf32>
    tpu.vector_store %arg5[%c0_740, %c0_741, %c0_742, %c0_743], %805 {strides = array<i32>} : memref<1x2x8x256xf32, #tpu.memory_space<vmem>>, vector<1x1x8x256xf32>,
    %c5_744 = arith.constant 5 : index
    %c0_745 = arith.constant 0 : index
    %c0_746 = arith.constant 0 : index
    %806 = vector.load %arg6[%c5_744, %c0_745, %c0_746] : memref<6x8x256xf32, #tpu.memory_space<vmem>>, vector<1x8x256xf32>
    %807 = vector.shape_cast %806 : vector<1x8x256xf32> to vector<8x256xf32>
    %c0_747 = arith.constant 0 : index
    %c1_748 = arith.constant 1 : index
    %c0_749 = arith.constant 0 : index
    %c0_750 = arith.constant 0 : index
    %808 = vector.load %arg5[%c0_747, %c1_748, %c0_749, %c0_750] : memref<1x2x8x256xf32, #tpu.memory_space<vmem>>, vector<1x1x8x256xf32>
    %809 = vector.shape_cast %808 : vector<1x1x8x256xf32> to vector<8x256xf32>
    %810 = vector.shape_cast %807 : vector<8x256xf32> to vector<1x1x8x256xf32>
    tpu.vector_store %arg5[%c0_747, %c1_748, %c0_749, %c0_750], %810 {strides = array<i32>} : memref<1x2x8x256xf32, #tpu.memory_space<vmem>>, vector<1x1x8x256xf32>,
    return
  }
  func.func @transform_0(%arg0: i32) -> (i32, i32) {
    %c0_i32 = arith.constant 0 : i32
    %c0_i32_0 = arith.constant 0 : i32
    %c0_i32_1 = arith.constant 0 : i32
    return %c0_i32, %c0_i32_0 : i32, i32
  }
  func.func @transform_1(%arg0: i32) -> (i32, i32, i32, i32) {
    %c0_i32 = arith.constant 0 : i32
    %c0_i32_0 = arith.constant 0 : i32
    %c0_i32_1 = arith.constant 0 : i32
    %c0_i32_2 = arith.constant 0 : i32
    return %arg0, %c0_i32, %c0_i32_0, %c0_i32_1 : i32, i32, i32, i32
  }
  func.func @transform_2(%arg0: i32) -> (i32, i32, i32) {
    %c0_i32 = arith.constant 0 : i32
    %c0_i32_0 = arith.constant 0 : i32
    %c0_i32_1 = arith.constant 0 : i32
    %c0_i32_2 = arith.constant 0 : i32
    return %c0_i32, %c0_i32_0, %c0_i32_1 : i32, i32, i32
  }
  func.func @transform_3(%arg0: i32) -> (i32, i32) {
    %c0_i32 = arith.constant 0 : i32
    %c0_i32_0 = arith.constant 0 : i32
    %c0_i32_1 = arith.constant 0 : i32
    return %c0_i32, %c0_i32_0 : i32, i32
  }
  func.func @transform_4(%arg0: i32) -> (i32, i32, i32, i32) {
    %c0_i32 = arith.constant 0 : i32
    %c0_i32_0 = arith.constant 0 : i32
    %c0_i32_1 = arith.constant 0 : i32
    %c0_i32_2 = arith.constant 0 : i32
    return %arg0, %c0_i32, %c0_i32_0, %c0_i32_1 : i32, i32, i32, i32
  }
}

</mosaic_0001>

<bundles_post_ra>
// kernel: cell_forward.1
= control target key start
LH: loop header
LB: loop body
LE: loop exit
PB: predicated region body
PF: predicated region fallthrough
CT: control target
= control target key end

     0   :  { %s4622_s15 = smov 0   ;;  %s6877_s0 = inlined_call_operand.vmem [shape: f32[25,256], index: 0, kind: input, shape index: {}]   ;;  %s6878_s1 = inlined_call_operand.vmem [shape: f32[2,2,5,256], index: 1, kind: input, shape index: {}]   ;;  %s6879_s2 = inlined_call_operand.vmem [shape: f32[2,8,5], index: 2, kind: input, shape index: {}]   ;;  %s6880_s3 = inlined_call_operand.vmem [shape: f32[112,216], index: 3, kind: input, shape index: {}]   ;;  %s6881_s4 = inlined_call_operand.vmem [shape: f32[2,2,8,256], index: 4, kind: output, shape index: {}]  }
   0x1 LB: > { %s4098_s16 = sadd.s32 4294967295, %s4570_s15   ;;  %p4102_p0 = scmp.ge.s32.totalorder %s4570_s15, 1  ;;  %s4570_s15 = sphi %s4622_s15, %s14_s15  }
   0x2   : > { %p162_p1 = scmp.lt.s32.totalorder %s4570_s15, 3 }
   0x4   : > { %p163_p2 = pnand %p4102_p0, %p162_p1 }
   0x6   : > { %166 = sbr.rel (%p163_p2) target bundleno = 2060 (0x80c), region = 36 }
   0xd   : > { %p188_p3 = scmp.lt.s32.totalorder %s4098_s16, 1  ;;  %v4572_v0 = vmov 0.0   ;;  %vm205_vm0 = vcmask 1044480   ;;  %v198_v1 = vld [vmem:[%s6879_s2] sm:$0xff]  ;;  %vm201_vm1 = vcmask 39936   ;;  %v4110_v6 = vld [vmem:[%s6879_s2 + $0x8] sm:$0xff]  ;;  %v379_v46 = vlaneseq }
   0xe   : > { %276 = vmatprep.mubr.f32.mxu1 %v4572_v0  ;;  %s4573_s25 = smov 33   ;;  %s4574_s26 = smov 34   ;;  %v981_v21 = vld [vmem:[%s6880_s3 + $0x8] sm:$0xff]  ;;  %vm1042_vm2 = vcmask 719872  }
   0xf   : > { %s7072_s16 = smov (!%p188_p3, %s4098_s16), 1  ;;  %s4575_s27 = smov 32   ;;  %v387_v49 = vshrl.u32 %v379_v46, 7  ;;  %v4920_v52 = vand.u32 127, %v379_v46 }
  0x10   : > { %s6882_s17 = sshll.u32 %s7072_s16, 5  ;;  %s4576_s28 = smov 31   ;;  %v4116_v57 = vld [vmem:[%s6877_s0 + $0x1] ss:$8 sm:$0x3] }
  0x11   : > { %s192_s20 = scalar_lea.vmem %s6878_s1, %s6882_s17  ;;  %s6943_s29 = smov 30   ;;  %v4926_v53 = vsub.s32 0, %v387_v49  ;;  %v4932_v56 = vsub.s32 1, %v387_v49  ;;  %vm404_vm3 = vcmp.lt.s32.totalorder %v4920_v52, 33  ;;  %vm452_vm4 = vcmp.lt.s32.totalorder %v4920_v52, 31 }
  0x12   : > { %v200_v2 = vld [vmem:[%s192_s20 + $0x8] sm:$0x1f]  ;;  %v199_v3 = vld [vmem:[%s192_s20] sm:$0x1f]  ;;  %v4112_v4 = vld [vmem:[%s192_s20 + $0x18] sm:$0x1f] }
  0x13   : > { %4107 = vmatprep.subr.msk.mxu1 %vm205_vm0, %v200_v2  ;;  %v4111_v5 = vld [vmem:[%s192_s20 + $0x10] sm:$0x1f]  ;;  %s6885_s30 = smov 18   ;;  %s6883_s5 = smov 17   ;;  %v413_v60 = vrot.slane %v4116_v57, %v4926_v53  ;;  %vm428_vm5 = vcmp.lt.s32.totalorder %v4920_v52, 32  ;;  %vm381_vm6 = vcmp.lt.s32.totalorder %v4920_v52, 34 }
  0x14   : > { %4108 = vmatpush1.msk.msra.mxu1 %vm205_vm0, %v199_v3  ;;  %s6941_s6 = smov 16   ;;  %s6939_s7 = smov 15   ;;  %v4118_v58 = vld [vmem:[%s6877_s0 + $0x3] ss:$8 sm:$0x3]  ;;  %vm476_vm7 = vcmp.lt.s32.totalorder %v4920_v52, 30 }
  0x15   : > { %4109 = vmatmul.mubr.msk.f32.vlgmr.msra.gmra.mrb[0].mxu1 %vm201_vm1, %v198_v1  ;;  %4113 = vmatprep.subr.msk.mxu1 %vm205_vm0, %v4112_v4  ;;  %s6937_s8 = smov 14   ;;  %s6935_s9 = smov 2   ;;  %v384_v59 = vld [vmem:[%s6877_s0] ss:$8 sm:$0x3]  ;;  %v465_v2 = vrot.slane %v4118_v58, %v4932_v56  ;;  %v461_v46 = vrot.slane %v4118_v58, %v4926_v53  ;;  %vm500_vm8 = vcmp.lt.s32.totalorder %v4920_v52, 18 }
  0x16   : > { %4114 = vmatpush1.msk.msra.mxu1 %vm205_vm0, %v4111_v5  ;;  %363 = vmatprep.mubr.f32.mxu1 %v4572_v0  ;;  %s6933_s10 = smov 1   ;;  %s6930_s11 = smov 127   ;;  %v4117_v61 = vld [vmem:[%s6877_s0 + $0x2] ss:$8 sm:$0x3]  ;;  %v417_v0 = vrot.slane %v4116_v57, %v4932_v56  ;;  %v389_v5 = vrot.slane %v384_v59, %v4926_v53  ;;  %vm6917_vm9 = vcmp.lt.s32.totalorder %v4920_v52, 16 }
  0x17   : > { %s6928_s12 = smov 126   ;;  %s6926_s13 = smov 114   ;;  %v4120_v3 = vld [vmem:[%s6877_s0 + $0x5] ss:$8 sm:$0x3]  ;;  %vm6932_vm10 = vcmp.lt.s32.totalorder %v4920_v52, 17 }
  0x18   : > { %s6924_s14 = smov 113   ;;  %s6922_s18 = smov 112   ;;  %vm6918_vm11 = vcmp.lt.s32.totalorder %v4920_v52, 14  ;;  %vm6919_vm12 = vcmp.lt.s32.totalorder %v4920_v52, 15  ;;  %vm6915_vm13 = vcmp.lt.s32.totalorder %v4920_v52, 1  ;;  %vm6909_vm14 = vcmp.lt.s32.totalorder %v4920_v52, 2 }
  0x19   : > { %4115 = vmatmul.mubr.msk.f32.vlgmr.msra.gmra.mrb[2].mxu1 %vm201_vm1, %v4110_v6  ;;  %s6920_s19 = smov 111   ;;  %s6897_s20 = smov 110   ;;  %v393_v6 = vrot.slane %v384_v59, %v4932_v56  ;;  %vm6908_vm15 = vcmp.lt.s32.totalorder %v4920_v52, 127  ;;  %vm6910_vm0 = vcmp.lt.s32.totalorder %v4920_v52, 114  ;;  %vm6911_vm1 = vcmp.lt.s32.totalorder %v4920_v52, 126 }
  0x1a   : > { %s6895_s21 = smov 98   ;;  %s6891_s22 = smov 97   ;;  %4139 = vmatprep.mubr.msk.f32.mxu1 %vm1042_vm2, %v981_v21  ;;  %v441_v21 = vrot.slane %v4117_v61, %v4932_v56 }
  0x1b   : > { %s6889_s23 = smov 96   ;;  %s6887_s24 = smov 95  }
  0x1c   : > { %s6893_s17 = smov 94  }
  0xe8   : > { %v4644_v7 = vpop.f32.mrb[0].mxu1 }
  0xe9   : > { %400 = vrot.lane.b32.xlu1 %v4644_v7, %s4573_s25  ;;  %375 = vrot.lane.b32.xlu0 %v4644_v7, %s4574_s26  ;;  %v4650_v8 = vpop.f32.mrb[1].mxu1 }
  0xec   : > { %v4652_v9 = vpop.f32.mrb[2].mxu1 }
  0xed   : > { %6945 = vst [vmem:[#allocation4_spill] sm:$0xff] %v4652_v9  ;;  %424 = vrot.lane.b32.xlu0 %v4644_v7, %s4575_s27  ;;  %402 = vrot.lane.b32.xlu1 %v4650_v8, %s4573_s25  ;;  %v4658_v10 = vpop.f32.mrb[3].mxu1 }
  0xee   : > { %6946 = vst [vmem:[#allocation5_spill] sm:$0xff] %v4658_v10 }
  0xf1   : > { %448 = vrot.lane.b32.xlu0 %v4644_v7, %s4576_s28  ;;  %426 = vrot.lane.b32.xlu1 %v4650_v8, %s4575_s27 }
  0xf5   : > { %472 = vrot.lane.b32.xlu0 %v4644_v7, %s6943_s29  ;;  %450 = vrot.lane.b32.xlu1 %v4650_v8, %s4576_s28 }
  0xf9   : > { %496 = vrot.lane.b32.xlu0 %v4644_v7, %s6885_s30  ;;  %474 = vrot.lane.b32.xlu1 %v4650_v8, %s6943_s29 }
  0xfd   : > { %520 = vrot.lane.b32.xlu0 %v4644_v7, %s6883_s5  ;;  %498 = vrot.lane.b32.xlu1 %v4650_v8, %s6885_s30 }
 0x101   : > { %544 = vrot.lane.b32.xlu0 %v4644_v7, %s6941_s6  ;;  %522 = vrot.lane.b32.xlu1 %v4650_v8, %s6883_s5 }
 0x105   : > { %568 = vrot.lane.b32.xlu0 %v4644_v7, %s6939_s7  ;;  %546 = vrot.lane.b32.xlu1 %v4650_v8, %s6941_s6 }
 0x109   : > { %592 = vrot.lane.b32.xlu0 %v4644_v7, %s6937_s8  ;;  %570 = vrot.lane.b32.xlu1 %v4650_v8, %s6939_s7 }
 0x10d   : > { %616 = vrot.lane.b32.xlu0 %v4644_v7, %s6935_s9  ;;  %594 = vrot.lane.b32.xlu1 %v4650_v8, %s6937_s8 }
 0x111   : > { %640 = vrot.lane.b32.xlu0 %v4644_v7, %s6933_s10  ;;  %618 = vrot.lane.b32.xlu1 %v4650_v8, %s6935_s9 }
 0x115   : > { %666 = vrot.lane.b32.xlu0 %v4644_v7, %s6930_s11  ;;  %642 = vrot.lane.b32.xlu1 %v4650_v8, %s6933_s10 }
 0x119   : > { %690 = vrot.lane.b32.xlu0 %v4644_v7, %s6928_s12  ;;  %668 = vrot.lane.b32.xlu1 %v4650_v8, %s6930_s11 }
 0x11d   : > { %714 = vrot.lane.b32.xlu0 %v4644_v7, %s6926_s13  ;;  %692 = vrot.lane.b32.xlu1 %v4650_v8, %s6928_s12 }
 0x121   : > { %738 = vrot.lane.b32.xlu0 %v4644_v7, %s6924_s14  ;;  %716 = vrot.lane.b32.xlu1 %v4650_v8, %s6926_s13 }
 0x125   : > { %762 = vrot.lane.b32.xlu0 %v4644_v7, %s6922_s18  ;;  %740 = vrot.lane.b32.xlu1 %v4650_v8, %s6924_s14 }
 0x129   : > { %786 = vrot.lane.b32.xlu0 %v4644_v7, %s6920_s19  ;;  %764 = vrot.lane.b32.xlu1 %v4650_v8, %s6922_s18 }
 0x12d   : > { %810 = vrot.lane.b32.xlu0 %v4644_v7, %s6897_s20  ;;  %788 = vrot.lane.b32.xlu1 %v4650_v8, %s6920_s19 }
 0x131   : > { %834 = vrot.lane.b32.xlu0 %v4644_v7, %s6895_s21  ;;  %812 = vrot.lane.b32.xlu1 %v4650_v8, %s6897_s20 }
 0x135   : > { %858 = vrot.lane.b32.xlu0 %v4644_v7, %s6891_s22  ;;  %836 = vrot.lane.b32.xlu1 %v4650_v8, %s6895_s21 }
 0x139   : > { %882 = vrot.lane.b32.xlu0 %v4644_v7, %s6889_s23  ;;  %860 = vrot.lane.b32.xlu1 %v4650_v8, %s6891_s22 }
 0x13d   : > { %884 = vrot.lane.b32.xlu1 %v4650_v8, %s6889_s23  ;;  %377 = vrot.lane.b32.xlu0 %v4650_v8, %s4574_s26 }
 0x141   : > { %908 = vrot.lane.b32.xlu1 %v4650_v8, %s6887_s24  ;;  %906 = vrot.lane.b32.xlu0 %v4644_v7, %s6887_s24 }
 0x145   : > { %932 = vrot.lane.b32.xlu1 %v4650_v8, %s6893_s17  ;;  %930 = vrot.lane.b32.xlu0 %v4644_v7, %s6893_s17 }
 0x149   : > { %1158 = vrot.lane.b32.xlu0 %v4652_v9, %s4574_s26  ;;  %1160 = vrot.lane.b32.xlu1 %v4658_v10, %s4574_s26 }
 0x14d   : > { %1180 = vrot.lane.b32.xlu0 %v4652_v9, %s4573_s25  ;;  %1182 = vrot.lane.b32.xlu1 %v4658_v10, %s4573_s25 }
 0x151   : > { %1202 = vrot.lane.b32.xlu0 %v4652_v9, %s4575_s27  ;;  %1204 = vrot.lane.b32.xlu1 %v4658_v10, %s4575_s27 }
 0x155   : > { %1224 = vrot.lane.b32.xlu0 %v4652_v9, %s4576_s28  ;;  %1226 = vrot.lane.b32.xlu1 %v4658_v10, %s4576_s28 }
 0x159   : > { %1246 = vrot.lane.b32.xlu0 %v4652_v9, %s6943_s29  ;;  %1248 = vrot.lane.b32.xlu1 %v4658_v10, %s6943_s29 }
 0x15b   : > { %v4768_v11 = vpop.permute.xlu1 %400  ;;  %v4770_v12 = vpop.permute.xlu0 %375 }
 0x15d   : > { %1268 = vrot.lane.b32.xlu0 %v4652_v9, %s6885_s30  ;;  %1270 = vrot.lane.b32.xlu1 %v4658_v10, %s6885_s30  ;;  %s6974_s30 = smov 18  }
 0x15f   : > { %v4776_v13 = vpop.permute.xlu0 %424  ;;  %v4778_v14 = vpop.permute.xlu1 %402 }
 0x160   : > { %v406_v1 = vsel %vm404_vm3, %v4778_v14, %v4768_v11  ;;  %v405_v4 = vsel %vm404_vm3, %v4768_v11, %v4778_v14  ;;  %v4119_v11 = vld [vmem:[%s6877_s0 + $0x4] ss:$8 sm:$0x3]  ;;  %v513_v14 = vrot.slane %v4120_v3, %v4932_v56 }
 0x161   : > { %1290 = vrot.lane.b32.xlu0 %v4652_v9, %s6883_s5  ;;  %1292 = vrot.lane.b32.xlu1 %v4658_v10, %s6883_s5  ;;  %v420_v57 = vmul.f32 %v413_v60, %v406_v1  ;;  %v421_v58 = vmul.f32 %v417_v0, %v405_v4  ;;  %s6975_s5 = smov 17  }
 0x163   : > { %v4784_v15 = vpop.permute.xlu0 %448  ;;  %v4786_v16 = vpop.permute.xlu1 %426 }
 0x165   : > { %1312 = vrot.lane.b32.xlu0 %v4652_v9, %s6941_s6  ;;  %1314 = vrot.lane.b32.xlu1 %v4658_v10, %s6941_s6 }
 0x167   : > { %v4792_v17 = vpop.permute.xlu0 %472  ;;  %v4794_v18 = vpop.permute.xlu1 %450 }
 0x168   : > { %v453_v49 = vsel %vm452_vm4, %v4784_v15, %v4794_v18 }
 0x169   : > { %1334 = vrot.lane.b32.xlu0 %v4652_v9, %s6939_s7  ;;  %1336 = vrot.lane.b32.xlu1 %v4658_v10, %s6939_s7 }
 0x16b   : > { %v4800_v19 = vpop.permute.xlu0 %496  ;;  %v4802_v20 = vpop.permute.xlu1 %474 }
 0x16d   : > { %1356 = vrot.lane.b32.xlu0 %v4652_v9, %s6937_s8  ;;  %1358 = vrot.lane.b32.xlu1 %v4658_v10, %s6937_s8 }
 0x16f   : > { %v4812_v22 = vpop.permute.xlu0 %520  ;;  %v4814_v23 = vpop.permute.xlu1 %498 }
 0x171   : > { %1378 = vrot.lane.b32.xlu0 %v4652_v9, %s6935_s9  ;;  %1380 = vrot.lane.b32.xlu1 %v4658_v10, %s6935_s9 }
 0x173   : > { %v4820_v24 = vpop.permute.xlu0 %544  ;;  %v4822_v25 = vpop.permute.xlu1 %522 }
 0x175   : > { %1400 = vrot.lane.b32.xlu0 %v4652_v9, %s6933_s10  ;;  %1402 = vrot.lane.b32.xlu1 %v4658_v10, %s6933_s10 }
 0x177   : > { %v4828_v26 = vpop.permute.xlu0 %568  ;;  %v4830_v27 = vpop.permute.xlu1 %546 }
 0x179   : > { %1424 = vrot.lane.b32.xlu0 %v4652_v9, %s6930_s11  ;;  %1426 = vrot.lane.b32.xlu1 %v4658_v10, %s6930_s11 }
 0x17b   : > { %v4836_v28 = vpop.permute.xlu0 %592  ;;  %v4838_v29 = vpop.permute.xlu1 %570 }
 0x17d   : > { %1446 = vrot.lane.b32.xlu0 %v4652_v9, %s6928_s12  ;;  %1448 = vrot.lane.b32.xlu1 %v4658_v10, %s6928_s12 }
 0x17f   : > { %v4844_v30 = vpop.permute.xlu0 %616  ;;  %v4846_v31 = vpop.permute.xlu1 %594 }
 0x181   : > { %1468 = vrot.lane.b32.xlu0 %v4652_v9, %s6926_s13  ;;  %1470 = vrot.lane.b32.xlu1 %v4658_v10, %s6926_s13 }
 0x183   : > { %v4852_v32 = vpop.permute.xlu0 %640  ;;  %v4854_v33 = vpop.permute.xlu1 %618 }
 0x185   : > { %1490 = vrot.lane.b32.xlu0 %v4652_v9, %s6924_s14  ;;  %1492 = vrot.lane.b32.xlu1 %v4658_v10, %s6924_s14 }
 0x187   : > { %v4860_v34 = vpop.permute.xlu0 %666  ;;  %v4862_v35 = vpop.permute.xlu1 %642 }
 0x189   : > { %1512 = vrot.lane.b32.xlu0 %v4652_v9, %s6922_s18  ;;  %1514 = vrot.lane.b32.xlu1 %v4658_v10, %s6922_s18 }
 0x18b   : > { %v4868_v36 = vpop.permute.xlu0 %690  ;;  %v4870_v37 = vpop.permute.xlu1 %668 }
 0x18d   : > { %1534 = vrot.lane.b32.xlu0 %v4652_v9, %s6920_s19  ;;  %1536 = vrot.lane.b32.xlu1 %v4658_v10, %s6920_s19 }
 0x18f   : > { %v4876_v38 = vpop.permute.xlu0 %714  ;;  %v4878_v39 = vpop.permute.xlu1 %692 }
 0x191   : > { %1556 = vrot.lane.b32.xlu0 %v4652_v9, %s6897_s20  ;;  %1558 = vrot.lane.b32.xlu1 %v4658_v10, %s6897_s20  ;;  %s6977_s20 = smov 98  }
 0x193   : > { %v4884_v40 = vpop.permute.xlu0 %738  ;;  %v4886_v41 = vpop.permute.xlu1 %716 }
 0x195   : > { %1578 = vrot.lane.b32.xlu0 %v4652_v9, %s6895_s21  ;;  %1580 = vrot.lane.b32.xlu1 %v4658_v10, %s6895_s21  ;;  %s6978_s21 = smov 97  }
 0x197   : > { %v4892_v42 = vpop.permute.xlu0 %762  ;;  %v4894_v43 = vpop.permute.xlu1 %740 }
 0x199   : > { %1600 = vrot.lane.b32.xlu0 %v4652_v9, %s6891_s22  ;;  %1602 = vrot.lane.b32.xlu1 %v4658_v10, %s6891_s22  ;;  %s6979_s22 = smov 96  }
 0x19b   : > { %v4900_v44 = vpop.permute.xlu0 %786  ;;  %v4902_v45 = vpop.permute.xlu1 %764 }
 0x19d   : > { %1622 = vrot.lane.b32.xlu0 %v4652_v9, %s6889_s23  ;;  %1624 = vrot.lane.b32.xlu1 %v4658_v10, %s6889_s23  ;;  %s6980_s23 = smov 95  }
 0x19f   : > { %v4908_v47 = vpop.permute.xlu0 %810  ;;  %v4910_v48 = vpop.permute.xlu1 %788 }
 0x1a1   : > { %1644 = vrot.lane.b32.xlu0 %v4652_v9, %s6887_s24  ;;  %1646 = vrot.lane.b32.xlu1 %v4658_v10, %s6887_s24  ;;  %s7007_s24 = smov 126  }
 0x1a3   : > { %v4916_v50 = vpop.permute.xlu0 %834  ;;  %v4918_v51 = vpop.permute.xlu1 %812 }
 0x1a4   : > { %6947 = vst [vmem:[#allocation6_spill] sm:$0xff] %v4916_v50  ;;  %v489_v50 = vrot.slane %v4119_v11, %v4932_v56 }
 0x1a5   : > { %1666 = vrot.lane.b32.xlu0 %v4652_v9, %s6893_s17  ;;  %1668 = vrot.lane.b32.xlu1 %v4658_v10, %s6893_s17  ;;  %v429_v10 = vsel %vm428_vm5, %v4776_v13, %v4786_v16  ;;  %s6976_s17 = smov 110  }
 0x1a7   : > { %v4928_v54 = vpop.permute.xlu0 %858  ;;  %v4930_v55 = vpop.permute.xlu1 %836 }
 0x1a8   : > { %6948 = vst [vmem:[#allocation7_spill] sm:$0xff] %v4930_v55  ;;  %v437_v55 = vrot.slane %v4117_v61, %v4926_v53 }
 0x1ab   : > { %v4949_v62 = vpop.permute.xlu0 %882  ;;  %v4951_v63 = vpop.permute.xlu1 %860 }
 0x1ac   : > { %6949 = vst [vmem:[#allocation8_spill] sm:$0xff] %v4949_v62  ;;  %6950 = vst [vmem:[#allocation9_spill] sm:$0xff] %v4951_v63  ;;  %v469_v62 = vmul.f32 %v465_v2, %v453_v49  ;;  %v501_v63 = vsel %vm500_vm8, %v4800_v19, %v4814_v23 }
 0x1af   : > { %v4982_v59 = vpop.permute.xlu1 %884  ;;  %v378_v9 = vpop.permute.xlu0 %377 }
 0x1b0   : > { %6951 = vst [vmem:[#allocation10_spill] sm:$0xff] %v4982_v59  ;;  %v382_v60 = vsel %vm381_vm6, %v4770_v12, %v378_v9  ;;  %v383_v1 = vsel %vm381_vm6, %v378_v9, %v4770_v12  ;;  %v454_v59 = vsel %vm452_vm4, %v4794_v18, %v4784_v15  ;;  %v4122_v9 = vld [vmem:[%s6877_s0 + $0x7] ss:$8 sm:$0x3]  ;;  %v430_v12 = vsel %vm428_vm5, %v4786_v16, %v4776_v13 }
 0x1b1   : > { %v396_v0 = vmul.f32 %v389_v5, %v383_v1  ;;  %v397_v4 = vmul.f32 %v393_v6, %v382_v60  ;;  %v445_v15 = vmul.f32 %v441_v21, %v429_v10  ;;  %v4121_v18 = vld [vmem:[%s6877_s0 + $0x6] ss:$8 sm:$0x3]  ;;  %v468_v49 = vmul.f32 %v461_v46, %v454_v59 }
 0x1b2   : > { %v477_v60 = vsel %vm476_vm7, %v4792_v17, %v4802_v20  ;;  %v509_v1 = vrot.slane %v4120_v3, %v4926_v53  ;;  %v502_v10 = vsel %vm500_vm8, %v4814_v23, %v4800_v19  ;;  %v517_v13 = vmul.f32 %v513_v14, %v501_v63 }
 0x1b3   : > { %v4253_v61 = vpack.c.bf16 %v420_v57, %v396_v0  ;;  %v5015_v2 = vpop.permute.xlu1 %908  ;;  %v5017_v5 = vpop.permute.xlu0 %906  ;;  %v4251_v6 = vpack.c.bf16 %v421_v58, %v397_v4  ;;  %v561_v16 = vrot.slane %v4122_v9, %v4932_v56  ;;  %v4255_v21 = vpack.c.bf16 %v469_v62, %v445_v15  ;;  %v4124_v58 = vld [vmem:[%s6877_s0 + $0x11] ss:$8 sm:$0x3]  ;;  %v4123_v62 = vld [vmem:[%s6877_s0 + $0x10] ss:$8 sm:$0x3] }
 0x1b4   : > { %v444_v46 = vmul.f32 %v437_v55, %v430_v12  ;;  %v485_v57 = vrot.slane %v4119_v11, %v4926_v53  ;;  %v537_v59 = vrot.slane %v4121_v18, %v4932_v56  ;;  %v549_v3 = vsel %vm6917_vm9, %v4820_v24, %v4830_v27 }
 0x1b5   : > { %4252 = vmatprep.subr.bf16.mxu1 %v4251_v6  ;;  %v478_v19 = vsel %vm476_vm7, %v4802_v20, %v4792_v17  ;;  %v493_v23 = vmul.f32 %v489_v50, %v477_v60  ;;  %v557_v55 = vrot.slane %v4122_v9, %v4926_v53  ;;  %v516_v0 = vmul.f32 %v509_v1, %v502_v10 }
 0x1b6   : > { %4254 = vmatpush1.bf16.msra.mxu1 %v4253_v61  ;;  %v4257_v14 = vpack.c.bf16 %v468_v49, %v444_v46  ;;  %v525_v17 = vsel %vm6932_vm10, %v4812_v22, %v4822_v25  ;;  %v550_v20 = vsel %vm6917_vm9, %v4830_v27, %v4820_v24  ;;  %v565_v50 = vmul.f32 %v561_v16, %v549_v3  ;;  %v4126_v49 = vld [vmem:[%s6877_s0 + $0x13] ss:$8 sm:$0x3] }
 0x1b7   : > { %v5048_v63 = vpop.permute.xlu1 %932  ;;  %4256 = vmatprep.subr.bf16.mxu1 %v4255_v21  ;;  %v5050_v11 = vpop.permute.xlu0 %930  ;;  %v609_v4 = vrot.slane %v4124_v58, %v4932_v56  ;;  %v4259_v9 = vpack.c.bf16 %v517_v13, %v493_v23  ;;  %v492_v12 = vmul.f32 %v485_v57, %v478_v19  ;;  %v533_v15 = vrot.slane %v4121_v18, %v4926_v53  ;;  %v4127_v19 = vld [vmem:[%s6877_s0 + $0x15] ss:$8 sm:$0x3] }
 0x1b8   : > { %v585_v61 = vrot.slane %v4123_v62, %v4932_v56  ;;  %v597_v6 = vsel %vm6918_vm11, %v4836_v28, %v4846_v31  ;;  %v526_v24 = vsel %vm6932_vm10, %v4822_v25, %v4812_v22  ;;  %v541_v27 = vmul.f32 %v537_v59, %v525_v17  ;;  %v4125_v22 = vld [vmem:[%s6877_s0 + $0x12] ss:$8 sm:$0x3] }
 0x1b9   : > { %v605_v18 = vrot.slane %v4124_v58, %v4926_v53  ;;  %v4261_v10 = vpack.c.bf16 %v516_v0, %v492_v12  ;;  %v564_v13 = vmul.f32 %v557_v55, %v550_v20  ;;  %v573_v16 = vsel %vm6919_vm12, %v4828_v26, %v4838_v29 }
 0x1ba   : > { %4258 = vmatpush1.bf16.msra.mxu1 %v4257_v14  ;;  %v598_v25 = vsel %vm6918_vm11, %v4846_v31, %v4836_v28  ;;  %v613_v21 = vmul.f32 %v609_v4, %v597_v6  ;;  %v657_v46 = vrot.slane %v4126_v49, %v4932_v56  ;;  %v4263_v57 = vpack.c.bf16 %v565_v50, %v541_v27 }
 0x1bb   : > { %4260 = vmatprep.subr.bf16.mxu1 %v4259_v9  ;;  %v5077_v60 = vpop.permute.xlu0 %1158  ;;  %v5079_v1 = vpop.permute.xlu1 %1160  ;;  %v540_v59 = vmul.f32 %v533_v15, %v526_v24  ;;  %v581_v3 = vrot.slane %v4123_v62, %v4926_v53  ;;  %v645_v58 = vsel %vm6915_vm13, %v4852_v32, %v4862_v35  ;;  %v574_v28 = vsel %vm6919_vm12, %v4838_v29, %v4828_v26 }
 0x1bc   : > { %v589_v31 = vmul.f32 %v585_v61, %v573_v16  ;;  %v633_v23 = vrot.slane %v4125_v22, %v4932_v56  ;;  %v612_v0 = vmul.f32 %v605_v18, %v598_v25  ;;  %v621_v17 = vsel %vm6909_vm14, %v4844_v30, %v4854_v33  ;;  %v4129_v61 = vld [vmem:[%s6877_s0 + $0x17] ss:$8 sm:$0x3] }
 0x1bd   : > { %v4265_v14 = vpack.c.bf16 %v564_v13, %v540_v59  ;;  %v653_v20 = vrot.slane %v4126_v49, %v4926_v53  ;;  %v646_v26 = vsel %vm6915_vm13, %v4862_v35, %v4852_v32  ;;  %v661_v29 = vmul.f32 %v657_v46, %v645_v58 }
 0x1be   : > { %4262 = vmatpush1.bf16.msra.mxu1 %v4261_v10  ;;  %v683_v50 = vrot.slane %v4127_v19, %v4932_v56  ;;  %v4267_v4 = vpack.c.bf16 %v613_v21, %v589_v31  ;;  %v588_v9 = vmul.f32 %v581_v3, %v574_v28  ;;  %v629_v12 = vrot.slane %v4125_v22, %v4926_v53  ;;  %v4128_v10 = vld [vmem:[%s6877_s0 + $0x16] ss:$8 sm:$0x3]  ;;  %v4131_v21 = vld [vmem:[%s6877_s0 + $0x21] ss:$8 sm:$0x3] }
 0x1bf   : > { %4264 = vmatprep.subr.bf16.mxu1 %v4263_v57  ;;  %v5108_v55 = vpop.permute.xlu0 %1180  ;;  %v5110_v62 = vpop.permute.xlu1 %1182  ;;  %v672_v15 = vsel %vm6908_vm15, %v4870_v37, %v4860_v34  ;;  %v622_v32 = vsel %vm6909_vm14, %v4854_v33, %v4844_v30  ;;  %v637_v35 = vmul.f32 %v633_v23, %v621_v17  ;;  %v660_v27 = vmul.f32 %v653_v20, %v646_v26  ;;  %v4133_v26 = vld [vmem:[%s6877_s0 + $0x23] ss:$8 sm:$0x3] }
 0x1c0   : > { %v4269_v24 = vpack.c.bf16 %v612_v0, %v588_v9  ;;  %v679_v18 = vrot.slane %v4127_v19, %v4926_v53  ;;  %v671_v30 = vsel %vm6908_vm15, %v4860_v34, %v4870_v37  ;;  %v5148_v33 = vmul.f32 %v683_v50, %v672_v15  ;;  %v4130_v37 = vld [vmem:[%s6877_s0 + $0x20] ss:$8 sm:$0x3]  ;;  %v4132_v50 = vld [vmem:[%s6877_s0 + $0x22] ss:$8 sm:$0x3] }
 0x1c1   : > { %v731_v13 = vrot.slane %v4129_v61, %v4932_v56  ;;  %v4271_v16 = vpack.c.bf16 %v661_v29, %v637_v35  ;;  %v636_v22 = vmul.f32 %v629_v12, %v622_v32  ;;  %v720_v25 = vsel %vm6910_vm0, %v4886_v41, %v4876_v38 }
 0x1c2   : > { %4266 = vmatpush1.bf16.msra.mxu1 %v4265_v14  ;;  %v707_v46 = vrot.slane %v4128_v10, %v4932_v56  ;;  %v727_v34 = vrot.slane %v4129_v61, %v4926_v53  ;;  %vm6912_vm15 = vcmp.lt.s32.totalorder %v4920_v52, 112  ;;  %v5168_v58 = vmul.f32 %v679_v18, %v671_v30  ;;  %v4135_v30 = vld [vmem:[%s6877_s0 + $0x25] ss:$8 sm:$0x3] }
 0x1c3   : > { %4268 = vmatprep.subr.bf16.mxu1 %v4267_v4  ;;  %v5135_v6 = vpop.permute.xlu0 %1202  ;;  %v5137_v49 = vpop.permute.xlu1 %1204  ;;  %v4273_v3 = vpack.c.bf16 %v660_v27, %v636_v22  ;;  %v696_v19 = vsel %vm6911_vm1, %v4878_v39, %v4868_v36  ;;  %vm6913_vm14 = vcmp.lt.s32.totalorder %v4920_v52, 113  ;;  %v719_v28 = vsel %vm6910_vm0, %v4876_v38, %v4886_v41 }
 0x1c4   : > { %v735_v31 = vmul.f32 %v731_v13, %v720_v25  ;;  %v779_v23 = vrot.slane %v4131_v21, %v4932_v56  ;;  %v4275_v14 = vpack.c.bf16 %v5148_v33, %v4650_v8  ;;  %v703_v0 = vrot.slane %v4128_v10, %v4926_v53 }
 0x1c5   : > { %v755_v17 = vrot.slane %v4130_v37, %v4932_v56  ;;  %v768_v20 = vsel %vm6912_vm15, %v4902_v45, %v4892_v42  ;;  %v695_v38 = vsel %vm6911_vm1, %v4868_v36, %v4878_v39  ;;  %v711_v41 = vmul.f32 %v707_v46, %v696_v19 }
 0x1c6   : > { %4270 = vmatpush1.bf16.msra.mxu1 %v4269_v24  ;;  %v775_v29 = vrot.slane %v4131_v21, %v4926_v53  ;;  %vm6914_vm0 = vcmp.lt.s32.totalorder %v4920_v52, 110  ;;  %v734_v12 = vmul.f32 %v727_v34, %v719_v28  ;;  %v744_v36 = vsel %vm6913_vm14, %v4894_v43, %v4884_v40 }
 0x1c7   : > { %4272 = vmatprep.subr.bf16.mxu1 %v4271_v16  ;;  %v5164_v57 = vpop.permute.xlu0 %1224  ;;  %v5166_v59 = vpop.permute.xlu1 %1226  ;;  %vm790_vm1 = vcmp.lt.s32.totalorder %v4920_v52, 111  ;;  %v4277_v39 = vpack.c.bf16 %v5168_v58, %v4644_v7  ;;  %v767_v15 = vsel %vm6912_vm15, %v4892_v42, %v4902_v45  ;;  %v5215_v61 = vmul.f32 %v779_v23, %v768_v20  ;;  %v4134_v16 = vld [vmem:[%s6877_s0 + $0x24] ss:$8 sm:$0x3] }
 0x1c8   : > { %v827_v32 = vrot.slane %v4133_v26, %v4932_v56  ;;  %v4279_v35 = vpack.c.bf16 %v735_v31, %v711_v41  ;;  %v710_v24 = vmul.f32 %v703_v0, %v695_v38  ;;  %v751_v27 = vrot.slane %v4130_v37, %v4926_v53  ;;  %v6952_v23 = vld [vmem:[#allocation9_spill] sm:$0xff]  ;;  %v6953_v41 = vld [vmem:[#allocation6_spill] sm:$0xff] }
 0x1c9   : > { %v803_v18 = vrot.slane %v4132_v50, %v4932_v56  ;;  %v816_v10 = vsel %vm6914_vm0, %v4918_v51, %v4908_v47  ;;  %v743_v42 = vsel %vm6913_vm14, %v4884_v40, %v4894_v43  ;;  %v759_v45 = vmul.f32 %v755_v17, %v744_v36  ;;  %v4137_v0 = vld [vmem:[%s6877_s0 + $0x27] ss:$8 sm:$0x3] }
 0x1ca   : > { %4274 = vmatpush1.bf16.msra.mxu1 %v4273_v3  ;;  %v823_v13 = vrot.slane %v4133_v26, %v4926_v53  ;;  %vm6916_vm15 = vcmp.lt.s32.totalorder %v4920_v52, 97  ;;  %v4281_v21 = vpack.c.bf16 %v734_v12, %v710_v24  ;;  %v5240_v46 = vmul.f32 %v775_v29, %v767_v15  ;;  %v6954_v29 = vld [vmem:[#allocation7_spill] sm:$0xff] }
 0x1cb   : > { %4276 = vmatprep.subr.bf16.mxu1 %v4275_v14  ;;  %v5200_v4 = vpop.permute.xlu0 %1246  ;;  %v5202_v9 = vpop.permute.xlu1 %1248  ;;  %v792_v40 = vsel %vm790_vm1, %v4910_v48, %v4900_v44  ;;  %vm838_vm14 = vcmp.lt.s32.totalorder %v4920_v52, 98  ;;  %v815_v43 = vsel %vm6914_vm0, %v4908_v47, %v4918_v51  ;;  %v831_v34 = vmul.f32 %v827_v32, %v816_v10 }
 0x1cc   : > { %v875_v37 = vrot.slane %v4135_v30, %v4932_v56  ;;  %v4283_v3 = vpack.c.bf16 %v5215_v61, %v759_v45  ;;  %v758_v19 = vmul.f32 %v751_v27, %v743_v42  ;;  %v799_v28 = vrot.slane %v4132_v50, %v4926_v53  ;;  %v4138_v27 = vld [vmem:[%s6877_s0 + $0x30] ss:$8 sm:$0x3] }
 0x1cd   : > { %v851_v31 = vrot.slane %v4134_v16, %v4932_v56  ;;  %v864_v14 = vsel %vm6916_vm15, %v6952_v23, %v4928_v54  ;;  %v791_v47 = vsel %vm790_vm1, %v4900_v44, %v4910_v48  ;;  %v5266_v51 = vmul.f32 %v803_v18, %v792_v40  ;;  %v4136_v44 = vld [vmem:[%s6877_s0 + $0x26] ss:$8 sm:$0x3] }
 0x1ce   : > { %4278 = vmatpush1.bf16.msra.mxu1 %v4277_v39  ;;  %v871_v17 = vrot.slane %v4135_v30, %v4926_v53  ;;  %vm910_vm0 = vcmp.lt.s32.totalorder %v4920_v52, 95  ;;  %v830_v38 = vmul.f32 %v823_v13, %v815_v43  ;;  %v840_v50 = vsel %vm838_vm14, %v6954_v29, %v6953_v41 }
 0x1cf   : > { %4280 = vmatprep.subr.bf16.mxu1 %v4279_v35  ;;  %v5236_v22 = vpop.permute.xlu0 %1268  ;;  %v5238_v25 = vpop.permute.xlu1 %1270  ;;  %vm886_vm13 = vcmp.lt.s32.totalorder %v4920_v52, 96  ;;  %v4285_v48 = vpack.c.bf16 %v5240_v46, %v758_v19  ;;  %v863_v12 = vsel %vm6916_vm15, %v4928_v54, %v6952_v23  ;;  %v879_v36 = vmul.f32 %v875_v37, %v864_v14 }
 0x1d0   : > { %v923_v39 = vrot.slane %v4137_v0, %v4932_v56  ;;  %v4287_v15 = vpack.c.bf16 %v831_v34, %v5266_v51  ;;  %v5289_v32 = vmul.f32 %v799_v28, %v791_v47  ;;  %v847_v35 = vrot.slane %v4134_v16, %v4926_v53  ;;  %v6955_v16 = vld [vmem:[#allocation8_spill] sm:$0xff] }
 0x1d1   : > { %v912_v24 = vsel %vm910_vm0, %v5015_v2, %v5017_v5  ;;  %v839_v54 = vsel %vm838_vm14, %v6953_v41, %v6954_v29  ;;  %v855_v18 = vmul.f32 %v851_v31, %v840_v50  ;;  %v899_v10 = vrot.slane %v4136_v44, %v4932_v56 }
 0x1d2   : > { %4282 = vmatpush1.bf16.msra.mxu1 %v4281_v21  ;;  %vm934_vm15 = vcmp.lt.s32.totalorder %v4920_v52, 94  ;;  %v4289_v45 = vpack.c.bf16 %v830_v38, %v5289_v32  ;;  %v878_v13 = vmul.f32 %v871_v17, %v863_v12  ;;  %v6956_v21 = vld [vmem:[#allocation10_spill] sm:$0xff]  ;;  %v919_v43 = vrot.slane %v4137_v0, %v4926_v53 }
 0x1d3   : > { %4284 = vmatprep.subr.bf16.mxu1 %v4283_v3  ;;  %v5270_v20 = vpop.permute.xlu0 %1290  ;;  %v5272_v26 = vpop.permute.xlu1 %1292  ;;  %v888_v40 = vsel %vm886_vm13, %v6956_v21, %v6955_v16  ;;  %v911_v34 = vsel %vm910_vm0, %v5017_v5, %v5015_v2  ;;  %v927_v37 = vmul.f32 %v923_v39, %v912_v24  ;;  %v947_v3 = vrot.slane %v4138_v27, %v4932_v56 }
 0x1d4   : > { %v4291_v19 = vpack.c.bf16 %v879_v36, %v855_v18  ;;  %v854_v28 = vmul.f32 %v847_v35, %v839_v54  ;;  %v895_v31 = vrot.slane %v4136_v44, %v4926_v53  ;;  %v936_v23 = vsel %vm934_vm15, %v5048_v63, %v5050_v11  ;;  %v1164_v18 = vld [vmem:[%s6877_s0] ss:$8 sm:$0x3] }
 0x1d5   : > { %v887_v14 = vsel %vm886_vm13, %v6955_v16, %v6956_v21  ;;  %v903_v0 = vmul.f32 %v899_v10, %v888_v40  ;;  %v965_v47 = vmax.f32 %v5215_v61, %v5266_v51  ;;  %v926_v38 = vmul.f32 %v919_v43, %v911_v34  ;;  %v4145_v10 = vld [vmem:[%s6877_s0 + $0x3] ss:$8 sm:$0x3]  ;;  %v4144_v40 = vld [vmem:[%s6877_s0 + $0x2] ss:$8 sm:$0x3] }
 0x1d6   : > { %4286 = vmatpush1.bf16.msra.mxu1 %v4285_v48  ;;  %v4293_v17 = vpack.c.bf16 %v878_v13, %v854_v28  ;;  %v943_v41 = vrot.slane %v4138_v27, %v4926_v53  ;;  %v963_v29 = vmax.f32 %v4650_v8, %v5148_v33  ;;  %v935_v50 = vsel %vm934_vm15, %v5050_v11, %v5048_v63 }
 0x1d7   : > { %4288 = vmatprep.subr.bf16.mxu1 %v4287_v15  ;;  %v5305_v30 = vpop.permute.xlu0 %1312  ;;  %v5307_v42 = vpop.permute.xlu1 %1314  ;;  %v951_v44 = vmul.f32 %v947_v3, %v936_v23  ;;  %v4295_v48 = vpack.c.bf16 %v927_v37, %v903_v0  ;;  %v971_v12 = vadd.f32 %v5148_v33, %v4650_v8  ;;  %v964_v36 = vmax.f32 %v5240_v46, %v5289_v32  ;;  %v4143_v15 = vld [vmem:[%s6877_s0 + $0x1] ss:$8 sm:$0x3] }
 0x1d8   : > { %v902_v39 = vmul.f32 %v895_v31, %v887_v14  ;;  %v967_v63 = vmax.f32 %v963_v29, %v965_v47  ;;  %v962_v8 = vmax.f32 %v4644_v7, %v5168_v58  ;;  %v970_v33 = vadd.f32 %v5168_v58, %v4644_v7  ;;  %v5406_v47 = vld [vmem:[%s6877_s0 + $0x4] ss:$8 sm:$0x3] }
 0x1d9   : > { %v973_v11 = vadd.f32 %v971_v12, %v5215_v61  ;;  %v950_v54 = vmul.f32 %v943_v41, %v935_v50  ;;  %v1191_v7 = vrot.slane %v4143_v15, %v4926_v53  ;;  %v1184_v58 = vsel %vm404_vm3, %v5108_v55, %v5110_v62 }
 0x1da   : > { %4290 = vmatpush1.bf16.msra.mxu1 %v4289_v45  ;;  %v4297_v27 = vpack.c.bf16 %v926_v38, %v902_v39  ;;  %v1195_v45 = vrot.slane %v4143_v15, %v4932_v56  ;;  %v4299_v13 = vpack.c.bf16 %v967_v63, %v951_v44  ;;  %v972_v16 = vadd.f32 %v970_v33, %v5240_v46  ;;  %v980_v63 = vld [vmem:[%s6880_s3] sm:$0xff] }
 0x1db   : > { %4292 = vmatprep.subr.bf16.mxu1 %v4291_v19  ;;  %v5329_v2 = vpop.permute.xlu0 %1334  ;;  %v5331_v5 = vpop.permute.xlu1 %1336  ;;  %v975_v61 = vadd.f32 %v973_v11, %v5266_v51  ;;  %v966_v21 = vmax.f32 %v962_v8, %v964_v36  ;;  %v1169_v43 = vrot.slane %v1164_v18, %v4926_v53  ;;  %v1173_v34 = vrot.slane %v1164_v18, %v4932_v56 }
 0x1dc   : > { %v1185_v46 = vsel %vm404_vm3, %v5110_v62, %v5108_v55  ;;  %v1239_v51 = vrot.slane %v4145_v10, %v4932_v56  ;;  %v1162_v28 = vsel %vm381_vm6, %v5077_v60, %v5079_v1  ;;  %v1228_v31 = vsel %vm452_vm4, %v5164_v57, %v5166_v59  ;;  %v4147_v55 = vld [vmem:[%s6877_s0 + $0x5] ss:$8 sm:$0x3] }
 0x1dd   : > { %v4301_v19 = vpack.c.bf16 %v966_v21, %v950_v54  ;;  %v974_v62 = vadd.f32 %v972_v16, %v5289_v32  ;;  %v1163_v23 = vsel %vm381_vm6, %v5079_v1, %v5077_v60  ;;  %v1199_v14 = vmul.f32 %v1195_v45, %v1184_v58  ;;  %v983_v54 = vld [vmem:[%s6880_s3 + $0x18] sm:$0xff] }
 0x1de   : > { %4294 = vmatpush1.bf16.msra.mxu1 %v4293_v17  ;;  %v1217_v0 = vrot.slane %v4144_v40, %v4932_v56  ;;  %v977_v17 = vmul.f32 0.25, %v975_v61  ;;  %v1198_v38 = vmul.f32 %v1191_v7, %v1185_v46  ;;  %v1213_v41 = vrot.slane %v4144_v40, %v4926_v53 }
 0x1df   : > { %4296 = vmatprep.subr.bf16.mxu1 %v4295_v48  ;;  %v5349_v35 = vpop.permute.xlu0 %1356  ;;  %v5351_v24 = vpop.permute.xlu1 %1358  ;;  %v1206_v32 = vsel %vm428_vm5, %v5135_v6, %v5137_v49  ;;  %v1235_v29 = vrot.slane %v4145_v10, %v4926_v53  ;;  %v1177_v60 = vmul.f32 %v1173_v34, %v1162_v28  ;;  %v1229_v1 = vsel %vm452_vm4, %v5166_v59, %v5164_v57  ;;  %v5422_v48 = vld [vmem:[%s6877_s0 + $0x7] ss:$8 sm:$0x3] }
 0x1e0   : > { %v1243_v50 = vmul.f32 %v1239_v51, %v1228_v31  ;;  %v1283_v44 = vrot.slane %v4147_v55, %v4932_v56  ;;  %v1176_v39 = vmul.f32 %v1169_v43, %v1163_v23  ;;  %v1261_v15 = vrot.slane %v5406_v47, %v4932_v56 }
 0x1e1   : > { %v1272_v57 = vsel %vm500_vm8, %v5236_v22, %v5238_v25  ;;  %v976_v59 = vmul.f32 0.25, %v974_v62  ;;  %v1207_v11 = vsel %vm428_vm5, %v5137_v49, %v5135_v6  ;;  %v1221_v8 = vmul.f32 %v1217_v0, %v1206_v32 }
 0x1e2   : > { %4298 = vmatpush1.bf16.msra.mxu1 %v4297_v27  ;;  %v1279_v33 = vrot.slane %v4147_v55, %v4926_v53  ;;  %v4303_v27 = vpack.c.bf16 %v1199_v14, %v1177_v60  ;;  %v4305_v18 = vpack.c.bf16 %v1198_v38, %v1176_v39  ;;  %v1242_v10 = vmul.f32 %v1235_v29, %v1229_v1 }
 0x1e3   : > { %4300 = vmatprep.subr.bf16.mxu1 %v4299_v13  ;;  %v5382_v37 = vpop.permute.xlu0 %1378  ;;  %v5384_v3 = vpop.permute.xlu1 %1380  ;;  %v1250_v45 = vsel %vm476_vm7, %v5200_v4, %v5202_v9  ;;  %v4148_v13 = vld [vmem:[%s6877_s0 + $0x6] ss:$8 sm:$0x3]  ;;  %v1327_v6 = vrot.slane %v5422_v48, %v4932_v56  ;;  %v1273_v49 = vsel %vm500_vm8, %v5238_v25, %v5236_v22  ;;  %v1287_v61 = vmul.f32 %v1283_v44, %v1272_v57  ;;  %v4151_v22 = vld [vmem:[%s6877_s0 + $0x11] ss:$8 sm:$0x3] }
 0x1e4   : > { %v4307_v7 = vpack.c.bf16 %v1243_v50, %v1221_v8  ;;  %v1220_v58 = vmul.f32 %v1213_v41, %v1207_v11  ;;  %v1257_v40 = vrot.slane %v5406_v47, %v4926_v53  ;;  %v1316_v43 = vsel %vm6917_vm9, %v5305_v30, %v5307_v42  ;;  %v982_v25 = vld [vmem:[%s6880_s3 + $0x10] sm:$0xff]  ;;  %v987_v50 = vld [vmem:[%s6880_s3 + $0x38] sm:$0xff] }
 0x1e5   : > { %v1251_v34 = vsel %vm476_vm7, %v5202_v9, %v5200_v4  ;;  %v1265_v46 = vmul.f32 %v1261_v15, %v1250_v45  ;;  %v1305_v51 = vrot.slane %v4148_v13, %v4932_v56  ;;  %v1286_v31 = vmul.f32 %v1279_v33, %v1273_v49  ;;  %v4150_v4 = vld [vmem:[%s6877_s0 + $0x10] ss:$8 sm:$0x3] }
 0x1e6   : > { %4302 = vmatpush1.bf16.msra.mxu1 %v4301_v19  ;;  %v985_v19 = vld [vmem:[%s6880_s3 + $0x28] sm:$0xff]  ;;  %v4309_v28 = vpack.c.bf16 %v1242_v10, %v1220_v58  ;;  %v1294_v55 = vsel %vm6932_vm10, %v5270_v20, %v5272_v26  ;;  %v1323_v62 = vrot.slane %v5422_v48, %v4926_v53  ;;  %v1317_v9 = vsel %vm6917_vm9, %v5307_v42, %v5305_v30  ;;  %v4153_v30 = vld [vmem:[%s6877_s0 + $0x13] ss:$8 sm:$0x3]  ;;  %v984_v42 = vld [vmem:[%s6880_s3 + $0x20] sm:$0xff] }
 0x1e7   : > { %1107 = vmatprep.subr.mxu1 %v977_v17  ;;  %v5424_v12 = vpop.permute.xlu0 %1400  ;;  %v5426_v36 = vpop.permute.xlu1 %1402  ;;  %v1331_v23 = vmul.f32 %v1327_v6, %v1316_v43  ;;  %v1371_v14 = vrot.slane %v4151_v22, %v4932_v56  ;;  %v4311_v17 = vpack.c.bf16 %v1287_v61, %v1265_v46  ;;  %v1264_v38 = vmul.f32 %v1257_v40, %v1251_v34 }
 0x1e8   : > { %v1301_v41 = vrot.slane %v4148_v13, %v4926_v53  ;;  %v1360_v32 = vsel %vm6918_vm11, %v5349_v35, %v5351_v24  ;;  %v1295_v29 = vsel %vm6932_vm10, %v5272_v26, %v5270_v20  ;;  %v1309_v60 = vmul.f32 %v1305_v51, %v1294_v55  ;;  %v4152_v20 = vld [vmem:[%s6877_s0 + $0x12] ss:$8 sm:$0x3]  ;;  %v1715_v13 = vld [vmem:[%s6880_s3 + $0x48] sm:$0xff] }
 0x1e9   : > { %v1349_v1 = vrot.slane %v4150_v4, %v4932_v56  ;;  %v4313_v44 = vpack.c.bf16 %v1286_v31, %v1264_v38  ;;  %v1330_v48 = vmul.f32 %v1323_v62, %v1317_v9  ;;  %v1338_v39 = vsel %vm6919_vm12, %v5329_v2, %v5331_v5  ;;  %v4155_v55 = vld [vmem:[%s6877_s0 + $0x16] ss:$8 sm:$0x3]  ;;  %v4158_v38 = vld [vmem:[%s6877_s0 + $0x21] ss:$8 sm:$0x3] }
 0x1ea   : > { %1108 = vmatpush1.msra.mxu1 %v976_v59  ;;  %v1367_v15 = vrot.slane %v4151_v22, %v4926_v53  ;;  %v1361_v26 = vsel %vm6918_vm11, %v5351_v24, %v5349_v35  ;;  %v1375_v57 = vmul.f32 %v1371_v14, %v1360_v32  ;;  %v1415_v59 = vrot.slane %v4153_v30, %v4932_v56  ;;  %v986_v35 = vld [vmem:[%s6880_s3 + $0x30] sm:$0xff] }
 0x1eb   : > { %v5458_v16 = vpop.permute.xlu0 %1424  ;;  %4304 = vmatprep.subr.bf16.mxu1 %v4303_v27  ;;  %v5460_v21 = vpop.permute.xlu1 %1426  ;;  %1120 = vmatmul.mubr.f32.vlgmr.msra.gmra.mrb[4].mxu1 %v980_v63  ;;  %v4315_v8 = vpack.c.bf16 %v1331_v23, %v1309_v60  ;;  %v1308_v33 = vmul.f32 %v1301_v41, %v1295_v29  ;;  %v1345_v27 = vrot.slane %v4150_v4, %v4926_v53  ;;  %vm6957_vm9 = vcmp.lt.s32.totalorder %v4920_v52, 1 }
 0x1ec   : > { %4306 = vmatpush1.bf16.msra.mxu1 %v4305_v18  ;;  %4140 = vmatprep.mubr.msk.f32.mxu1 %vm1042_vm2, %v983_v54  ;;  %v1404_v54 = vsel %vm6957_vm9, %v5424_v12, %v5426_v36  ;;  %v4154_v18 = vld [vmem:[%s6877_s0 + $0x15] ss:$8 sm:$0x3]  ;;  %v1339_v24 = vsel %vm6919_vm12, %v5331_v5, %v5329_v2  ;;  %v1353_v10 = vmul.f32 %v1349_v1, %v1338_v39  ;;  %vm6958_vm9 = vcmp.lt.s32.totalorder %v4920_v52, 2 }
 0x1ed   : > { %4308 = vmatprep.subr.bf16.mxu1 %v4307_v7  ;;  %v1393_v45 = vrot.slane %v4152_v20, %v4932_v56  ;;  %v4317_v6 = vpack.c.bf16 %v1330_v48, %v1308_v33  ;;  %v1374_v49 = vmul.f32 %v1367_v15, %v1361_v26  ;;  %v1382_v61 = vsel %vm6958_vm9, %v5382_v37, %v5384_v3  ;;  %v6964_v48 = vld [vmem:[#allocation5_spill] sm:$0xff] }
 0x1ee   : > { %v1411_v7 = vrot.slane %v4153_v30, %v4926_v53  ;;  %vm6959_vm11 = vcmp.lt.s32.totalorder %v4920_v52, 1  ;;  %v1419_v5 = vmul.f32 %v1415_v59, %v1404_v54  ;;  %v1439_v58 = vrot.slane %v4154_v18, %v4932_v56  ;;  %v4160_v26 = vld [vmem:[%s6877_s0 + $0x23] ss:$8 sm:$0x3] }
 0x1ef   : > { %v5497_v0 = vpop.permute.xlu0 %1446  ;;  %v5499_v47 = vpop.permute.xlu1 %1448  ;;  %1126 = vmatmul.mubr.f32.gmra.mrb[6].mxu1 %v982_v25  ;;  %v1405_v2 = vsel %vm6959_vm11, %v5426_v36, %v5424_v12  ;;  %v4319_v22 = vpack.c.bf16 %v1375_v57, %v1353_v10  ;;  %v1352_v25 = vmul.f32 %v1345_v27, %v1339_v24  ;;  %v1389_v34 = vrot.slane %v4152_v20, %v4926_v53  ;;  %v4156_v12 = vld [vmem:[%s6877_s0 + $0x17] ss:$8 sm:$0x3]  ;;  %v4159_v27 = vld [vmem:[%s6877_s0 + $0x22] ss:$8 sm:$0x3] }
 0x1f0   : > { %4310 = vmatpush1.bf16.msra.mxu1 %v4309_v28  ;;  %4141 = vmatprep.mubr.msk.f32.mxu1 %vm1042_vm2, %v985_v19  ;;  %vm6960_vm9 = vcmp.lt.s32.totalorder %v4920_v52, 127  ;;  %vm6961_vm11 = vcmp.lt.s32.totalorder %v4920_v52, 2  ;;  %v1397_v51 = vmul.f32 %v1393_v45, %v1382_v61  ;;  %v1418_v28 = vmul.f32 %v1411_v7, %v1405_v2  ;;  %v6968_v54 = vld [vmem:[#allocation4_spill] sm:$0xff] }
 0x1f1   : > { %4312 = vmatprep.subr.bf16.mxu1 %v4311_v17  ;;  %v1429_v46 = vsel %vm6960_vm9, %v5460_v21, %v5458_v16  ;;  %v1383_v36 = vsel %vm6961_vm11, %v5384_v3, %v5382_v37  ;;  %v4321_v19 = vpack.c.bf16 %v1374_v49, %v1352_v25  ;;  %v1435_v31 = vrot.slane %v4154_v18, %v4926_v53 }
 0x1f2   : > { %v1428_v62 = vsel %vm6960_vm9, %v5458_v16, %v5460_v21  ;;  %v5589_v4 = vmul.f32 %v1439_v58, %v1429_v46  ;;  %v1483_v9 = vrot.slane %v4156_v12, %v4932_v56  ;;  %v4323_v23 = vpack.c.bf16 %v1419_v5, %v1397_v51 }
 0x1f3   : > { %v1469_v63 = vpop.permute.xlu0 %1468  ;;  %v1471_v11 = vpop.permute.xlu1 %1470  ;;  %1132 = vmatmul.mubr.f32.gmra.mrb[8].mxu1 %v984_v42  ;;  %v1396_v14 = vmul.f32 %v1389_v34, %v1383_v36  ;;  %vm6962_vm11 = vcmp.lt.s32.totalorder %v4920_v52, 114  ;;  %v1461_v41 = vrot.slane %v4155_v55, %v4932_v56  ;;  %v5598_v21 = vmul.f32 %v1435_v31, %v1428_v62  ;;  %v4157_v42 = vld [vmem:[%s6877_s0 + $0x20] ss:$8 sm:$0x3] }
 0x1f4   : > { %4314 = vmatpush1.bf16.msra.mxu1 %v4313_v44  ;;  %4142 = vmatprep.mubr.msk.f32.mxu1 %vm1042_vm2, %v987_v50  ;;  %v1473_v17 = vsel %vm6962_vm11, %v1471_v11, %v1469_v63  ;;  %vm6963_vm9 = vcmp.lt.s32.totalorder %v4920_v52, 126  ;;  %v1479_v30 = vrot.slane %v4156_v12, %v4926_v53  ;;  %v1472_v29 = vsel %vm6962_vm11, %v1469_v63, %v1471_v11  ;;  %v4161_v34 = vld [vmem:[%s6877_s0 + $0x24] ss:$8 sm:$0x3] }
 0x1f5   : > { %4316 = vmatprep.subr.bf16.mxu1 %v4315_v8  ;;  %v4325_v16 = vpack.c.bf16 %v1418_v28, %v1396_v14  ;;  %v1451_v32 = vsel %vm6963_vm9, %v5499_v47, %v5497_v0  ;;  %v1487_v60 = vmul.f32 %v1483_v9, %v1473_v17  ;;  %v1527_v1 = vrot.slane %v4158_v38, %v4932_v56 }
 0x1f6   : > { %v4327_v39 = vpack.c.bf16 %v5589_v4, %v6964_v48  ;;  %v1457_v15 = vrot.slane %v4155_v55, %v4926_v53  ;;  %vm6965_vm9 = vcmp.lt.s32.totalorder %v4920_v52, 112  ;;  %vm6966_vm11 = vcmp.lt.s32.totalorder %v4920_v52, 126 }
 0x1f7   : > { %v5564_v40 = vpop.permute.xlu0 %1490  ;;  %v5566_v43 = vpop.permute.xlu1 %1492  ;;  %1138 = vmatmul.mubr.f32.gmra.mrb[10].mxu1 %v986_v35  ;;  %v1450_v57 = vsel %vm6966_vm11, %v5497_v0, %v5499_v47  ;;  %v1465_v59 = vmul.f32 %v1461_v41, %v1451_v32  ;;  %v1505_v63 = vrot.slane %v4157_v42, %v4932_v56  ;;  %v1486_v11 = vmul.f32 %v1479_v30, %v1472_v29 }
 0x1f8   : > { %4318 = vmatpush1.bf16.msra.mxu1 %v4317_v6  ;;  %4166 = vmatprep.mubr.msk.f32.mxu1 %vm1042_vm2, %v1715_v13  ;;  %vm6967_vm12 = vcmp.lt.s32.totalorder %v4920_v52, 113  ;;  %v1523_v33 = vrot.slane %v4158_v38, %v4926_v53  ;;  %v4329_v18 = vpack.c.bf16 %v5598_v21, %v6968_v54  ;;  %v1571_v24 = vrot.slane %v4160_v26, %v4932_v56 }
 0x1f9   : > { %4320 = vmatprep.subr.bf16.mxu1 %v4319_v22  ;;  %v1495_v8 = vsel %vm6967_vm12, %v5566_v43, %v5564_v40  ;;  %v4331_v45 = vpack.c.bf16 %v1487_v60, %v1465_v59  ;;  %v1464_v13 = vmul.f32 %v1457_v15, %v1450_v57  ;;  %v1501_v6 = vrot.slane %v4157_v42, %v4926_v53  ;;  %v4164_v15 = vld [vmem:[%s6877_s0 + $0x27] ss:$8 sm:$0x3] }
 0x1fa   : > { %vm6969_vm12 = vcmp.lt.s32.totalorder %v4920_v52, 110  ;;  %vm6970_vm11 = vcmp.lt.s32.totalorder %v4920_v52, 113  ;;  %v1509_v7 = vmul.f32 %v1505_v63, %v1495_v8  ;;  %v1549_v2 = vrot.slane %v4159_v27, %v4932_v56  ;;  %v4165_v63 = vld [vmem:[%s6877_s0 + $0x30] ss:$8 sm:$0x3] }
 0x1fb   : > { %v1513_v37 = vpop.permute.xlu0 %1512  ;;  %v1515_v3 = vpop.permute.xlu1 %1514  ;;  %v1494_v61 = vsel %vm6970_vm11, %v5564_v40, %v5566_v43  ;;  %v4333_v5 = vpack.c.bf16 %v1486_v11, %v1464_v13  ;;  %v1567_v25 = vrot.slane %v4160_v26, %v4926_v53  ;;  %v4162_v40 = vld [vmem:[%s6877_s0 + $0x25] ss:$8 sm:$0x3]  ;;  %v1545_v28 = vrot.slane %v4159_v27, %v4926_v53 }
 0x1fc   : > { %4322 = vmatpush1.bf16.msra.mxu1 %v4321_v19  ;;  %v1517_v20 = vsel %vm6965_vm9, %v1515_v3, %v1513_v37  ;;  %v1516_v0 = vsel %vm6965_vm9, %v1513_v37, %v1515_v3  ;;  %vm6971_vm9 = vmmov %vm6969_vm12  ;;  %v1508_v19 = vmul.f32 %v1501_v6, %v1494_v61  ;;  %v1593_v62 = vrot.slane %v4161_v34, %v4932_v56 }
 0x1fd   : > { %4324 = vmatprep.subr.bf16.mxu1 %v4323_v23  ;;  %v5636_v47 = vmul.f32 %v1527_v1, %v1517_v20  ;;  %v5647_v58 = vmul.f32 %v1523_v33, %v1516_v0  ;;  %v1615_v9 = vrot.slane %v4162_v40, %v4932_v56  ;;  %v1611_v23 = vrot.slane %v4162_v40, %v4926_v53 }
 0x1fe   : > { %v1589_v32 = vrot.slane %v4161_v34, %v4926_v53  ;;  %v1655_v33 = vrot.slane %v4164_v15, %v4926_v53  ;;  %v1659_v27 = vrot.slane %v4164_v15, %v4932_v56  ;;  %v1681_v13 = vrot.slane %v4165_v63, %v4932_v56 }
 0x1ff   : > { %v1535_v50 = vpop.permute.xlu0 %1534  ;;  %v1537_v44 = vpop.permute.xlu1 %1536  ;;  %v4335_v51 = vpack.c.bf16 %v5636_v47, %v1509_v7  ;;  %v4337_v14 = vpack.c.bf16 %v5647_v58, %v1508_v19  ;;  %v1705_v6 = vadd.f32 %v5589_v4, %v6964_v48  ;;  %v1697_v19 = vmax.f32 %v6964_v48, %v5589_v4 }
 0x200   : > { %4326 = vmatpush1.bf16.msra.mxu1 %v4325_v16  ;;  %v1539_v22 = vsel %vm790_vm1, %v1537_v44, %v1535_v50  ;;  %v1538_v31 = vsel %vm790_vm1, %v1535_v50, %v1537_v44 }
 0x201   : > { %4328 = vmatprep.subr.bf16.mxu1 %v4327_v39  ;;  %v5664_v55 = vmul.f32 %v1549_v2, %v1539_v22  ;;  %v1552_v16 = vmul.f32 %v1545_v28, %v1538_v31  ;;  %v4163_v39 = vld [vmem:[%s6877_s0 + $0x26] ss:$8 sm:$0x3]  ;;  %v1707_v40 = vadd.f32 %v1705_v6, %v5636_v47  ;;  %v1704_v28 = vadd.f32 %v5598_v21, %v6968_v54 }
 0x202   : > { %v1633_v11 = vrot.slane %v4163_v39, %v4926_v53  ;;  %v1637_v8 = vrot.slane %v4163_v39, %v4932_v56 }
 0x203   : > { %v1557_v35 = vpop.permute.xlu0 %1556  ;;  %v1559_v10 = vpop.permute.xlu1 %1558  ;;  %v1699_v2 = vmax.f32 %v5636_v47, %v5664_v55  ;;  %v1709_v47 = vadd.f32 %v1707_v40, %v5664_v55 }
 0x204   : > { %v1561_v49 = vsel %vm6969_vm12, %v1559_v10, %v1557_v35  ;;  %4330 = vmatpush1.bf16.msra.mxu1 %v4329_v18  ;;  %v1560_v43 = vsel %vm6971_vm9, %v1557_v35, %v1559_v10  ;;  %vm6972_vm12 = vcmp.lt.s32.totalorder %v4920_v52, 97  ;;  %vm6982_vm9 = vcmp.lt.s32.totalorder %v4920_v52, 16 }
 0x205   : > { %4332 = vmatprep.subr.bf16.mxu1 %v4331_v45  ;;  %v1575_v46 = vmul.f32 %v1571_v24, %v1561_v49  ;;  %v1574_v37 = vmul.f32 %v1567_v25, %v1560_v43  ;;  %vm6973_vm11 = vmmov %vm6972_vm12  ;;  %v1677_v45 = vrot.slane %v4165_v63, %v4926_v53  ;;  %v1698_v49 = vmax.f32 %v5647_v58, %v1552_v16 }
 0x206   : > { %v1696_v43 = vmax.f32 %v6968_v54, %v5598_v21  ;;  %v1711_v21 = vmul.f32 0.25, %v1709_v47 }
 0x207   : > { %v1579_v12 = vpop.permute.xlu0 %1578  ;;  %v1581_v36 = vpop.permute.xlu1 %1580  ;;  %v4339_v41 = vpack.c.bf16 %v1575_v46, %v5664_v55  ;;  %v4341_v50 = vpack.c.bf16 %v1574_v37, %v1552_v16  ;;  %v1714_v55 = vld [vmem:[%s6880_s3 + $0x40] sm:$0xff] }
 0x208   : > { %4334 = vmatpush1.bf16.msra.mxu1 %v4333_v5  ;;  %v1583_v3 = vsel %vm838_vm14, %v1581_v36, %v1579_v12  ;;  %v1582_v29 = vsel %vm838_vm14, %v1579_v12, %v1581_v36 }
 0x209   : > { %4336 = vmatprep.subr.bf16.mxu1 %v4335_v51  ;;  %v1597_v60 = vmul.f32 %v1593_v62, %v1583_v3  ;;  %v1596_v59 = vmul.f32 %v1589_v32, %v1582_v29  ;;  %v1721_v32 = vld [vmem:[%s6880_s3 + $0x78] sm:$0xff] }
 0x20b   : > { %v1601_v17 = vpop.permute.xlu0 %1600  ;;  %v1603_v38 = vpop.permute.xlu1 %1602 }
 0x20c   : > { %v1604_v30 = vsel %vm6972_vm12, %v1601_v17, %v1603_v38  ;;  %v1605_v42 = vsel %vm6973_vm11, %v1603_v38, %v1601_v17  ;;  %4338 = vmatpush1.bf16.msra.mxu1 %v4337_v14  ;;  %v1706_v14 = vadd.f32 %v1704_v28, %v5647_v58  ;;  %v1717_v38 = vld [vmem:[%s6880_s3 + $0x58] sm:$0xff]  ;;  %v1716_v58 = vld [vmem:[%s6880_s3 + $0x50] sm:$0xff]  ;;  %vm6983_vm12 = vmmov %vm6982_vm9  ;;  %vm6984_vm11 = vcmp.lt.s32.totalorder %v4920_v52, 15 }
 0x20d   : > { %v1619_v1 = vmul.f32 %v1615_v9, %v1605_v42  ;;  %4340 = vmatprep.subr.bf16.mxu1 %v4339_v41  ;;  %v1618_v44 = vmul.f32 %v1611_v23, %v1604_v30  ;;  %v1700_v9 = vmax.f32 %v1696_v43, %v1698_v49  ;;  %v1701_v23 = vmax.f32 %v1697_v19, %v1699_v2  ;;  %v1719_v41 = vld [vmem:[%s6880_s3 + $0x68] sm:$0xff]  ;;  %v1720_v30 = vld [vmem:[%s6880_s3 + $0x70] sm:$0xff] }
 0x20e   : > { %v1708_v17 = vadd.f32 %v1706_v14, %v1552_v16  ;;  %v1718_v16 = vld [vmem:[%s6880_s3 + $0x60] sm:$0xff] }
 0x20f   : > { %v1623_v20 = vpop.permute.xlu0 %1622  ;;  %v1625_v26 = vpop.permute.xlu1 %1624  ;;  %v4343_v57 = vpack.c.bf16 %v1619_v1, %v1597_v60  ;;  %v4345_v18 = vpack.c.bf16 %v1618_v44, %v1596_v59  ;;  %v4170_v59 = vld [vmem:[%s6877_s0 + $0x1] ss:$8 sm:$0x3]  ;;  %v4171_v2 = vld [vmem:[%s6877_s0 + $0x2] ss:$8 sm:$0x3] }
 0x210   : > { %4342 = vmatpush1.bf16.msra.mxu1 %v4341_v50  ;;  %v1626_v0 = vsel %vm886_vm13, %v1623_v20, %v1625_v26  ;;  %v1627_v35 = vsel %vm886_vm13, %v1625_v26, %v1623_v20  ;;  %v1710_v54 = vmul.f32 0.25, %v1708_v17  ;;  %v2460_v20 = vld [vmem:[%s6880_s3 + $0x88] sm:$0xff]  ;;  %v1958_v40 = vrot.slane %v4171_v2, %v4926_v53 }
 0x211   : > { %4344 = vmatprep.subr.bf16.mxu1 %v4343_v57  ;;  %v1640_v5 = vmul.f32 %v1633_v11, %v1626_v0  ;;  %v1641_v22 = vmul.f32 %v1637_v8, %v1627_v35  ;;  %4193 = vmatprep.mubr.msk.f32.mxu0 %vm1042_vm2, %v2460_v20  ;;  %v1909_v57 = vld [vmem:[%s6877_s0] ss:$8 sm:$0x3]  ;;  %v1940_v8 = vrot.slane %v4170_v59, %v4932_v56  ;;  %v4173_v14 = vld [vmem:[%s6877_s0 + $0x4] ss:$8 sm:$0x3] }
 0x212   : > { %v1918_v11 = vrot.slane %v1909_v57, %v4932_v56  ;;  %v1962_v43 = vrot.slane %v4171_v2, %v4932_v56 }
 0x213   : > { %v1645_v24 = vpop.permute.xlu0 %1644  ;;  %v1647_v10 = vpop.permute.xlu1 %1646 }
 0x214   : > { %v1648_v61 = vsel %vm910_vm0, %v1645_v24, %v1647_v10  ;;  %v1649_v7 = vsel %vm910_vm0, %v1647_v10, %v1645_v24  ;;  %4346 = vmatpush1.bf16.msra.mxu1 %v4345_v18 }
 0x215   : > { %v1662_v25 = vmul.f32 %v1655_v33, %v1648_v61  ;;  %v1663_v34 = vmul.f32 %v1659_v27, %v1649_v7  ;;  %v1914_v33 = vrot.slane %v1909_v57, %v4926_v53  ;;  %v1936_v27 = vrot.slane %v4170_v59, %v4926_v53 }
 0x217   : > { %v4349_v46 = vpack.c.bf16 %v1662_v25, %v1640_v5  ;;  %v1667_v12 = vpop.permute.xlu0 %1666  ;;  %v1669_v36 = vpop.permute.xlu1 %1668  ;;  %v4347_v51 = vpack.c.bf16 %v1663_v34, %v1641_v22  ;;  %v4172_v5 = vld [vmem:[%s6877_s0 + $0x3] ss:$8 sm:$0x3] }
 0x218   : > { %v1670_v31 = vsel %vm934_vm15, %v1667_v12, %v1669_v36  ;;  %v1671_v62 = vsel %vm934_vm15, %v1669_v36, %v1667_v12  ;;  %v1984_v12 = vrot.slane %v4172_v5, %v4932_v56 }
 0x219   : > { %v1684_v37 = vmul.f32 %v1677_v45, %v1670_v31  ;;  %v1685_v3 = vmul.f32 %v1681_v13, %v1671_v62  ;;  %4348 = vmatprep.subr.bf16.mxu1 %v4347_v51 }
 0x21a   : > { %4350 = vmatpush1.bf16.msra.mxu1 %v4349_v46  ;;  %v1980_v46 = vrot.slane %v4172_v5, %v4926_v53 }
 0x21b   : > { %v4353_v4 = vpack.c.bf16 %v1700_v9, %v1684_v37  ;;  %v4351_v48 = vpack.c.bf16 %v1701_v23, %v1685_v3 }
 0x21d   : > { %4352 = vmatprep.subr.bf16.mxu1 %v4351_v48 }
 0x21e   : > { %4354 = vmatpush1.bf16.msra.mxu1 %v4353_v4  ;;  %v4174_v4 = vld [vmem:[%s6877_s0 + $0x5] ss:$8 sm:$0x3] }
 0x21f   : > { %1840 = vmatprep.subr.mxu1 %v1711_v21 }
 0x222   : > { %1841 = vmatpush1.msra.mxu1 %v1710_v54  ;;  %v2002_v54 = vrot.slane %v4173_v14, %v4926_v53 }
 0x223   : > { %1853 = vmatmul.mubr.f32.vlgmr.msra.gmra.mrb[4].mxu1 %v1714_v55  ;;  %v2006_v55 = vrot.slane %v4173_v14, %v4932_v56 }
 0x224   : > { %4167 = vmatprep.mubr.msk.f32.mxu1 %vm1042_vm2, %v1717_v38  ;;  %v2024_v38 = vrot.slane %v4174_v4, %v4926_v53 }
 0x227   : > { %1859 = vmatmul.mubr.f32.gmra.mrb[6].mxu1 %v1716_v58  ;;  %v2028_v58 = vrot.slane %v4174_v4, %v4932_v56 }
 0x228   : > { %4168 = vmatprep.mubr.msk.f32.mxu1 %vm1042_vm2, %v1719_v41 }
 0x22b   : > { %1865 = vmatmul.mubr.f32.gmra.mrb[8].mxu1 %v1718_v16 }
 0x22c   : > { %4169 = vmatprep.mubr.msk.f32.mxu1 %vm1042_vm2, %v1721_v32 }
 0x22f   : > { %1871 = vmatmul.mubr.f32.gmra.mrb[10].mxu1 %v1720_v30 }
 0x2f6   : > { %v5745_v42 = vpop.f32.mrb[4].mxu1 }
 0x2f7   : > { %1903 = vrot.lane.b32.xlu0 %v5745_v42, %s4574_s26  ;;  %v5749_v29 = vpop.f32.mrb[5].mxu1 }
 0x2f8   : > { %1905 = vrot.lane.b32.xlu1 %v5749_v29, %s4574_s26 }
 0x2fa   : > { %v5753_v60 = vpop.f32.mrb[6].mxu1 }
 0x2fb   : > { %1925 = vrot.lane.b32.xlu0 %v5745_v42, %s4573_s25  ;;  %v5757_v1 = vpop.f32.mrb[7].mxu1 }
 0x2fc   : > { %1927 = vrot.lane.b32.xlu1 %v5749_v29, %s4573_s25 }
 0x2fe   : > { %v5761_v50 = vpop.f32.mrb[8].mxu1 }
 0x2ff   : > { %1947 = vrot.lane.b32.xlu0 %v5745_v42, %s4575_s27  ;;  %v5765_v44 = vpop.f32.mrb[9].mxu1 }
 0x300   : > { %1949 = vrot.lane.b32.xlu1 %v5749_v29, %s4575_s27 }
 0x302   : > { %v5769_v39 = vpop.f32.mrb[10].mxu1 }
 0x303   : > { %1969 = vrot.lane.b32.xlu0 %v5745_v42, %s4576_s28  ;;  %v5773_v15 = vpop.f32.mrb[11].mxu1 }
 0x304   : > { %1971 = vrot.lane.b32.xlu1 %v5749_v29, %s4576_s28 }
 0x307   : > { %1991 = vrot.lane.b32.xlu0 %v5745_v42, %s6943_s29 }
 0x308   : > { %1993 = vrot.lane.b32.xlu1 %v5749_v29, %s6943_s29 }
 0x30b   : > { %2013 = vrot.lane.b32.xlu0 %v5745_v42, %s6974_s30 }
 0x30c   : > { %2015 = vrot.lane.b32.xlu1 %v5749_v29, %s6974_s30 }
 0x30f   : > { %2035 = vrot.lane.b32.xlu0 %v5745_v42, %s6975_s5 }
 0x310   : > { %2037 = vrot.lane.b32.xlu1 %v5749_v29, %s6975_s5 }
 0x313   : > { %2057 = vrot.lane.b32.xlu0 %v5745_v42, %s6941_s6 }
 0x314   : > { %2059 = vrot.lane.b32.xlu1 %v5749_v29, %s6941_s6 }
 0x317   : > { %2079 = vrot.lane.b32.xlu0 %v5745_v42, %s6939_s7 }
 0x318   : > { %2081 = vrot.lane.b32.xlu1 %v5749_v29, %s6939_s7 }
 0x31b   : > { %2101 = vrot.lane.b32.xlu0 %v5745_v42, %s6937_s8 }
 0x31c   : > { %2103 = vrot.lane.b32.xlu1 %v5749_v29, %s6937_s8 }
 0x31f   : > { %2123 = vrot.lane.b32.xlu0 %v5745_v42, %s6935_s9 }
 0x320   : > { %2125 = vrot.lane.b32.xlu1 %v5749_v29, %s6935_s9 }
 0x323   : > { %2145 = vrot.lane.b32.xlu0 %v5745_v42, %s6933_s10 }
 0x324   : > { %2147 = vrot.lane.b32.xlu1 %v5749_v29, %s6933_s10 }
 0x327   : > { %2169 = vrot.lane.b32.xlu0 %v5745_v42, %s6930_s11 }
 0x328   : > { %2171 = vrot.lane.b32.xlu1 %v5749_v29, %s6930_s11  ;;  %s7008_s11 = smov 114  }
 0x32b   : > { %2191 = vrot.lane.b32.xlu0 %v5745_v42, %s6928_s12 }
 0x32c   : > { %2193 = vrot.lane.b32.xlu1 %v5749_v29, %s6928_s12  ;;  %s7009_s12 = smov 113  }
 0x32f   : > { %2213 = vrot.lane.b32.xlu0 %v5745_v42, %s6926_s13 }
 0x330   : > { %2215 = vrot.lane.b32.xlu1 %v5749_v29, %s6926_s13  ;;  %s7010_s13 = smov 112  }
 0x333   : > { %2235 = vrot.lane.b32.xlu0 %v5745_v42, %s6924_s14 }
 0x334   : > { %2237 = vrot.lane.b32.xlu1 %v5749_v29, %s6924_s14  ;;  %s7011_s14 = smov 111  }
 0x337   : > { %2257 = vrot.lane.b32.xlu0 %v5745_v42, %s6922_s18 }
 0x338   : > { %2259 = vrot.lane.b32.xlu1 %v5749_v29, %s6922_s18  ;;  %s6981_s18 = smov 94  }
 0x33b   : > { %2279 = vrot.lane.b32.xlu0 %v5745_v42, %s6920_s19 }
 0x33c   : > { %2281 = vrot.lane.b32.xlu1 %v5749_v29, %s6920_s19  ;;  %s7006_s19 = smov 127  }
 0x33f   : > { %2301 = vrot.lane.b32.xlu0 %v5745_v42, %s6976_s17 }
 0x340   : > { %2303 = vrot.lane.b32.xlu1 %v5749_v29, %s6976_s17 }
 0x343   : > { %2323 = vrot.lane.b32.xlu0 %v5745_v42, %s6977_s20 }
 0x344   : > { %2325 = vrot.lane.b32.xlu1 %v5749_v29, %s6977_s20 }
 0x347   : > { %2345 = vrot.lane.b32.xlu0 %v5745_v42, %s6978_s21 }
 0x348   : > { %2347 = vrot.lane.b32.xlu1 %v5749_v29, %s6978_s21 }
 0x34b   : > { %2367 = vrot.lane.b32.xlu0 %v5745_v42, %s6979_s22 }
 0x34c   : > { %2369 = vrot.lane.b32.xlu1 %v5749_v29, %s6979_s22 }
 0x34f   : > { %2389 = vrot.lane.b32.xlu0 %v5745_v42, %s6980_s23 }
 0x350   : > { %2391 = vrot.lane.b32.xlu1 %v5749_v29, %s6980_s23 }
 0x353   : > { %2411 = vrot.lane.b32.xlu0 %v5745_v42, %s6981_s18 }
 0x354   : > { %2413 = vrot.lane.b32.xlu1 %v5749_v29, %s6981_s18 }
 0x369   : > { %v1904_v26 = vpop.permute.xlu0 %1903 }
 0x36a   : > { %v1906_v63 = vpop.permute.xlu1 %1905 }
 0x36b   : > { %v1908_v18 = vsel %vm381_vm6, %v1906_v63, %v1904_v26  ;;  %v1907_v35 = vsel %vm381_vm6, %v1904_v26, %v1906_v63 }
 0x36c   : > { %v1922_v13 = vmul.f32 %v1918_v11, %v1907_v35  ;;  %v1921_v49 = vmul.f32 %v1914_v33, %v1908_v18  ;;  %v4175_v33 = vld [vmem:[%s6877_s0 + $0x6] ss:$8 sm:$0x3] }
 0x36d   : > { %v1926_v0 = vpop.permute.xlu0 %1925 }
 0x36e   : > { %v1928_v24 = vpop.permute.xlu1 %1927 }
 0x36f   : > { %v1930_v10 = vsel %vm404_vm3, %v1928_v24, %v1926_v0  ;;  %v1929_v45 = vsel %vm404_vm3, %v1926_v0, %v1928_v24  ;;  %v2046_v24 = vrot.slane %v4175_v33, %v4926_v53 }
 0x370   : > { %v1944_v6 = vmul.f32 %v1940_v8, %v1929_v45  ;;  %v1943_v61 = vmul.f32 %v1936_v27, %v1930_v10  ;;  %v4176_v27 = vld [vmem:[%s6877_s0 + $0x7] ss:$8 sm:$0x3]  ;;  %v2050_v10 = vrot.slane %v4175_v33, %v4932_v56 }
 0x371   : > { %v1948_v7 = vpop.permute.xlu0 %1947  ;;  %v2068_v45 = vrot.slane %v4176_v27, %v4926_v53 }
 0x372   : > { %v1950_v22 = vpop.permute.xlu1 %1949  ;;  %v4355_v25 = vpack.c.bf16 %v1944_v6, %v1922_v13  ;;  %v4357_v34 = vpack.c.bf16 %v1943_v61, %v1921_v49  ;;  %v2072_v13 = vrot.slane %v4176_v27, %v4932_v56 }
 0x373   : > { %v1951_v36 = vsel %vm428_vm5, %v1948_v7, %v1950_v22  ;;  %v1952_v51 = vsel %vm428_vm5, %v1950_v22, %v1948_v7 }
 0x374   : > { %4356 = vmatprep.subr.bf16.mxu0 %v4355_v25  ;;  %v1965_v47 = vmul.f32 %v1958_v40, %v1952_v51  ;;  %v1966_v9 = vmul.f32 %v1962_v43, %v1951_v36 }
 0x375   : > { %v1970_v19 = vpop.permute.xlu0 %1969  ;;  %4358 = vmatpush1.bf16.msra.mxu0 %v4357_v34 }
 0x376   : > { %v1972_v28 = vpop.permute.xlu1 %1971 }
 0x377   : > { %v1973_v31 = vsel %vm452_vm4, %v1970_v19, %v1972_v28  ;;  %v1974_v62 = vsel %vm452_vm4, %v1972_v28, %v1970_v19 }
 0x378   : > { %v1987_v37 = vmul.f32 %v1980_v46, %v1974_v62  ;;  %v1988_v3 = vmul.f32 %v1984_v12, %v1973_v31  ;;  %v4177_v46 = vld [vmem:[%s6877_s0 + $0x10] ss:$8 sm:$0x3]  ;;  %v4178_v12 = vld [vmem:[%s6877_s0 + $0x11] ss:$8 sm:$0x3] }
 0x379   : > { %v1992_v23 = vpop.permute.xlu0 %1991  ;;  %v2090_v28 = vrot.slane %v4177_v46, %v4926_v53  ;;  %v2094_v31 = vrot.slane %v4177_v46, %v4932_v56  ;;  %v2112_v62 = vrot.slane %v4178_v12, %v4926_v53 }
 0x37a   : > { %v1994_v48 = vpop.permute.xlu1 %1993  ;;  %v4359_v17 = vpack.c.bf16 %v1988_v3, %v1966_v9  ;;  %v4361_v21 = vpack.c.bf16 %v1987_v37, %v1965_v47  ;;  %v2116_v47 = vrot.slane %v4178_v12, %v4932_v56 }
 0x37b   : > { %v1995_v41 = vsel %vm476_vm7, %v1992_v23, %v1994_v48  ;;  %v1996_v16 = vsel %vm476_vm7, %v1994_v48, %v1992_v23 }
 0x37c   : > { %4360 = vmatprep.subr.bf16.mxu0 %v4359_v17  ;;  %v2009_v57 = vmul.f32 %v2002_v54, %v1996_v16  ;;  %v2010_v59 = vmul.f32 %v2006_v55, %v1995_v41 }
 0x37d   : > { %v2014_v32 = vpop.permute.xlu0 %2013  ;;  %4362 = vmatpush1.bf16.msra.mxu0 %v4361_v21 }
 0x37e   : > { %v2016_v30 = vpop.permute.xlu1 %2015 }
 0x37f   : > { %v2017_v20 = vsel %vm500_vm8, %v2014_v32, %v2016_v30  ;;  %v2018_v26 = vsel %vm500_vm8, %v2016_v30, %v2014_v32 }
 0x380   : > { %v2031_v63 = vmul.f32 %v2024_v38, %v2018_v26  ;;  %v2032_v11 = vmul.f32 %v2028_v58, %v2017_v20  ;;  %v4179_v38 = vld [vmem:[%s6877_s0 + $0x12] ss:$8 sm:$0x3]  ;;  %v4180_v58 = vld [vmem:[%s6877_s0 + $0x13] ss:$8 sm:$0x3] }
 0x381   : > { %v2036_v8 = vpop.permute.xlu0 %2035  ;;  %v2134_v30 = vrot.slane %v4179_v38, %v4926_v53  ;;  %v2138_v20 = vrot.slane %v4179_v38, %v4932_v56  ;;  %v2156_v26 = vrot.slane %v4180_v58, %v4926_v53 }
 0x382   : > { %v2038_v18 = vpop.permute.xlu1 %2037  ;;  %v4363_v0 = vpack.c.bf16 %v2032_v11, %v2010_v59  ;;  %v4365_v35 = vpack.c.bf16 %v2031_v63, %v2009_v57  ;;  %v2160_v57 = vrot.slane %v4180_v58, %v4932_v56  ;;  %v4181_v59 = vld [vmem:[%s6877_s0 + $0x15] ss:$8 sm:$0x3] }
 0x383   : > { %v2039_v6 = vsel %vm6932_vm10, %v2036_v8, %v2038_v18  ;;  %v2040_v49 = vsel %vm6932_vm10, %v2038_v18, %v2036_v8 }
 0x384   : > { %4364 = vmatprep.subr.bf16.mxu0 %v4363_v0  ;;  %v2053_v22 = vmul.f32 %v2046_v24, %v2040_v49  ;;  %v2054_v25 = vmul.f32 %v2050_v10, %v2039_v6  ;;  %v2180_v0 = vrot.slane %v4181_v59, %v4926_v53 }
 0x385   : > { %v2058_v61 = vpop.permute.xlu0 %2057  ;;  %4366 = vmatpush1.bf16.msra.mxu0 %v4365_v35  ;;  %v2184_v35 = vrot.slane %v4181_v59, %v4932_v56 }
 0x386   : > { %v2060_v7 = vpop.permute.xlu1 %2059 }
 0x387   : > { %v2061_v2 = vsel %vm6982_vm9, %v2058_v61, %v2060_v7  ;;  %v2062_v5 = vsel %vm6983_vm12, %v2060_v7, %v2058_v61  ;;  %vm6985_vm9 = vmmov %vm6984_vm11  ;;  %vm6986_vm12 = vcmp.lt.s32.totalorder %v4920_v52, 14 }
 0x388   : > { %v2075_v34 = vmul.f32 %v2068_v45, %v2062_v5  ;;  %v2076_v40 = vmul.f32 %v2072_v13, %v2061_v2  ;;  %vm6987_vm10 = vmmov %vm6986_vm12 }
 0x389   : > { %v2080_v43 = vpop.permute.xlu0 %2079 }
 0x38a   : > { %v2082_v36 = vpop.permute.xlu1 %2081  ;;  %v4367_v51 = vpack.c.bf16 %v2076_v40, %v2054_v25  ;;  %v4369_v19 = vpack.c.bf16 %v2075_v34, %v2053_v22  ;;  %v4182_v40 = vld [vmem:[%s6877_s0 + $0x16] ss:$8 sm:$0x3] }
 0x38b   : > { %v2083_v9 = vsel %vm6984_vm11, %v2080_v43, %v2082_v36  ;;  %v2084_v37 = vsel %vm6985_vm9, %v2082_v36, %v2080_v43  ;;  %vm6990_vm9 = vcmp.lt.s32.totalorder %v4920_v52, 1  ;;  %v4183_v43 = vld [vmem:[%s6877_s0 + $0x17] ss:$8 sm:$0x3] }
 0x38c   : > { %4368 = vmatprep.subr.bf16.mxu0 %v4367_v51  ;;  %v2097_v48 = vmul.f32 %v2090_v28, %v2084_v37  ;;  %v2098_v17 = vmul.f32 %v2094_v31, %v2083_v9  ;;  %v2202_v51 = vrot.slane %v4182_v40, %v4926_v53  ;;  %v2224_v28 = vrot.slane %v4183_v43, %v4926_v53 }
 0x38d   : > { %v2102_v3 = vpop.permute.xlu0 %2101  ;;  %4370 = vmatpush1.bf16.msra.mxu0 %v4369_v19  ;;  %v2206_v19 = vrot.slane %v4182_v40, %v4932_v56  ;;  %v2228_v31 = vrot.slane %v4183_v43, %v4932_v56 }
 0x38e   : > { %v2104_v23 = vpop.permute.xlu1 %2103 }
 0x38f   : > { %v2105_v14 = vsel %vm6986_vm12, %v2102_v3, %v2104_v23  ;;  %v2106_v4 = vsel %vm6987_vm10, %v2104_v23, %v2102_v3  ;;  %vm6988_vm10 = vcmp.lt.s32.totalorder %v4920_v52, 2  ;;  %vm6991_vm12 = vmmov %vm6990_vm9 }
 0x390   : > { %v2119_v21 = vmul.f32 %v2112_v62, %v2106_v4  ;;  %v2120_v54 = vmul.f32 %v2116_v47, %v2105_v14  ;;  %vm6989_vm11 = vmmov %vm6988_vm10 }
 0x391   : > { %v2124_v55 = vpop.permute.xlu0 %2123 }
 0x392   : > { %v2126_v41 = vpop.permute.xlu1 %2125  ;;  %v4371_v16 = vpack.c.bf16 %v2120_v54, %v2098_v17  ;;  %v4373_v32 = vpack.c.bf16 %v2119_v21, %v2097_v48  ;;  %v4184_v54 = vld [vmem:[%s6877_s0 + $0x20] ss:$8 sm:$0x3] }
 0x393   : > { %v2127_v63 = vsel %vm6988_vm10, %v2124_v55, %v2126_v41  ;;  %v2128_v11 = vsel %vm6989_vm11, %v2126_v41, %v2124_v55  ;;  %vm6992_vm10 = vcmp.lt.s32.totalorder %v4920_v52, 127  ;;  %v4185_v55 = vld [vmem:[%s6877_s0 + $0x21] ss:$8 sm:$0x3] }
 0x394   : > { %4372 = vmatprep.subr.bf16.mxu0 %v4371_v16  ;;  %v2141_v24 = vmul.f32 %v2134_v30, %v2128_v11  ;;  %v2142_v10 = vmul.f32 %v2138_v20, %v2127_v63  ;;  %vm6993_vm11 = vmmov %vm6992_vm10  ;;  %v2246_v16 = vrot.slane %v4184_v54, %v4926_v53  ;;  %v2268_v30 = vrot.slane %v4185_v55, %v4926_v53 }
 0x395   : > { %v2146_v8 = vpop.permute.xlu0 %2145  ;;  %4374 = vmatpush1.bf16.msra.mxu0 %v4373_v32  ;;  %v2250_v32 = vrot.slane %v4184_v54, %v4932_v56  ;;  %v2272_v20 = vrot.slane %v4185_v55, %v4932_v56 }
 0x396   : > { %v2148_v33 = vpop.permute.xlu1 %2147 }
 0x397   : > { %v2149_v27 = vsel %vm6990_vm9, %v2146_v8, %v2148_v33  ;;  %v2150_v18 = vsel %vm6991_vm12, %v2148_v33, %v2146_v8  ;;  %vm6994_vm9 = vcmp.lt.s32.totalorder %v4920_v52, 126 }
 0x398   : > { %v2163_v45 = vmul.f32 %v2156_v26, %v2150_v18  ;;  %v2164_v13 = vmul.f32 %v2160_v57, %v2149_v27  ;;  %vm6995_vm12 = vmmov %vm6994_vm9 }
 0x399   : > { %v2170_v6 = vpop.permute.xlu0 %2169 }
 0x39a   : > { %v2172_v49 = vpop.permute.xlu1 %2171  ;;  %v4375_v61 = vpack.c.bf16 %v2164_v13, %v2142_v10  ;;  %v4377_v7 = vpack.c.bf16 %v2163_v45, %v2141_v24  ;;  %v4186_v24 = vld [vmem:[%s6877_s0 + $0x22] ss:$8 sm:$0x3]  ;;  %v4187_v10 = vld [vmem:[%s6877_s0 + $0x23] ss:$8 sm:$0x3] }
 0x39b   : > { %v2173_v2 = vsel %vm6992_vm10, %v2170_v6, %v2172_v49  ;;  %v2174_v5 = vsel %vm6993_vm11, %v2172_v49, %v2170_v6  ;;  %vm6996_vm10 = vcmp.lt.s32.totalorder %v4920_v52, 114  ;;  %v2290_v49 = vrot.slane %v4186_v24, %v4926_v53 }
 0x39c   : > { %v5978_v22 = vmul.f32 %v2180_v0, %v2173_v2  ;;  %v5980_v25 = vmul.f32 %v2184_v35, %v2174_v5  ;;  %4376 = vmatprep.subr.bf16.mxu0 %v4375_v61  ;;  %vm6997_vm11 = vmmov %vm6996_vm10  ;;  %v2294_v61 = vrot.slane %v4186_v24, %v4932_v56  ;;  %v2316_v2 = vrot.slane %v4187_v10, %v4932_v56 }
 0x39d   : > { %v2192_v34 = vpop.permute.xlu0 %2191  ;;  %4378 = vmatpush1.bf16.msra.mxu0 %v4377_v7  ;;  %v2312_v7 = vrot.slane %v4187_v10, %v4926_v53 }
 0x39e   : > { %v2194_v46 = vpop.permute.xlu1 %2193  ;;  %v4379_v12 = vpack.c.bf16 %v5980_v25, %v5749_v29  ;;  %v4381_v36 = vpack.c.bf16 %v5978_v22, %v5745_v42 }
 0x39f   : > { %v2195_v62 = vsel %vm6994_vm9, %v2192_v34, %v2194_v46  ;;  %v2196_v47 = vsel %vm6995_vm12, %v2194_v46, %v2192_v34  ;;  %vm6998_vm9 = vcmp.lt.s32.totalorder %v4920_v52, 113 }
 0x3a0   : > { %4380 = vmatprep.subr.bf16.mxu0 %v4379_v12  ;;  %v2209_v14 = vmul.f32 %v2202_v51, %v2195_v62  ;;  %v2210_v4 = vmul.f32 %v2206_v19, %v2196_v47  ;;  %vm6999_vm12 = vmmov %vm6998_vm9  ;;  %v4188_v62 = vld [vmem:[%s6877_s0 + $0x24] ss:$8 sm:$0x3]  ;;  %v4189_v47 = vld [vmem:[%s6877_s0 + $0x25] ss:$8 sm:$0x3] }
 0x3a1   : > { %v2214_v9 = vpop.permute.xlu0 %2213  ;;  %4382 = vmatpush1.bf16.msra.mxu0 %v4381_v36 }
 0x3a2   : > { %v2216_v37 = vpop.permute.xlu1 %2215 }
 0x3a3   : > { %v2217_v3 = vsel %vm6996_vm10, %v2214_v9, %v2216_v37  ;;  %v2218_v23 = vsel %vm6997_vm11, %v2216_v37, %v2214_v9  ;;  %vm7000_vm10 = vcmp.lt.s32.totalorder %v4920_v52, 112 }
 0x3a4   : > { %v2231_v48 = vmul.f32 %v2224_v28, %v2217_v3  ;;  %v2232_v17 = vmul.f32 %v2228_v31, %v2218_v23  ;;  %vm7001_vm11 = vmmov %vm7000_vm10  ;;  %v2334_v23 = vrot.slane %v4188_v62, %v4926_v53 }
 0x3a5   : > { %v2236_v21 = vpop.permute.xlu0 %2235 }
 0x3a6   : > { %v2238_v38 = vpop.permute.xlu1 %2237  ;;  %v4383_v58 = vpack.c.bf16 %v2232_v17, %v2210_v4  ;;  %v4385_v41 = vpack.c.bf16 %v2231_v48, %v2209_v14  ;;  %v2338_v14 = vrot.slane %v4188_v62, %v4932_v56  ;;  %v2356_v4 = vrot.slane %v4189_v47, %v4926_v53 }
 0x3a7   : > { %v2239_v26 = vsel %vm6998_vm9, %v2236_v21, %v2238_v38  ;;  %v2240_v57 = vsel %vm6999_vm12, %v2238_v38, %v2236_v21  ;;  %vm7002_vm9 = vcmp.lt.s32.totalorder %v4920_v52, 110  ;;  %v2360_v48 = vrot.slane %v4189_v47, %v4932_v56 }
 0x3a8   : > { %4384 = vmatprep.subr.bf16.mxu0 %v4383_v58  ;;  %v2253_v33 = vmul.f32 %v2246_v16, %v2239_v26  ;;  %v2254_v27 = vmul.f32 %v2250_v32, %v2240_v57  ;;  %vm7003_vm12 = vmmov %vm7002_vm9  ;;  %v4190_v26 = vld [vmem:[%s6877_s0 + $0x26] ss:$8 sm:$0x3]  ;;  %v4191_v57 = vld [vmem:[%s6877_s0 + $0x27] ss:$8 sm:$0x3] }
 0x3a9   : > { %v2258_v59 = vpop.permute.xlu0 %2257  ;;  %4386 = vmatpush1.bf16.msra.mxu0 %v4385_v41  ;;  %v2404_v24 = vrot.slane %v4191_v57, %v4932_v56 }
 0x3aa   : > { %v2260_v63 = vpop.permute.xlu1 %2259 }
 0x3ab   : > { %v2261_v11 = vsel %vm7000_vm10, %v2258_v59, %v2260_v63  ;;  %v2262_v8 = vsel %vm7001_vm11, %v2260_v63, %v2258_v59  ;;  %vm7004_vm10 = vcmp.lt.s32.totalorder %v4920_v52, 97 }
 0x3ac   : > { %v6022_v18 = vmul.f32 %v2268_v30, %v2261_v11  ;;  %v6024_v0 = vmul.f32 %v2272_v20, %v2262_v8  ;;  %vm7005_vm11 = vmmov %vm7004_vm10  ;;  %v4192_v8 = vld [vmem:[%s6877_s0 + $0x30] ss:$8 sm:$0x3] }
 0x3ad   : > { %v2280_v35 = vpop.permute.xlu0 %2279 }
 0x3ae   : > { %v2282_v45 = vpop.permute.xlu1 %2281  ;;  %v4387_v13 = vpack.c.bf16 %v6024_v0, %v2254_v27  ;;  %v4389_v6 = vpack.c.bf16 %v6022_v18, %v2253_v33  ;;  %v2378_v33 = vrot.slane %v4190_v26, %v4926_v53  ;;  %v2382_v27 = vrot.slane %v4190_v26, %v4932_v56  ;;  %v2637_v26 = vld [vmem:[%s6877_s0] ss:$8 sm:$0x3] }
 0x3af   : > { %v2283_v5 = vsel %vm790_vm1, %v2280_v35, %v2282_v45  ;;  %v2284_v34 = vsel %vm790_vm1, %v2282_v45, %v2280_v35  ;;  %v2400_v35 = vrot.slane %v4191_v57, %v4926_v53  ;;  %v4196_v57 = vld [vmem:[%s6877_s0 + $0x1] ss:$8 sm:$0x3] }
 0x3b0   : > { %4388 = vmatprep.subr.bf16.mxu0 %v4387_v13  ;;  %v6046_v36 = vmul.f32 %v2290_v49, %v2283_v5  ;;  %v6048_v51 = vmul.f32 %v2294_v61, %v2284_v34  ;;  %v2422_v49 = vrot.slane %v4192_v8, %v4926_v53  ;;  %v2426_v61 = vrot.slane %v4192_v8, %v4932_v56 }
 0x3b1   : > { %v2302_v40 = vpop.permute.xlu0 %2301  ;;  %4390 = vmatpush1.bf16.msra.mxu0 %v4389_v6  ;;  %v2664_v8 = vrot.slane %v4196_v57, %v4926_v53 }
 0x3b2   : > { %v2304_v43 = vpop.permute.xlu1 %2303  ;;  %v2444_v34 = vmax.f32 %v6024_v0, %v6048_v51 }
 0x3b3   : > { %v2305_v46 = vsel %vm7002_vm9, %v2302_v40, %v2304_v43  ;;  %v2306_v12 = vsel %vm7003_vm12, %v2304_v43, %v2302_v40  ;;  %v2443_v40 = vmax.f32 %v6022_v18, %v6046_v36  ;;  %vm7012_vm9 = vcmp.lt.s32.totalorder %v4920_v52, 17 }
 0x3b4   : > { %v2319_v19 = vmul.f32 %v2312_v7, %v2305_v46  ;;  %v2320_v28 = vmul.f32 %v2316_v2, %v2306_v12  ;;  %v2450_v7 = vadd.f32 %v5980_v25, %v5749_v29  ;;  %vm7013_vm12 = vmmov %vm7012_vm9 }
 0x3b5   : > { %v2324_v31 = vpop.permute.xlu0 %2323 }
 0x3b6   : > { %v2326_v9 = vpop.permute.xlu1 %2325  ;;  %v4391_v37 = vpack.c.bf16 %v2320_v28, %v6048_v51  ;;  %v4393_v3 = vpack.c.bf16 %v2319_v19, %v6046_v36 }
 0x3b7   : > { %v2327_v17 = vsel %vm838_vm14, %v2324_v31, %v2326_v9  ;;  %v2328_v21 = vsel %vm838_vm14, %v2326_v9, %v2324_v31  ;;  %v2452_v31 = vadd.f32 %v2450_v7, %v6024_v0  ;;  %v2449_v0 = vadd.f32 %v5978_v22, %v5745_v42 }
 0x3b8   : > { %4392 = vmatprep.subr.bf16.mxu0 %v4391_v37  ;;  %v2341_v41 = vmul.f32 %v2334_v23, %v2327_v17  ;;  %v2342_v16 = vmul.f32 %v2338_v14, %v2328_v21  ;;  %v2442_v37 = vmax.f32 %v5749_v29, %v5980_v25 }
 0x3b9   : > { %v2346_v54 = vpop.permute.xlu0 %2345  ;;  %4394 = vmatpush1.bf16.msra.mxu0 %v4393_v3  ;;  %v2441_v3 = vmax.f32 %v5745_v42, %v5978_v22  ;;  %v2451_v29 = vadd.f32 %v2449_v0, %v6022_v18  ;;  %v2459_v42 = vld [vmem:[%s6880_s3 + $0x80] sm:$0xff] }
 0x3ba   : > { %v2348_v55 = vpop.permute.xlu1 %2347  ;;  %v2446_v21 = vmax.f32 %v2442_v37, %v2444_v34  ;;  %v4198_v34 = vld [vmem:[%s6877_s0 + $0x3] ss:$8 sm:$0x3] }
 0x3bb   : > { %v2349_v38 = vsel %vm7004_vm10, %v2346_v54, %v2348_v55  ;;  %v2350_v58 = vsel %vm7005_vm11, %v2348_v55, %v2346_v54  ;;  %v2445_v54 = vmax.f32 %v2441_v3, %v2443_v40  ;;  %vm7014_vm10 = vcmp.lt.s32.totalorder %v4920_v52, 16 }
 0x3bc   : > { %v2363_v32 = vmul.f32 %v2356_v4, %v2349_v38  ;;  %v2364_v30 = vmul.f32 %v2360_v48, %v2350_v58  ;;  %v2454_v4 = vadd.f32 %v2452_v31, %v6048_v51  ;;  %v2453_v38 = vadd.f32 %v2451_v29, %v6046_v36  ;;  %v2464_v36 = vld [vmem:[%s6880_s3 + $0xa8] sm:$0xff]  ;;  %vm7015_vm11 = vmmov %vm7014_vm10 }
 0x3bd   : > { %v2368_v20 = vpop.permute.xlu0 %2367  ;;  %v2712_v31 = vrot.slane %v4198_v34, %v4932_v56 }
 0x3be   : > { %v2370_v59 = vpop.permute.xlu1 %2369  ;;  %v4395_v63 = vpack.c.bf16 %v2364_v30, %v2342_v16  ;;  %v4397_v11 = vpack.c.bf16 %v2363_v32, %v2341_v41  ;;  %v2456_v58 = vmul.f32 0.25, %v2454_v4  ;;  %v2455_v51 = vmul.f32 0.25, %v2453_v38  ;;  %v2463_v32 = vld [vmem:[%s6880_s3 + $0xa0] sm:$0xff]  ;;  %v3188_v30 = vld [vmem:[%s6880_s3 + $0xb8] sm:$0xff] }
 0x3bf   : > { %v2371_v10 = vsel %vm886_vm13, %v2368_v20, %v2370_v59  ;;  %v2372_v45 = vsel %vm886_vm13, %v2370_v59, %v2368_v20 }
 0x3c0   : > { %4396 = vmatprep.subr.bf16.mxu0 %v4395_v63  ;;  %v2385_v43 = vmul.f32 %v2378_v33, %v2371_v10  ;;  %v2386_v46 = vmul.f32 %v2382_v27, %v2372_v45  ;;  %v2642_v63 = vrot.slane %v2637_v26, %v4926_v53  ;;  %v2668_v33 = vrot.slane %v4196_v57, %v4932_v56 }
 0x3c1   : > { %v2390_v13 = vpop.permute.xlu0 %2389  ;;  %4398 = vmatpush1.bf16.msra.mxu0 %v4397_v11  ;;  %v2646_v11 = vrot.slane %v2637_v26, %v4932_v56 }
 0x3c2   : > { %v2392_v6 = vpop.permute.xlu1 %2391 }
 0x3c3   : > { %v2393_v2 = vsel %vm910_vm0, %v2390_v13, %v2392_v6  ;;  %v2394_v5 = vsel %vm910_vm0, %v2392_v6, %v2390_v13 }
 0x3c4   : > { %v2407_v12 = vmul.f32 %v2400_v35, %v2393_v2  ;;  %v2408_v19 = vmul.f32 %v2404_v24, %v2394_v5  ;;  %v4197_v5 = vld [vmem:[%s6877_s0 + $0x2] ss:$8 sm:$0x3] }
 0x3c5   : > { %v2412_v28 = vpop.permute.xlu0 %2411 }
 0x3c6   : > { %v2414_v62 = vpop.permute.xlu1 %2413  ;;  %v4399_v47 = vpack.c.bf16 %v2408_v19, %v2386_v46  ;;  %v4401_v9 = vpack.c.bf16 %v2407_v12, %v2385_v43  ;;  %v2686_v12 = vrot.slane %v4197_v5, %v4926_v53  ;;  %v2690_v19 = vrot.slane %v4197_v5, %v4932_v56 }
 0x3c7   : > { %v2415_v23 = vsel %vm934_vm15, %v2412_v28, %v2414_v62  ;;  %v2416_v14 = vsel %vm934_vm15, %v2414_v62, %v2412_v28  ;;  %v2708_v28 = vrot.slane %v4198_v34, %v4926_v53 }
 0x3c8   : > { %v2429_v48 = vmul.f32 %v2422_v49, %v2415_v23  ;;  %v2430_v17 = vmul.f32 %v2426_v61, %v2416_v14  ;;  %4400 = vmatprep.subr.bf16.mxu0 %v4399_v47 }
 0x3c9   : > { %4402 = vmatpush1.bf16.msra.mxu0 %v4401_v9 }
 0x3ca   : > { %v4403_v25 = vpack.c.bf16 %v2446_v21, %v2430_v17  ;;  %v4405_v55 = vpack.c.bf16 %v2445_v54, %v2429_v48  ;;  %v4199_v21 = vld [vmem:[%s6877_s0 + $0x4] ss:$8 sm:$0x3]  ;;  %v4200_v54 = vld [vmem:[%s6877_s0 + $0x5] ss:$8 sm:$0x3] }
 0x3cb   : > { %v2730_v38 = vrot.slane %v4199_v21, %v4926_v53 }
 0x3cc   : > { %4404 = vmatprep.subr.bf16.mxu0 %v4403_v25 }
 0x3cd   : > { %4406 = vmatpush1.bf16.msra.mxu0 %v4405_v55 }
 0x3ce   : > { %2580 = vmatprep.subr.mxu0 %v2456_v58  ;;  %v2734_v58 = vrot.slane %v4199_v21, %v4932_v56 }
 0x3d1   : > { %2581 = vmatpush1.msra.mxu0 %v2455_v51  ;;  %v2752_v51 = vrot.slane %v4200_v54, %v4926_v53 }
 0x3d2   : > { %2593 = vmatmul.mubr.f32.vlgmr.msra.gmra.mrb[0].mxu0 %v2459_v42  ;;  %v2756_v42 = vrot.slane %v4200_v54, %v4932_v56 }
 0x4a5   : > { %v2594_v22 = vpop.f32.mrb[0].mxu0 }
 0x4a6   : > { %v6117_v41 = vadd.f32 %v2594_v22, %v5753_v60  ;;  %v2596_v18 = vpop.f32.mrb[1].mxu0  ;;  %v2462_v60 = vld [vmem:[%s6880_s3 + $0x98] sm:$0xff] }
 0x4a7   : > { %v6120_v16 = vadd.f32 %v2596_v18, %v5757_v1  ;;  %v2461_v1 = vld [vmem:[%s6880_s3 + $0x90] sm:$0xff]  ;;  %4194 = vmatprep.mubr.msk.f32.mxu0 %vm1042_vm2, %v2462_v60 }
 0x4a8   : > { %2631 = vrot.lane.b32.xlu0 %v6117_v41, %s4574_s26  ;;  %2599 = vmatmul.mubr.f32.gmra.mrb[2].mxu0 %v2461_v1 }
 0x4a9   : > { %2633 = vrot.lane.b32.xlu1 %v6120_v16, %s4574_s26  ;;  %4195 = vmatprep.mubr.msk.f32.mxu0 %vm1042_vm2, %v2464_v36 }
 0x4ac   : > { %2653 = vrot.lane.b32.xlu0 %v6117_v41, %s4573_s25  ;;  %2605 = vmatmul.mubr.f32.gmra.mrb[4].mxu0 %v2463_v32 }
 0x4ad   : > { %2655 = vrot.lane.b32.xlu1 %v6120_v16, %s4573_s25  ;;  %4219 = vmatprep.mubr.msk.f32.mxu0 %vm1042_vm2, %v3188_v30 }
 0x4b0   : > { %2675 = vrot.lane.b32.xlu0 %v6117_v41, %s4575_s27 }
 0x4b1   : > { %2677 = vrot.lane.b32.xlu1 %v6120_v16, %s4575_s27 }
 0x4b4   : > { %2697 = vrot.lane.b32.xlu0 %v6117_v41, %s4576_s28 }
 0x4b5   : > { %2699 = vrot.lane.b32.xlu1 %v6120_v16, %s4576_s28 }
 0x4b8   : > { %2719 = vrot.lane.b32.xlu0 %v6117_v41, %s6943_s29 }
 0x4b9   : > { %2721 = vrot.lane.b32.xlu1 %v6120_v16, %s6943_s29 }
 0x4bc   : > { %2741 = vrot.lane.b32.xlu0 %v6117_v41, %s6974_s30 }
 0x4bd   : > { %2743 = vrot.lane.b32.xlu1 %v6120_v16, %s6974_s30 }
 0x4c0   : > { %2763 = vrot.lane.b32.xlu0 %v6117_v41, %s6975_s5 }
 0x4c1   : > { %2765 = vrot.lane.b32.xlu1 %v6120_v16, %s6975_s5 }
 0x4c4   : > { %2785 = vrot.lane.b32.xlu0 %v6117_v41, %s6941_s6 }
 0x4c5   : > { %2787 = vrot.lane.b32.xlu1 %v6120_v16, %s6941_s6 }
 0x4c8   : > { %2807 = vrot.lane.b32.xlu0 %v6117_v41, %s6939_s7 }
 0x4c9   : > { %2809 = vrot.lane.b32.xlu1 %v6120_v16, %s6939_s7 }
 0x4cc   : > { %2829 = vrot.lane.b32.xlu0 %v6117_v41, %s6937_s8 }
 0x4cd   : > { %2831 = vrot.lane.b32.xlu1 %v6120_v16, %s6937_s8 }
 0x4d0   : > { %2851 = vrot.lane.b32.xlu0 %v6117_v41, %s6935_s9 }
 0x4d1   : > { %2853 = vrot.lane.b32.xlu1 %v6120_v16, %s6935_s9  ;;  %s7038_s9 = sshll.u32 %s7072_s16, 5  ;;  %s7039_s16 = smov 30  }
 0x4d2   : > { %s6496_s8 = scalar_lea.vmem %s6881_s4, %s7038_s9 }
 0x4d4   : > { %2873 = vrot.lane.b32.xlu0 %v6117_v41, %s6933_s10 }
 0x4d5   : > { %2875 = vrot.lane.b32.xlu1 %v6120_v16, %s6933_s10 }
 0x4d8   : > { %2897 = vrot.lane.b32.xlu0 %v6117_v41, %s7006_s19 }
 0x4d9   : > { %2899 = vrot.lane.b32.xlu1 %v6120_v16, %s7006_s19 }
 0x4dc   : > { %2919 = vrot.lane.b32.xlu0 %v6117_v41, %s7007_s24 }
 0x4dd   : > { %2921 = vrot.lane.b32.xlu1 %v6120_v16, %s7007_s24 }
 0x4e0   : > { %2941 = vrot.lane.b32.xlu0 %v6117_v41, %s7008_s11 }
 0x4e1   : > { %2943 = vrot.lane.b32.xlu1 %v6120_v16, %s7008_s11 }
 0x4e4   : > { %2963 = vrot.lane.b32.xlu0 %v6117_v41, %s7009_s12 }
 0x4e5   : > { %2965 = vrot.lane.b32.xlu1 %v6120_v16, %s7009_s12 }
 0x4e8   : > { %2985 = vrot.lane.b32.xlu0 %v6117_v41, %s7010_s13 }
 0x4e9   : > { %2987 = vrot.lane.b32.xlu1 %v6120_v16, %s7010_s13 }
 0x4ec   : > { %3007 = vrot.lane.b32.xlu0 %v6117_v41, %s7011_s14 }
 0x4ed   : > { %3009 = vrot.lane.b32.xlu1 %v6120_v16, %s7011_s14 }
 0x4f0   : > { %3029 = vrot.lane.b32.xlu0 %v6117_v41, %s6976_s17 }
 0x4f1   : > { %3031 = vrot.lane.b32.xlu1 %v6120_v16, %s6976_s17 }
 0x4f4   : > { %3051 = vrot.lane.b32.xlu0 %v6117_v41, %s6977_s20 }
 0x4f5   : > { %3053 = vrot.lane.b32.xlu1 %v6120_v16, %s6977_s20 }
 0x4f8   : > { %3073 = vrot.lane.b32.xlu0 %v6117_v41, %s6978_s21 }
 0x4f9   : > { %3075 = vrot.lane.b32.xlu1 %v6120_v16, %s6978_s21 }
 0x4fc   : > { %3095 = vrot.lane.b32.xlu0 %v6117_v41, %s6979_s22 }
 0x4fd   : > { %3097 = vrot.lane.b32.xlu1 %v6120_v16, %s6979_s22 }
 0x500   : > { %3117 = vrot.lane.b32.xlu0 %v6117_v41, %s6980_s23 }
 0x501   : > { %3119 = vrot.lane.b32.xlu1 %v6120_v16, %s6980_s23 }
 0x504   : > { %3139 = vrot.lane.b32.xlu0 %v6117_v41, %s6981_s18 }
 0x505   : > { %3141 = vrot.lane.b32.xlu1 %v6120_v16, %s6981_s18 }
 0x51a   : > { %v2632_v20 = vpop.permute.xlu0 %2631 }
 0x51b   : > { %v2634_v59 = vpop.permute.xlu1 %2633 }
 0x51c   : > { %v2635_v27 = vsel %vm381_vm6, %v2632_v20, %v2634_v59  ;;  %v2636_v35 = vsel %vm381_vm6, %v2634_v59, %v2632_v20 }
 0x51d   : > { %v2649_v6 = vmul.f32 %v2642_v63, %v2636_v35  ;;  %v2650_v49 = vmul.f32 %v2646_v11, %v2635_v27  ;;  %v4201_v63 = vld [vmem:[%s6877_s0 + $0x6] ss:$8 sm:$0x3]  ;;  %v4202_v11 = vld [vmem:[%s6877_s0 + $0x7] ss:$8 sm:$0x3] }
 0x51e   : > { %v2654_v24 = vpop.permute.xlu0 %2653  ;;  %v2774_v35 = vrot.slane %v4201_v63, %v4926_v53 }
 0x51f   : > { %v2656_v10 = vpop.permute.xlu1 %2655 }
 0x520   : > { %v2657_v45 = vsel %vm404_vm3, %v2654_v24, %v2656_v10  ;;  %v2658_v13 = vsel %vm404_vm3, %v2656_v10, %v2654_v24  ;;  %v2778_v24 = vrot.slane %v4201_v63, %v4932_v56  ;;  %v2796_v10 = vrot.slane %v4202_v11, %v4926_v53 }
 0x521   : > { %v2671_v61 = vmul.f32 %v2664_v8, %v2658_v13  ;;  %v2672_v7 = vmul.f32 %v2668_v33, %v2657_v45  ;;  %v2800_v45 = vrot.slane %v4202_v11, %v4932_v56 }
 0x522   : > { %v2676_v2 = vpop.permute.xlu0 %2675 }
 0x523   : > { %v4409_v40 = vpack.c.bf16 %v2671_v61, %v2649_v6  ;;  %v2678_v43 = vpop.permute.xlu1 %2677  ;;  %v4407_v46 = vpack.c.bf16 %v2672_v7, %v2650_v49 }
 0x524   : > { %v2679_v62 = vsel %vm428_vm5, %v2676_v2, %v2678_v43  ;;  %v2680_v47 = vsel %vm428_vm5, %v2678_v43, %v2676_v2 }
 0x525   : > { %4408 = vmatprep.subr.bf16.mxu0 %v4407_v46  ;;  %v2693_v14 = vmul.f32 %v2686_v12, %v2680_v47  ;;  %v2694_v4 = vmul.f32 %v2690_v19, %v2679_v62  ;;  %v4203_v12 = vld [vmem:[%s6877_s0 + $0x10] ss:$8 sm:$0x3]  ;;  %v4204_v19 = vld [vmem:[%s6877_s0 + $0x11] ss:$8 sm:$0x3] }
 0x526   : > { %v2698_v9 = vpop.permute.xlu0 %2697  ;;  %4410 = vmatpush1.bf16.msra.mxu0 %v4409_v40  ;;  %v2818_v47 = vrot.slane %v4203_v12, %v4926_v53 }
 0x527   : > { %v2700_v37 = vpop.permute.xlu1 %2699 }
 0x528   : > { %v2701_v3 = vsel %vm452_vm4, %v2698_v9, %v2700_v37  ;;  %v2702_v23 = vsel %vm452_vm4, %v2700_v37, %v2698_v9  ;;  %v2822_v9 = vrot.slane %v4203_v12, %v4932_v56  ;;  %v2840_v37 = vrot.slane %v4204_v19, %v4926_v53 }
 0x529   : > { %v2715_v0 = vmul.f32 %v2708_v28, %v2702_v23  ;;  %v2716_v48 = vmul.f32 %v2712_v31, %v2701_v3  ;;  %v2844_v3 = vrot.slane %v4204_v19, %v4932_v56 }
 0x52a   : > { %v2720_v17 = vpop.permute.xlu0 %2719 }
 0x52b   : > { %v4413_v29 = vpack.c.bf16 %v2715_v0, %v2693_v14  ;;  %v2722_v25 = vpop.permute.xlu1 %2721  ;;  %v4411_v55 = vpack.c.bf16 %v2716_v48, %v2694_v4 }
 0x52c   : > { %v2723_v22 = vsel %vm476_vm7, %v2720_v17, %v2722_v25  ;;  %v2724_v18 = vsel %vm476_vm7, %v2722_v25, %v2720_v17 }
 0x52d   : > { %4412 = vmatprep.subr.bf16.mxu0 %v4411_v55  ;;  %v2737_v30 = vmul.f32 %v2730_v38, %v2724_v18  ;;  %v2738_v20 = vmul.f32 %v2734_v58, %v2723_v22  ;;  %v4205_v38 = vld [vmem:[%s6877_s0 + $0x12] ss:$8 sm:$0x3]  ;;  %v4206_v58 = vld [vmem:[%s6877_s0 + $0x13] ss:$8 sm:$0x3] }
 0x52e   : > { %v2742_v60 = vpop.permute.xlu0 %2741  ;;  %4414 = vmatpush1.bf16.msra.mxu0 %v4413_v29  ;;  %v2862_v18 = vrot.slane %v4205_v38, %v4926_v53 }
 0x52f   : > { %v2744_v1 = vpop.permute.xlu1 %2743 }
 0x530   : > { %v2745_v36 = vsel %vm500_vm8, %v2742_v60, %v2744_v1  ;;  %v2746_v32 = vsel %vm500_vm8, %v2744_v1, %v2742_v60  ;;  %v2866_v60 = vrot.slane %v4205_v38, %v4932_v56  ;;  %v2884_v1 = vrot.slane %v4206_v58, %v4926_v53 }
 0x531   : > { %v2759_v26 = vmul.f32 %v2752_v51, %v2746_v32  ;;  %v2760_v57 = vmul.f32 %v2756_v42, %v2745_v36  ;;  %v2888_v36 = vrot.slane %v4206_v58, %v4932_v56  ;;  %v4207_v32 = vld [vmem:[%s6877_s0 + $0x15] ss:$8 sm:$0x3] }
 0x532   : > { %v2764_v59 = vpop.permute.xlu0 %2763  ;;  %v2908_v11 = vrot.slane %v4207_v32, %v4926_v53 }
 0x533   : > { %v4417_v8 = vpack.c.bf16 %v2759_v26, %v2737_v30  ;;  %v2766_v33 = vpop.permute.xlu1 %2765  ;;  %v4415_v27 = vpack.c.bf16 %v2760_v57, %v2738_v20 }
 0x534   : > { %v2767_v13 = vsel %vm7012_vm9, %v2764_v59, %v2766_v33  ;;  %v2768_v6 = vsel %vm7013_vm12, %v2766_v33, %v2764_v59  ;;  %vm7016_vm9 = vcmp.lt.s32.totalorder %v4920_v52, 15 }
 0x535   : > { %4416 = vmatprep.subr.bf16.mxu0 %v4415_v27  ;;  %v2781_v5 = vmul.f32 %v2774_v35, %v2768_v6  ;;  %v2782_v34 = vmul.f32 %v2778_v24, %v2767_v13  ;;  %vm7017_vm12 = vmmov %vm7016_vm9 }
 0x536   : > { %v2786_v49 = vpop.permute.xlu0 %2785  ;;  %4418 = vmatpush1.bf16.msra.mxu0 %v4417_v8  ;;  %v2912_v8 = vrot.slane %v4207_v32, %v4932_v56 }
 0x537   : > { %v2788_v61 = vpop.permute.xlu1 %2787 }
 0x538   : > { %v2789_v7 = vsel %vm7014_vm10, %v2786_v49, %v2788_v61  ;;  %v2790_v2 = vsel %vm7015_vm11, %v2788_v61, %v2786_v49  ;;  %vm7018_vm10 = vcmp.lt.s32.totalorder %v4920_v52, 14 }
 0x539   : > { %v2803_v40 = vmul.f32 %v2796_v10, %v2790_v2  ;;  %v2804_v43 = vmul.f32 %v2800_v45, %v2789_v7  ;;  %vm7019_vm11 = vmmov %vm7018_vm10 }
 0x53a   : > { %v2808_v46 = vpop.permute.xlu0 %2807 }
 0x53b   : > { %v4421_v28 = vpack.c.bf16 %v2803_v40, %v2781_v5  ;;  %v2810_v31 = vpop.permute.xlu1 %2809  ;;  %v4419_v62 = vpack.c.bf16 %v2804_v43, %v2782_v34  ;;  %v4208_v34 = vld [vmem:[%s6877_s0 + $0x16] ss:$8 sm:$0x3]  ;;  %v4209_v40 = vld [vmem:[%s6877_s0 + $0x17] ss:$8 sm:$0x3] }
 0x53c   : > { %v2811_v23 = vsel %vm7016_vm9, %v2808_v46, %v2810_v31  ;;  %v2812_v14 = vsel %vm7017_vm12, %v2810_v31, %v2808_v46  ;;  %vm7020_vm9 = vcmp.lt.s32.totalorder %v4920_v52, 2  ;;  %v2930_v19 = vrot.slane %v4208_v34, %v4926_v53 }
 0x53d   : > { %4420 = vmatprep.subr.bf16.mxu0 %v4419_v62  ;;  %v2825_v21 = vmul.f32 %v2818_v47, %v2812_v14  ;;  %v2826_v54 = vmul.f32 %v2822_v9, %v2811_v23  ;;  %vm7021_vm12 = vmmov %vm7020_vm9  ;;  %v2952_v31 = vrot.slane %v4209_v40, %v4926_v53  ;;  %v2956_v62 = vrot.slane %v4209_v40, %v4932_v56 }
 0x53e   : > { %v2830_v4 = vpop.permute.xlu0 %2829  ;;  %4422 = vmatpush1.bf16.msra.mxu0 %v4421_v28  ;;  %v2934_v28 = vrot.slane %v4208_v34, %v4932_v56 }
 0x53f   : > { %v2832_v0 = vpop.permute.xlu1 %2831 }
 0x540   : > { %v2833_v48 = vsel %vm7018_vm10, %v2830_v4, %v2832_v0  ;;  %v2834_v17 = vsel %vm7019_vm11, %v2832_v0, %v2830_v4  ;;  %vm7022_vm10 = vcmp.lt.s32.totalorder %v4920_v52, 1 }
 0x541   : > { %v2847_v29 = vmul.f32 %v2840_v37, %v2834_v17  ;;  %v2848_v25 = vmul.f32 %v2844_v3, %v2833_v48  ;;  %vm7023_vm11 = vmmov %vm7022_vm10 }
 0x542   : > { %v2852_v55 = vpop.permute.xlu0 %2851 }
 0x543   : > { %v4425_v51 = vpack.c.bf16 %v2847_v29, %v2825_v21  ;;  %v2854_v42 = vpop.permute.xlu1 %2853  ;;  %v4423_v22 = vpack.c.bf16 %v2848_v25, %v2826_v54  ;;  %v4210_v54 = vld [vmem:[%s6877_s0 + $0x20] ss:$8 sm:$0x3]  ;;  %v4211_v29 = vld [vmem:[%s6877_s0 + $0x21] ss:$8 sm:$0x3] }
 0x544   : > { %v2855_v30 = vsel %vm7020_vm9, %v2852_v55, %v2854_v42  ;;  %v2856_v20 = vsel %vm7021_vm12, %v2854_v42, %v2852_v55  ;;  %vm7024_vm9 = vcmp.lt.s32.totalorder %v4920_v52, 127  ;;  %v2974_v58 = vrot.slane %v4210_v54, %v4926_v53 }
 0x545   : > { %4424 = vmatprep.subr.bf16.mxu0 %v4423_v22  ;;  %v2869_v33 = vmul.f32 %v2862_v18, %v2856_v20  ;;  %v2870_v27 = vmul.f32 %v2866_v60, %v2855_v30  ;;  %vm7025_vm12 = vmmov %vm7024_vm9  ;;  %v2996_v42 = vrot.slane %v4211_v29, %v4926_v53  ;;  %v3000_v22 = vrot.slane %v4211_v29, %v4932_v56 }
 0x546   : > { %v2874_v26 = vpop.permute.xlu0 %2873  ;;  %4426 = vmatpush1.bf16.msra.mxu0 %v4425_v51  ;;  %v2978_v51 = vrot.slane %v4210_v54, %v4932_v56 }
 0x547   : > { %v2876_v57 = vpop.permute.xlu1 %2875 }
 0x548   : > { %v2877_v59 = vsel %vm7022_vm10, %v2874_v26, %v2876_v57  ;;  %v2878_v63 = vsel %vm7023_vm11, %v2876_v57, %v2874_v26  ;;  %vm7026_vm10 = vcmp.lt.s32.totalorder %v4920_v52, 126 }
 0x549   : > { %v2891_v35 = vmul.f32 %v2884_v1, %v2878_v63  ;;  %v2892_v24 = vmul.f32 %v2888_v36, %v2877_v59  ;;  %vm7027_vm11 = vmmov %vm7026_vm10 }
 0x54a   : > { %v2898_v10 = vpop.permute.xlu0 %2897 }
 0x54b   : > { %v4429_v45 = vpack.c.bf16 %v2891_v35, %v2869_v33  ;;  %v2900_v13 = vpop.permute.xlu1 %2899  ;;  %v4427_v6 = vpack.c.bf16 %v2892_v24, %v2870_v27 }
 0x54c   : > { %v2901_v49 = vsel %vm7024_vm9, %v2898_v10, %v2900_v13  ;;  %v2902_v61 = vsel %vm7025_vm12, %v2900_v13, %v2898_v10  ;;  %vm7028_vm9 = vcmp.lt.s32.totalorder %v4920_v52, 114 }
 0x54d   : > { %v6353_v7 = vmul.f32 %v2908_v11, %v2901_v49  ;;  %v6355_v2 = vmul.f32 %v2912_v8, %v2902_v61  ;;  %4428 = vmatprep.subr.bf16.mxu0 %v4427_v6  ;;  %vm7029_vm12 = vmmov %vm7028_vm9  ;;  %v4212_v11 = vld [vmem:[%s6877_s0 + $0x22] ss:$8 sm:$0x3]  ;;  %v4213_v8 = vld [vmem:[%s6877_s0 + $0x23] ss:$8 sm:$0x3] }
 0x54e   : > { %v2920_v5 = vpop.permute.xlu0 %2919  ;;  %4430 = vmatpush1.bf16.msra.mxu0 %v4429_v45  ;;  %v3018_v24 = vrot.slane %v4212_v11, %v4926_v53  ;;  %v3022_v10 = vrot.slane %v4212_v11, %v4932_v56  ;;  %v3040_v45 = vrot.slane %v4213_v8, %v4926_v53  ;;  %v3044_v13 = vrot.slane %v4213_v8, %v4932_v56 }
 0x54f   : > { %v2922_v43 = vpop.permute.xlu1 %2921  ;;  %v4433_v46 = vpack.c.bf16 %v6353_v7, %v6117_v41  ;;  %v4431_v12 = vpack.c.bf16 %v6355_v2, %v6120_v16 }
 0x550   : > { %v2923_v47 = vsel %vm7026_vm10, %v2920_v5, %v2922_v43  ;;  %v2924_v9 = vsel %vm7027_vm11, %v2922_v43, %v2920_v5  ;;  %vm7030_vm10 = vcmp.lt.s32.totalorder %v4920_v52, 113 }
 0x551   : > { %4432 = vmatprep.subr.bf16.mxu0 %v4431_v12  ;;  %v2937_v4 = vmul.f32 %v2930_v19, %v2923_v47  ;;  %v2938_v0 = vmul.f32 %v2934_v28, %v2924_v9  ;;  %vm7031_vm11 = vmmov %vm7030_vm10 }
 0x552   : > { %v2942_v37 = vpop.permute.xlu0 %2941  ;;  %4434 = vmatpush1.bf16.msra.mxu0 %v4433_v46 }
 0x553   : > { %v2944_v3 = vpop.permute.xlu1 %2943 }
 0x554   : > { %v2945_v23 = vsel %vm7028_vm9, %v2942_v37, %v2944_v3  ;;  %v2946_v14 = vsel %vm7029_vm12, %v2944_v3, %v2942_v37  ;;  %vm7032_vm9 = vcmp.lt.s32.totalorder %v4920_v52, 112 }
 0x555   : > { %v2959_v48 = vmul.f32 %v2952_v31, %v2945_v23  ;;  %v2960_v17 = vmul.f32 %v2956_v62, %v2946_v14  ;;  %vm7033_vm12 = vmmov %vm7032_vm9  ;;  %v4214_v31 = vld [vmem:[%s6877_s0 + $0x24] ss:$8 sm:$0x3]  ;;  %v4215_v62 = vld [vmem:[%s6877_s0 + $0x25] ss:$8 sm:$0x3] }
 0x556   : > { %v2964_v21 = vpop.permute.xlu0 %2963  ;;  %v3062_v3 = vrot.slane %v4214_v31, %v4926_v53  ;;  %v3066_v23 = vrot.slane %v4214_v31, %v4932_v56  ;;  %v3084_v14 = vrot.slane %v4215_v62, %v4926_v53 }
 0x557   : > { %v4437_v25 = vpack.c.bf16 %v2959_v48, %v2937_v4  ;;  %v2966_v55 = vpop.permute.xlu1 %2965  ;;  %v4435_v38 = vpack.c.bf16 %v2960_v17, %v2938_v0  ;;  %v3088_v4 = vrot.slane %v4215_v62, %v4932_v56 }
 0x558   : > { %v2967_v18 = vsel %vm7030_vm10, %v2964_v21, %v2966_v55  ;;  %v2968_v60 = vsel %vm7031_vm11, %v2966_v55, %v2964_v21  ;;  %vm7034_vm10 = vcmp.lt.s32.totalorder %v4920_v52, 110 }
 0x559   : > { %4436 = vmatprep.subr.bf16.mxu0 %v4435_v38  ;;  %v2981_v20 = vmul.f32 %v2974_v58, %v2967_v18  ;;  %v2982_v26 = vmul.f32 %v2978_v51, %v2968_v60  ;;  %vm7035_vm11 = vmmov %vm7034_vm10 }
 0x55a   : > { %v2986_v1 = vpop.permute.xlu0 %2985  ;;  %4438 = vmatpush1.bf16.msra.mxu0 %v4437_v25 }
 0x55b   : > { %v2988_v36 = vpop.permute.xlu1 %2987 }
 0x55c   : > { %v2989_v32 = vsel %vm7032_vm9, %v2986_v1, %v2988_v36  ;;  %v2990_v30 = vsel %vm7033_vm12, %v2988_v36, %v2986_v1  ;;  %vm7036_vm9 = vcmp.lt.s32.totalorder %v4920_v52, 97  ;;  %v4218_v36 = vld [vmem:[%s6877_s0 + $0x30] ss:$8 sm:$0x3] }
 0x55d   : > { %v6397_v57 = vmul.f32 %v2996_v42, %v2989_v32  ;;  %v6399_v59 = vmul.f32 %v3000_v22, %v2990_v30  ;;  %vm7037_vm12 = vmmov %vm7036_vm9  ;;  %v4216_v42 = vld [vmem:[%s6877_s0 + $0x26] ss:$8 sm:$0x3]  ;;  %v4217_v22 = vld [vmem:[%s6877_s0 + $0x27] ss:$8 sm:$0x3] }
 0x55e   : > { %v3008_v63 = vpop.permute.xlu0 %3007  ;;  %v3106_v32 = vrot.slane %v4216_v42, %v4926_v53  ;;  %v3110_v30 = vrot.slane %v4216_v42, %v4932_v56 }
 0x55f   : > { %v4441_v33 = vpack.c.bf16 %v6397_v57, %v2981_v20  ;;  %v3010_v27 = vpop.permute.xlu1 %3009  ;;  %v4439_v35 = vpack.c.bf16 %v6399_v59, %v2982_v26  ;;  %v3128_v20 = vrot.slane %v4217_v22, %v4926_v53  ;;  %v3132_v26 = vrot.slane %v4217_v22, %v4932_v56 }
 0x560   : > { %v3011_v6 = vsel %vm790_vm1, %v3008_v63, %v3010_v27  ;;  %v3012_v49 = vsel %vm790_vm1, %v3010_v27, %v3008_v63 }
 0x561   : > { %4440 = vmatprep.subr.bf16.mxu0 %v4439_v35  ;;  %v6421_v43 = vmul.f32 %v3018_v24, %v3011_v6  ;;  %v6423_v46 = vmul.f32 %v3022_v10, %v3012_v49  ;;  %v3150_v35 = vrot.slane %v4218_v36, %v4926_v53  ;;  %v3154_v24 = vrot.slane %v4218_v36, %v4932_v56 }
 0x562   : > { %v3030_v61 = vpop.permute.xlu0 %3029  ;;  %4442 = vmatpush1.bf16.msra.mxu0 %v4441_v33  ;;  %v3178_v33 = vadd.f32 %v6120_v16, %v6355_v2 }
 0x563   : > { %v3032_v5 = vpop.permute.xlu1 %3031  ;;  %v3171_v10 = vmax.f32 %v6397_v57, %v6421_v43 }
 0x564   : > { %v3033_v34 = vsel %vm7034_vm10, %v3030_v61, %v3032_v5  ;;  %v3034_v40 = vsel %vm7035_vm11, %v3032_v5, %v3030_v61  ;;  %vm7053_vm11 = vcmp.lt.s32.totalorder %v4920_v52, 2 }
 0x565   : > { %v3047_v12 = vmul.f32 %v3040_v45, %v3033_v34  ;;  %v3048_v19 = vmul.f32 %v3044_v13, %v3034_v40  ;;  %v3172_v45 = vmax.f32 %v6399_v59, %v6423_v46 }
 0x566   : > { %v3052_v28 = vpop.permute.xlu0 %3051 }
 0x567   : > { %v4445_v47 = vpack.c.bf16 %v3047_v12, %v6421_v43  ;;  %v3054_v9 = vpop.permute.xlu1 %3053  ;;  %v4443_v37 = vpack.c.bf16 %v3048_v19, %v6423_v46  ;;  %v3180_v12 = vadd.f32 %v3178_v33, %v6399_v59  ;;  %v3169_v19 = vmax.f32 %v6117_v41, %v6353_v7 }
 0x568   : > { %v3055_v0 = vsel %vm838_vm14, %v3052_v28, %v3054_v9  ;;  %v3056_v48 = vsel %vm838_vm14, %v3054_v9, %v3052_v28  ;;  %v3170_v28 = vmax.f32 %v6120_v16, %v6355_v2  ;;  %v3177_v9 = vadd.f32 %v6117_v41, %v6353_v7 }
 0x569   : > { %4444 = vmatprep.subr.bf16.mxu0 %v4443_v37  ;;  %v3069_v25 = vmul.f32 %v3062_v3, %v3055_v0  ;;  %v3070_v55 = vmul.f32 %v3066_v23, %v3056_v48  ;;  %v3182_v59 = vadd.f32 %v3180_v12, %v6423_v46  ;;  %v3173_v23 = vmax.f32 %v3169_v19, %v3171_v10  ;;  %v3187_v46 = vld [vmem:[%s6880_s3 + $0xb0] sm:$0xff] }
 0x56a   : > { %v3074_v17 = vpop.permute.xlu0 %3073  ;;  %4446 = vmatpush1.bf16.msra.mxu0 %v4445_v47  ;;  %v3174_v16 = vmax.f32 %v3170_v28, %v3172_v45  ;;  %v3179_v2 = vadd.f32 %v3177_v9, %v6397_v57 }
 0x56b   : > { %v3076_v21 = vpop.permute.xlu1 %3075  ;;  %v3184_v7 = vmul.f32 0.25, %v3182_v59  ;;  %v4225_v59 = vld [vmem:[%s6877_s0 + $0x5] ss:$8 sm:$0x3] }
 0x56c   : > { %v3077_v54 = vsel %vm7036_vm9, %v3074_v17, %v3076_v21  ;;  %v3078_v29 = vsel %vm7037_vm12, %v3076_v21, %v3074_v17  ;;  %v3181_v41 = vadd.f32 %v3179_v2, %v6421_v43  ;;  %vm7054_vm9 = vmmov %vm7053_vm11  ;;  %vm7055_vm12 = vcmp.lt.s32.totalorder %v4920_v52, 1 }
 0x56d   : > { %v3091_v38 = vmul.f32 %v3084_v14, %v3077_v54  ;;  %v3092_v58 = vmul.f32 %v3088_v4, %v3078_v29  ;;  %v3899_v29 = vld [vmem:[%s6880_s3 + $0xd8] sm:$0xff] }
 0x56e   : > { %v3096_v51 = vpop.permute.xlu0 %3095  ;;  %v3183_v17 = vmul.f32 0.25, %v3181_v41 }
 0x56f   : > { %v4449_v18 = vpack.c.bf16 %v3091_v38, %v3069_v25  ;;  %v3098_v60 = vpop.permute.xlu1 %3097  ;;  %v4447_v1 = vpack.c.bf16 %v3092_v58, %v3070_v55  ;;  %v3348_v55 = vld [vmem:[%s6877_s0] ss:$8 sm:$0x3]  ;;  %v4221_v38 = vld [vmem:[%s6877_s0 + $0x1] ss:$8 sm:$0x3] }
 0x570   : > { %v3099_v63 = vsel %vm886_vm13, %v3096_v51, %v3098_v60  ;;  %v3100_v11 = vsel %vm886_vm13, %v3098_v60, %v3096_v51  ;;  %v3353_v51 = vrot.slane %v3348_v55, %v4926_v53  ;;  %v3357_v42 = vrot.slane %v3348_v55, %v4932_v56 }
 0x571   : > { %4448 = vmatprep.subr.bf16.mxu0 %v4447_v1  ;;  %v3113_v49 = vmul.f32 %v3106_v32, %v3099_v63  ;;  %v3114_v61 = vmul.f32 %v3110_v30, %v3100_v11  ;;  %v3375_v22 = vrot.slane %v4221_v38, %v4926_v53 }
 0x572   : > { %v3118_v8 = vpop.permute.xlu0 %3117  ;;  %4450 = vmatpush1.bf16.msra.mxu0 %v4449_v18  ;;  %v3379_v18 = vrot.slane %v4221_v38, %v4932_v56  ;;  %v4226_v38 = vld [vmem:[%s6877_s0 + $0x6] ss:$8 sm:$0x3] }
 0x573   : > { %v3120_v27 = vpop.permute.xlu1 %3119 }
 0x574   : > { %v3121_v13 = vsel %vm910_vm0, %v3118_v8, %v3120_v27  ;;  %v3122_v6 = vsel %vm910_vm0, %v3120_v27, %v3118_v8  ;;  %v4222_v27 = vld [vmem:[%s6877_s0 + $0x2] ss:$8 sm:$0x3] }
 0x575   : > { %v3135_v5 = vmul.f32 %v3128_v20, %v3121_v13  ;;  %v3136_v34 = vmul.f32 %v3132_v26, %v3122_v6  ;;  %v3397_v13 = vrot.slane %v4222_v27, %v4926_v53  ;;  %v3401_v6 = vrot.slane %v4222_v27, %v4932_v56 }
 0x576   : > { %v3140_v40 = vpop.permute.xlu0 %3139 }
 0x577   : > { %v4453_v31 = vpack.c.bf16 %v3135_v5, %v3113_v49  ;;  %v3142_v62 = vpop.permute.xlu1 %3141  ;;  %v4451_v47 = vpack.c.bf16 %v3136_v34, %v3114_v61 }
 0x578   : > { %v3143_v37 = vsel %vm934_vm15, %v3140_v40, %v3142_v62  ;;  %v3144_v3 = vsel %vm934_vm15, %v3142_v62, %v3140_v40 }
 0x579   : > { %v3157_v14 = vmul.f32 %v3150_v35, %v3143_v37  ;;  %v3158_v4 = vmul.f32 %v3154_v24, %v3144_v3  ;;  %4452 = vmatprep.subr.bf16.mxu0 %v4451_v47  ;;  %v4223_v35 = vld [vmem:[%s6877_s0 + $0x3] ss:$8 sm:$0x3]  ;;  %v4224_v3 = vld [vmem:[%s6877_s0 + $0x4] ss:$8 sm:$0x3] }
 0x57a   : > { %4454 = vmatpush1.bf16.msra.mxu0 %v4453_v31  ;;  %v3419_v49 = vrot.slane %v4223_v35, %v4926_v53  ;;  %v3423_v61 = vrot.slane %v4223_v35, %v4932_v56  ;;  %v3445_v2 = vrot.slane %v4224_v3, %v4932_v56 }
 0x57b   : > { %v4457_v0 = vpack.c.bf16 %v3173_v23, %v3157_v14  ;;  %v4455_v48 = vpack.c.bf16 %v3174_v16, %v3158_v4  ;;  %v3441_v16 = vrot.slane %v4224_v3, %v4926_v53 }
 0x57d   : > { %4456 = vmatprep.subr.bf16.mxu0 %v4455_v48  ;;  %v3467_v48 = vrot.slane %v4225_v59, %v4932_v56 }
 0x57e   : > { %4458 = vmatpush1.bf16.msra.mxu0 %v4457_v0  ;;  %v3463_v0 = vrot.slane %v4225_v59, %v4926_v53 }
 0x57f   : > { %3303 = vmatprep.subr.mxu0 %v3184_v7 }
 0x582   : > { %3304 = vmatpush1.msra.mxu0 %v3183_v17 }
 0x583   : > { %3316 = vmatmul.mubr.f32.vlgmr.msra.gmra.mrb[2].mxu0 %v3187_v46 }
 0x656   : > { %v3317_v21 = vpop.f32.mrb[2].mxu0 }
 0x657   : > { %v6499_v57 = vadd.f32 %v3317_v21, %v5761_v50  ;;  %v3319_v43 = vpop.f32.mrb[3].mxu0  ;;  %v3190_v50 = vld [vmem:[%s6880_s3 + $0xc8] sm:$0xff] }
 0x658   : > { %v6502_v54 = vadd.f32 %v3319_v43, %v5765_v44  ;;  %v3189_v44 = vld [vmem:[%s6880_s3 + $0xc0] sm:$0xff]  ;;  %4220 = vmatprep.mubr.msk.f32.mxu0 %vm1042_vm2, %v3190_v50 }
 0x659   : > { %3342 = vrot.lane.b32.xlu0 %v6499_v57, %s4574_s26  ;;  %4036 = vst [vmem:[%s6496_s8] sm:$0xff] %v6499_v57  ;;  %3322 = vmatmul.mubr.f32.gmra.mrb[4].mxu0 %v3189_v44 }
 0x65a   : > { %3344 = vrot.lane.b32.xlu1 %v6502_v54, %s4574_s26  ;;  %4037 = vst [vmem:[%s6496_s8 + $0x8] sm:$0xff] %v6502_v54  ;;  %s7041_s26 = smov 15   ;;  %4244 = vmatprep.mubr.msk.f32.mxu0 %vm1042_vm2, %v3899_v29  ;;  %vm7045_vm2 = vcmp.lt.s32.totalorder %v4920_v52, 17 }
 0x65d   : > { %3364 = vrot.lane.b32.xlu0 %v6499_v57, %s4573_s25 }
 0x65e   : > { %3366 = vrot.lane.b32.xlu1 %v6502_v54, %s4573_s25  ;;  %s7040_s25 = smov 16  }
 0x661   : > { %3386 = vrot.lane.b32.xlu0 %v6499_v57, %s4575_s27 }
 0x662   : > { %3388 = vrot.lane.b32.xlu1 %v6502_v54, %s4575_s27  ;;  %s7042_s27 = smov 14  }
 0x665   : > { %3408 = vrot.lane.b32.xlu0 %v6499_v57, %s4576_s28 }
 0x666   : > { %3410 = vrot.lane.b32.xlu1 %v6502_v54, %s4576_s28  ;;  %s7043_s28 = smov 2  }
 0x669   : > { %3430 = vrot.lane.b32.xlu0 %v6499_v57, %s7039_s16 }
 0x66a   : > { %3432 = vrot.lane.b32.xlu1 %v6502_v54, %s7039_s16 }
 0x66d   : > { %3452 = vrot.lane.b32.xlu0 %v6499_v57, %s6974_s30 }
 0x66e   : > { %3454 = vrot.lane.b32.xlu1 %v6502_v54, %s6974_s30  ;;  %s7044_s30 = smov 1  }
 0x671   : > { %3474 = vrot.lane.b32.xlu0 %v6499_v57, %s6975_s5 }
 0x672   : > { %3476 = vrot.lane.b32.xlu1 %v6502_v54, %s6975_s5 }
 0x675   : > { %3496 = vrot.lane.b32.xlu0 %v6499_v57, %s7040_s25 }
 0x676   : > { %3498 = vrot.lane.b32.xlu1 %v6502_v54, %s7040_s25 }
 0x679   : > { %3518 = vrot.lane.b32.xlu0 %v6499_v57, %s7041_s26 }
 0x67a   : > { %3520 = vrot.lane.b32.xlu1 %v6502_v54, %s7041_s26 }
 0x67d   : > { %3540 = vrot.lane.b32.xlu0 %v6499_v57, %s7042_s27 }
 0x67e   : > { %3542 = vrot.lane.b32.xlu1 %v6502_v54, %s7042_s27 }
 0x681   : > { %3562 = vrot.lane.b32.xlu0 %v6499_v57, %s7043_s28 }
 0x682   : > { %3564 = vrot.lane.b32.xlu1 %v6502_v54, %s7043_s28 }
 0x685   : > { %3584 = vrot.lane.b32.xlu0 %v6499_v57, %s7044_s30 }
 0x686   : > { %3586 = vrot.lane.b32.xlu1 %v6502_v54, %s7044_s30 }
 0x689   : > { %3608 = vrot.lane.b32.xlu0 %v6499_v57, %s7006_s19 }
 0x68a   : > { %3610 = vrot.lane.b32.xlu1 %v6502_v54, %s7006_s19 }
 0x68d   : > { %3630 = vrot.lane.b32.xlu0 %v6499_v57, %s7007_s24 }
 0x68e   : > { %3632 = vrot.lane.b32.xlu1 %v6502_v54, %s7007_s24 }
 0x691   : > { %3652 = vrot.lane.b32.xlu0 %v6499_v57, %s7008_s11 }
 0x692   : > { %3654 = vrot.lane.b32.xlu1 %v6502_v54, %s7008_s11 }
 0x695   : > { %3674 = vrot.lane.b32.xlu0 %v6499_v57, %s7009_s12 }
 0x696   : > { %3676 = vrot.lane.b32.xlu1 %v6502_v54, %s7009_s12 }
 0x699   : > { %3696 = vrot.lane.b32.xlu0 %v6499_v57, %s7010_s13 }
 0x69a   : > { %3698 = vrot.lane.b32.xlu1 %v6502_v54, %s7010_s13 }
 0x69d   : > { %3718 = vrot.lane.b32.xlu0 %v6499_v57, %s7011_s14 }
 0x69e   : > { %3720 = vrot.lane.b32.xlu1 %v6502_v54, %s7011_s14 }
 0x6a1   : > { %3740 = vrot.lane.b32.xlu0 %v6499_v57, %s6976_s17 }
 0x6a2   : > { %3742 = vrot.lane.b32.xlu1 %v6502_v54, %s6976_s17 }
 0x6a5   : > { %3762 = vrot.lane.b32.xlu0 %v6499_v57, %s6977_s20 }
 0x6a6   : > { %3764 = vrot.lane.b32.xlu1 %v6502_v54, %s6977_s20 }
 0x6a9   : > { %3784 = vrot.lane.b32.xlu0 %v6499_v57, %s6978_s21 }
 0x6aa   : > { %3786 = vrot.lane.b32.xlu1 %v6502_v54, %s6978_s21 }
 0x6ad   : > { %3806 = vrot.lane.b32.xlu0 %v6499_v57, %s6979_s22 }
 0x6ae   : > { %3808 = vrot.lane.b32.xlu1 %v6502_v54, %s6979_s22 }
 0x6b1   : > { %3828 = vrot.lane.b32.xlu0 %v6499_v57, %s6980_s23 }
 0x6b2   : > { %3830 = vrot.lane.b32.xlu1 %v6502_v54, %s6980_s23 }
 0x6b5   : > { %3850 = vrot.lane.b32.xlu0 %v6499_v57, %s6981_s18 }
 0x6b6   : > { %3852 = vrot.lane.b32.xlu1 %v6502_v54, %s6981_s18 }
 0x6cb   : > { %v3343_v25 = vpop.permute.xlu0 %3342 }
 0x6cc   : > { %v3345_v58 = vpop.permute.xlu1 %3344 }
 0x6cd   : > { %v3346_v60 = vsel %vm381_vm6, %v3343_v25, %v3345_v58  ;;  %v3347_v1 = vsel %vm381_vm6, %v3345_v58, %v3343_v25  ;;  %v4227_v58 = vld [vmem:[%s6877_s0 + $0x7] ss:$8 sm:$0x3]  ;;  %vm7049_vm6 = vcmp.lt.s32.totalorder %v4920_v52, 15 }
 0x6ce   : > { %v3360_v26 = vmul.f32 %v3353_v51, %v3347_v1  ;;  %v3361_v63 = vmul.f32 %v3357_v42, %v3346_v60  ;;  %v3489_v60 = vrot.slane %v4226_v38, %v4932_v56  ;;  %v3507_v1 = vrot.slane %v4227_v58, %v4926_v53 }
 0x6cf   : > { %v3365_v36 = vpop.permute.xlu0 %3364 }
 0x6d0   : > { %v3367_v32 = vpop.permute.xlu1 %3366 }
 0x6d1   : > { %v3368_v30 = vsel %vm404_vm3, %v3365_v36, %v3367_v32  ;;  %v3369_v20 = vsel %vm404_vm3, %v3367_v32, %v3365_v36  ;;  %v3511_v36 = vrot.slane %v4227_v58, %v4932_v56  ;;  %vm7046_vm3 = vmmov %vm7045_vm2 }
 0x6d2   : > { %v3382_v11 = vmul.f32 %v3375_v22, %v3369_v20  ;;  %v3383_v8 = vmul.f32 %v3379_v18, %v3368_v30  ;;  %v3485_v18 = vrot.slane %v4226_v38, %v4926_v53 }
 0x6d3   : > { %v3387_v33 = vpop.permute.xlu0 %3386 }
 0x6d4   : > { %v4461_v24 = vpack.c.bf16 %v3382_v11, %v3360_v26  ;;  %v3389_v10 = vpop.permute.xlu1 %3388  ;;  %v4459_v45 = vpack.c.bf16 %v3383_v8, %v3361_v63 }
 0x6d5   : > { %v3390_v5 = vsel %vm428_vm5, %v3387_v33, %v3389_v10  ;;  %v3391_v34 = vsel %vm428_vm5, %v3389_v10, %v3387_v33  ;;  %v4228_v10 = vld [vmem:[%s6877_s0 + $0x10] ss:$8 sm:$0x3] }
 0x6d6   : > { %4460 = vmatprep.subr.bf16.mxu0 %v4459_v45  ;;  %v3404_v31 = vmul.f32 %v3397_v13, %v3391_v34  ;;  %v3405_v62 = vmul.f32 %v3401_v6, %v3390_v5  ;;  %v4229_v45 = vld [vmem:[%s6877_s0 + $0x11] ss:$8 sm:$0x3]  ;;  %v3533_v5 = vrot.slane %v4228_v10, %v4932_v56 }
 0x6d7   : > { %v3409_v40 = vpop.permute.xlu0 %3408  ;;  %4462 = vmatpush1.bf16.msra.mxu0 %v4461_v24  ;;  %v3551_v34 = vrot.slane %v4229_v45, %v4926_v53 }
 0x6d8   : > { %v3411_v12 = vpop.permute.xlu1 %3410 }
 0x6d9   : > { %v3412_v19 = vsel %vm452_vm4, %v3409_v40, %v3411_v12  ;;  %v3413_v28 = vsel %vm452_vm4, %v3411_v12, %v3409_v40  ;;  %vm7047_vm4 = vcmp.lt.s32.totalorder %v4920_v52, 16  ;;  %v3555_v40 = vrot.slane %v4229_v45, %v4932_v56 }
 0x6da   : > { %v3426_v47 = vmul.f32 %v3419_v49, %v3413_v28  ;;  %v3427_v9 = vmul.f32 %v3423_v61, %v3412_v19  ;;  %vm7048_vm5 = vmmov %vm7047_vm4  ;;  %v3529_v61 = vrot.slane %v4228_v10, %v4926_v53 }
 0x6db   : > { %v3431_v37 = vpop.permute.xlu0 %3430 }
 0x6dc   : > { %v4465_v23 = vpack.c.bf16 %v3426_v47, %v3404_v31  ;;  %v3433_v14 = vpop.permute.xlu1 %3432  ;;  %v4463_v4 = vpack.c.bf16 %v3427_v9, %v3405_v62 }
 0x6dd   : > { %v3434_v41 = vsel %vm476_vm7, %v3431_v37, %v3433_v14  ;;  %v3435_v7 = vsel %vm476_vm7, %v3433_v14, %v3431_v37  ;;  %vm7050_vm7 = vmmov %vm7049_vm6  ;;  %v4230_v14 = vld [vmem:[%s6877_s0 + $0x12] ss:$8 sm:$0x3] }
 0x6de   : > { %4464 = vmatprep.subr.bf16.mxu0 %v4463_v4  ;;  %v3448_v50 = vmul.f32 %v3441_v16, %v3435_v7  ;;  %v3449_v44 = vmul.f32 %v3445_v2, %v3434_v41  ;;  %v4231_v4 = vld [vmem:[%s6877_s0 + $0x13] ss:$8 sm:$0x3]  ;;  %v3577_v41 = vrot.slane %v4230_v14, %v4932_v56 }
 0x6df   : > { %v3453_v17 = vpop.permute.xlu0 %3452  ;;  %4466 = vmatpush1.bf16.msra.mxu0 %v4465_v23  ;;  %v3595_v7 = vrot.slane %v4231_v4, %v4926_v53 }
 0x6e0   : > { %v3455_v46 = vpop.permute.xlu1 %3454 }
 0x6e1   : > { %v3456_v21 = vsel %vm500_vm8, %v3453_v17, %v3455_v46  ;;  %v3457_v43 = vsel %vm500_vm8, %v3455_v46, %v3453_v17  ;;  %vm7051_vm8 = vcmp.lt.s32.totalorder %v4920_v52, 14  ;;  %v3599_v17 = vrot.slane %v4231_v4, %v4932_v56  ;;  %v4232_v46 = vld [vmem:[%s6877_s0 + $0x15] ss:$8 sm:$0x3] }
 0x6e2   : > { %v3470_v29 = vmul.f32 %v3463_v0, %v3457_v43  ;;  %v3471_v25 = vmul.f32 %v3467_v48, %v3456_v21  ;;  %vm7052_vm10 = vmmov %vm7051_vm8  ;;  %v3573_v48 = vrot.slane %v4230_v14, %v4926_v53  ;;  %v3623_v38 = vrot.slane %v4232_v46, %v4932_v56 }
 0x6e3   : > { %v3475_v55 = vpop.permute.xlu0 %3474 }
 0x6e4   : > { %v4469_v51 = vpack.c.bf16 %v3470_v29, %v3448_v50  ;;  %v3477_v42 = vpop.permute.xlu1 %3476  ;;  %v4467_v22 = vpack.c.bf16 %v3471_v25, %v3449_v44 }
 0x6e5   : > { %v3478_v32 = vsel %vm7045_vm2, %v3475_v55, %v3477_v42  ;;  %v3479_v30 = vsel %vm7046_vm3, %v3477_v42, %v3475_v55  ;;  %vm7056_vm2 = vmmov %vm7055_vm12  ;;  %v3619_v55 = vrot.slane %v4232_v46, %v4926_v53  ;;  %vm7057_vm3 = vcmp.lt.s32.totalorder %v4920_v52, 127 }
 0x6e6   : > { %4468 = vmatprep.subr.bf16.mxu0 %v4467_v22  ;;  %v3492_v8 = vmul.f32 %v3485_v18, %v3479_v30  ;;  %v3493_v33 = vmul.f32 %v3489_v60, %v3478_v32 }
 0x6e7   : > { %v3497_v20 = vpop.permute.xlu0 %3496  ;;  %4470 = vmatpush1.bf16.msra.mxu0 %v4469_v51 }
 0x6e8   : > { %v3499_v26 = vpop.permute.xlu1 %3498 }
 0x6e9   : > { %v3500_v63 = vsel %vm7047_vm4, %v3497_v20, %v3499_v26  ;;  %v3501_v11 = vsel %vm7048_vm5, %v3499_v26, %v3497_v20  ;;  %vm7058_vm4 = vmmov %vm7057_vm3  ;;  %vm7059_vm5 = vcmp.lt.s32.totalorder %v4920_v52, 126 }
 0x6ea   : > { %v3514_v27 = vmul.f32 %v3507_v1, %v3501_v11  ;;  %v3515_v35 = vmul.f32 %v3511_v36, %v3500_v63  ;;  %v4233_v11 = vld [vmem:[%s6877_s0 + $0x16] ss:$8 sm:$0x3] }
 0x6eb   : > { %v3519_v24 = vpop.permute.xlu0 %3518  ;;  %v3645_v10 = vrot.slane %v4233_v11, %v4932_v56 }
 0x6ec   : > { %v4473_v13 = vpack.c.bf16 %v3514_v27, %v3492_v8  ;;  %v3521_v6 = vpop.permute.xlu1 %3520  ;;  %v4471_v49 = vpack.c.bf16 %v3515_v35, %v3493_v33  ;;  %v4234_v8 = vld [vmem:[%s6877_s0 + $0x17] ss:$8 sm:$0x3] }
 0x6ed   : > { %v3522_v12 = vsel %vm7049_vm6, %v3519_v24, %v3521_v6  ;;  %v3523_v19 = vsel %vm7050_vm7, %v3521_v6, %v3519_v24  ;;  %v3641_v24 = vrot.slane %v4233_v11, %v4926_v53  ;;  %v3663_v45 = vrot.slane %v4234_v8, %v4926_v53  ;;  %vm7060_vm6 = vmmov %vm7059_vm5 }
 0x6ee   : > { %4472 = vmatprep.subr.bf16.mxu0 %v4471_v49  ;;  %v3536_v9 = vmul.f32 %v3529_v61, %v3523_v19  ;;  %v3537_v37 = vmul.f32 %v3533_v5, %v3522_v12  ;;  %vm7061_vm7 = vcmp.lt.s32.totalorder %v4920_v52, 114 }
 0x6ef   : > { %v3541_v28 = vpop.permute.xlu0 %3540  ;;  %4474 = vmatpush1.bf16.msra.mxu0 %v4473_v13  ;;  %v3667_v13 = vrot.slane %v4234_v8, %v4932_v56 }
 0x6f0   : > { %v3543_v31 = vpop.permute.xlu1 %3542 }
 0x6f1   : > { %v3544_v62 = vsel %vm7051_vm8, %v3541_v28, %v3543_v31  ;;  %v3545_v47 = vsel %vm7052_vm10, %v3543_v31, %v3541_v28  ;;  %vm7062_vm8 = vmmov %vm7061_vm7  ;;  %vm7063_vm10 = vcmp.lt.s32.totalorder %v4920_v52, 113 }
 0x6f2   : > { %v3558_v3 = vmul.f32 %v3551_v34, %v3545_v47  ;;  %v3559_v59 = vmul.f32 %v3555_v40, %v3544_v62  ;;  %v4235_v47 = vld [vmem:[%s6877_s0 + $0x20] ss:$8 sm:$0x3] }
 0x6f3   : > { %v3563_v23 = vpop.permute.xlu0 %3562  ;;  %v3689_v14 = vrot.slane %v4235_v47, %v4932_v56 }
 0x6f4   : > { %v4477_v16 = vpack.c.bf16 %v3558_v3, %v3536_v9  ;;  %v3565_v2 = vpop.permute.xlu1 %3564  ;;  %v4475_v0 = vpack.c.bf16 %v3559_v59, %v3537_v37  ;;  %v4236_v9 = vld [vmem:[%s6877_s0 + $0x21] ss:$8 sm:$0x3] }
 0x6f5   : > { %v3566_v21 = vsel %vm7053_vm11, %v3563_v23, %v3565_v2  ;;  %v3567_v43 = vsel %vm7054_vm9, %v3565_v2, %v3563_v23  ;;  %v3685_v23 = vrot.slane %v4235_v47, %v4926_v53  ;;  %v3707_v4 = vrot.slane %v4236_v9, %v4926_v53  ;;  %vm7064_vm11 = vmmov %vm7063_vm10 }
 0x6f6   : > { %4476 = vmatprep.subr.bf16.mxu0 %v4475_v0  ;;  %v3580_v58 = vmul.f32 %v3573_v48, %v3567_v43  ;;  %v3581_v51 = vmul.f32 %v3577_v41, %v3566_v21  ;;  %vm7065_vm9 = vcmp.lt.s32.totalorder %v4920_v52, 112 }
 0x6f7   : > { %v3585_v50 = vpop.permute.xlu0 %3584  ;;  %4478 = vmatpush1.bf16.msra.mxu0 %v4477_v16  ;;  %v3711_v16 = vrot.slane %v4236_v9, %v4932_v56 }
 0x6f8   : > { %v3587_v44 = vpop.permute.xlu1 %3586 }
 0x6f9   : > { %v3588_v29 = vsel %vm7055_vm12, %v3585_v50, %v3587_v44  ;;  %v3589_v25 = vsel %vm7056_vm2, %v3587_v44, %v3585_v50  ;;  %vm7066_vm12 = vmmov %vm7065_vm9  ;;  %vm7067_vm2 = vcmp.lt.s32.totalorder %v4920_v52, 110 }
 0x6fa   : > { %v3602_v42 = vmul.f32 %v3595_v7, %v3589_v25  ;;  %v3603_v22 = vmul.f32 %v3599_v17, %v3588_v29  ;;  %v4237_v29 = vld [vmem:[%s6877_s0 + $0x22] ss:$8 sm:$0x3]  ;;  %v4238_v25 = vld [vmem:[%s6877_s0 + $0x23] ss:$8 sm:$0x3] }
 0x6fb   : > { %v3609_v18 = vpop.permute.xlu0 %3608 }
 0x6fc   : > { %v4481_v60 = vpack.c.bf16 %v3602_v42, %v3580_v58  ;;  %v3611_v1 = vpop.permute.xlu1 %3610  ;;  %v4479_v36 = vpack.c.bf16 %v3603_v22, %v3581_v51  ;;  %v3729_v51 = vrot.slane %v4237_v29, %v4926_v53  ;;  %v3733_v42 = vrot.slane %v4237_v29, %v4932_v56 }
 0x6fd   : > { %v3612_v32 = vsel %vm7057_vm3, %v3609_v18, %v3611_v1  ;;  %v3613_v30 = vsel %vm7058_vm4, %v3611_v1, %v3609_v18  ;;  %v3751_v22 = vrot.slane %v4238_v25, %v4926_v53  ;;  %v3755_v18 = vrot.slane %v4238_v25, %v4932_v56  ;;  %vm7068_vm3 = vmmov %vm7067_vm2 }
 0x6fe   : > { %v6732_v20 = vmul.f32 %v3619_v55, %v3612_v32  ;;  %v6734_v26 = vmul.f32 %v3623_v38, %v3613_v30  ;;  %4480 = vmatprep.subr.bf16.mxu0 %v4479_v36 }
 0x6ff   : > { %v3631_v63 = vpop.permute.xlu0 %3630  ;;  %4482 = vmatpush1.bf16.msra.mxu0 %v4481_v60 }
 0x700   : > { %v3633_v33 = vpop.permute.xlu1 %3632  ;;  %v4485_v27 = vpack.c.bf16 %v6732_v20, %v6499_v57  ;;  %v4483_v35 = vpack.c.bf16 %v6734_v26, %v6502_v54  ;;  %v3889_v29 = vadd.f32 %v6502_v54, %v6734_v26 }
 0x701   : > { %v3634_v6 = vsel %vm7059_vm5, %v3631_v63, %v3633_v33  ;;  %v3635_v49 = vsel %vm7060_vm6, %v3633_v33, %v3631_v63 }
 0x702   : > { %4484 = vmatprep.subr.bf16.mxu0 %v4483_v35  ;;  %v3648_v12 = vmul.f32 %v3641_v24, %v3634_v6  ;;  %v3649_v19 = vmul.f32 %v3645_v10, %v3635_v49  ;;  %v4239_v24 = vld [vmem:[%s6877_s0 + $0x24] ss:$8 sm:$0x3]  ;;  %v4240_v10 = vld [vmem:[%s6877_s0 + $0x25] ss:$8 sm:$0x3] }
 0x703   : > { %v3653_v61 = vpop.permute.xlu0 %3652  ;;  %4486 = vmatpush1.bf16.msra.mxu0 %v4485_v27  ;;  %v3773_v49 = vrot.slane %v4239_v24, %v4926_v53 }
 0x704   : > { %v3655_v5 = vpop.permute.xlu1 %3654 }
 0x705   : > { %v3656_v34 = vsel %vm7061_vm7, %v3653_v61, %v3655_v5  ;;  %v3657_v40 = vsel %vm7062_vm8, %v3655_v5, %v3653_v61  ;;  %v3777_v61 = vrot.slane %v4239_v24, %v4932_v56  ;;  %v3795_v5 = vrot.slane %v4240_v10, %v4926_v53 }
 0x706   : > { %v3670_v28 = vmul.f32 %v3663_v45, %v3656_v34  ;;  %v3671_v31 = vmul.f32 %v3667_v13, %v3657_v40  ;;  %v3799_v34 = vrot.slane %v4240_v10, %v4932_v56 }
 0x707   : > { %v3675_v62 = vpop.permute.xlu0 %3674 }
 0x708   : > { %v4489_v37 = vpack.c.bf16 %v3670_v28, %v3648_v12  ;;  %v3677_v3 = vpop.permute.xlu1 %3676  ;;  %v4487_v59 = vpack.c.bf16 %v3671_v31, %v3649_v19 }
 0x709   : > { %v3678_v2 = vsel %vm7063_vm10, %v3675_v62, %v3677_v3  ;;  %v3679_v0 = vsel %vm7064_vm11, %v3677_v3, %v3675_v62 }
 0x70a   : > { %4488 = vmatprep.subr.bf16.mxu0 %v4487_v59  ;;  %v3692_v46 = vmul.f32 %v3685_v23, %v3678_v2  ;;  %v3693_v21 = vmul.f32 %v3689_v14, %v3679_v0  ;;  %v4241_v23 = vld [vmem:[%s6877_s0 + $0x26] ss:$8 sm:$0x3]  ;;  %v4242_v14 = vld [vmem:[%s6877_s0 + $0x27] ss:$8 sm:$0x3] }
 0x70b   : > { %v3697_v48 = vpop.permute.xlu0 %3696  ;;  %4490 = vmatpush1.bf16.msra.mxu0 %v4489_v37  ;;  %v4243_v0 = vld [vmem:[%s6877_s0 + $0x30] ss:$8 sm:$0x3] }
 0x70c   : > { %v3699_v41 = vpop.permute.xlu1 %3698 }
 0x70d   : > { %v3700_v7 = vsel %vm7065_vm9, %v3697_v48, %v3699_v41  ;;  %v3701_v17 = vsel %vm7066_vm12, %v3699_v41, %v3697_v48  ;;  %v3817_v48 = vrot.slane %v4241_v23, %v4926_v53  ;;  %v3821_v41 = vrot.slane %v4241_v23, %v4932_v56 }
 0x70e   : > { %v6776_v43 = vmul.f32 %v3707_v4, %v3700_v7  ;;  %v6778_v50 = vmul.f32 %v3711_v16, %v3701_v17  ;;  %v3839_v7 = vrot.slane %v4242_v14, %v4926_v53  ;;  %v3843_v17 = vrot.slane %v4242_v14, %v4932_v56 }
 0x70f   : > { %v3719_v44 = vpop.permute.xlu0 %3718 }
 0x710   : > { %v4493_v55 = vpack.c.bf16 %v6776_v43, %v3692_v46  ;;  %v3721_v38 = vpop.permute.xlu1 %3720  ;;  %v4491_v58 = vpack.c.bf16 %v6778_v50, %v3693_v21 }
 0x711   : > { %v3722_v60 = vsel %vm790_vm1, %v3719_v44, %v3721_v38  ;;  %v3723_v1 = vsel %vm790_vm1, %v3721_v38, %v3719_v44  ;;  %vm7069_vm1 = vcmp.lt.s32.totalorder %v4920_v52, 97  ;;  %v3865_v38 = vrot.slane %v4243_v0, %v4932_v56 }
 0x712   : > { %4492 = vmatprep.subr.bf16.mxu0 %v4491_v58  ;;  %v6800_v11 = vmul.f32 %v3729_v51, %v3722_v60  ;;  %v6802_v8 = vmul.f32 %v3733_v42, %v3723_v1  ;;  %vm7070_vm4 = vmmov %vm7069_vm1  ;;  %v3880_v56 = vmax.f32 %v6499_v57, %v6732_v20 }
 0x713   : > { %v3741_v36 = vpop.permute.xlu0 %3740  ;;  %4494 = vmatpush1.bf16.msra.mxu0 %v4493_v55  ;;  %v3861_v55 = vrot.slane %v4243_v0, %v4926_v53  ;;  %v3891_v53 = vadd.f32 %v3889_v29, %v6778_v50 }
 0x714   : > { %v3743_v32 = vpop.permute.xlu1 %3742  ;;  %v3882_v58 = vmax.f32 %v6776_v43, %v6800_v11  ;;  %v3883_v51 = vmax.f32 %v6778_v50, %v6802_v8 }
 0x715   : > { %v3744_v30 = vsel %vm7067_vm2, %v3741_v36, %v3743_v32  ;;  %v3745_v63 = vsel %vm7068_vm3, %v3743_v32, %v3741_v36  ;;  %v3893_v50 = vadd.f32 %v3891_v53, %v6802_v8 }
 0x716   : > { %v3758_v33 = vmul.f32 %v3751_v22, %v3744_v30  ;;  %v3759_v27 = vmul.f32 %v3755_v18, %v3745_v63  ;;  %v3881_v30 = vmax.f32 %v6502_v54, %v6734_v26 }
 0x717   : > { %v3763_v35 = vpop.permute.xlu0 %3762 }
 0x718   : > { %v4497_v45 = vpack.c.bf16 %v3758_v33, %v6800_v11  ;;  %v3765_v13 = vpop.permute.xlu1 %3764  ;;  %v4495_v6 = vpack.c.bf16 %v3759_v27, %v6802_v8  ;;  %v3898_v8 = vld [vmem:[%s6880_s3 + $0xd0] sm:$0xff] }
 0x719   : > { %v3766_v40 = vsel %vm838_vm14, %v3763_v35, %v3765_v13  ;;  %v3767_v12 = vsel %vm838_vm14, %v3765_v13, %v3763_v35  ;;  %v3888_v35 = vadd.f32 %v6499_v57, %v6732_v20 }
 0x71a   : > { %4496 = vmatprep.subr.bf16.mxu0 %v4495_v6  ;;  %v3780_v47 = vmul.f32 %v3773_v49, %v3766_v40  ;;  %v3781_v9 = vmul.f32 %v3777_v61, %v3767_v12  ;;  %v3885_v49 = vmax.f32 %v3881_v30, %v3883_v51  ;;  %v3895_v61 = vmul.f32 0.25, %v3893_v50 }
 0x71b   : > { %v3785_v19 = vpop.permute.xlu0 %3784  ;;  %4498 = vmatpush1.bf16.msra.mxu0 %v4497_v45  ;;  %v3884_v45 = vmax.f32 %v3880_v56, %v3882_v58  ;;  %v3890_v54 = vadd.f32 %v3888_v35, %v6776_v43 }
 0x71c   : > { %v3787_v28 = vpop.permute.xlu1 %3786 }
 0x71d   : > { %v3788_v31 = vsel %vm7069_vm1, %v3785_v19, %v3787_v28  ;;  %v3789_v62 = vsel %vm7070_vm4, %v3787_v28, %v3785_v19  ;;  %v3892_v20 = vadd.f32 %v3890_v54, %v6800_v11 }
 0x71e   : > { %v3802_v37 = vmul.f32 %v3795_v5, %v3788_v31  ;;  %v3803_v3 = vmul.f32 %v3799_v34, %v3789_v62 }
 0x71f   : > { %v3807_v59 = vpop.permute.xlu0 %3806  ;;  %v3894_v52 = vmul.f32 0.25, %v3892_v20 }
 0x720   : > { %v4501_v4 = vpack.c.bf16 %v3802_v37, %v3780_v47  ;;  %v3809_v16 = vpop.permute.xlu1 %3808  ;;  %v4499_v2 = vpack.c.bf16 %v3803_v3, %v3781_v9 }
 0x721   : > { %v3810_v46 = vsel %vm886_vm13, %v3807_v59, %v3809_v16  ;;  %v3811_v21 = vsel %vm886_vm13, %v3809_v16, %v3807_v59 }
 0x722   : > { %4500 = vmatprep.subr.bf16.mxu0 %v4499_v2  ;;  %v3824_v18 = vmul.f32 %v3817_v48, %v3810_v46  ;;  %v3825_v60 = vmul.f32 %v3821_v41, %v3811_v21 }
 0x723   : > { %v3829_v44 = vpop.permute.xlu0 %3828  ;;  %4502 = vmatpush1.bf16.msra.mxu0 %v4501_v4 }
 0x724   : > { %v3831_v25 = vpop.permute.xlu1 %3830 }
 0x725   : > { %v3832_v42 = vsel %vm910_vm0, %v3829_v44, %v3831_v25  ;;  %v3833_v22 = vsel %vm910_vm0, %v3831_v25, %v3829_v44 }
 0x726   : > { %v3846_v1 = vmul.f32 %v3839_v7, %v3832_v42  ;;  %v3847_v36 = vmul.f32 %v3843_v17, %v3833_v22 }
 0x727   : > { %v3851_v32 = vpop.permute.xlu0 %3850 }
 0x728   : > { %v4505_v63 = vpack.c.bf16 %v3846_v1, %v3824_v18  ;;  %v3853_v33 = vpop.permute.xlu1 %3852  ;;  %v4503_v27 = vpack.c.bf16 %v3847_v36, %v3825_v60 }
 0x729   : > { %v3854_v24 = vsel %vm934_vm15, %v3851_v32, %v3853_v33  ;;  %v3855_v10 = vsel %vm934_vm15, %v3853_v33, %v3851_v32 }
 0x72a   : > { %v3868_v13 = vmul.f32 %v3861_v55, %v3854_v24  ;;  %v3869_v6 = vmul.f32 %v3865_v38, %v3855_v10  ;;  %4504 = vmatprep.subr.bf16.mxu0 %v4503_v27 }
 0x72b   : > { %4506 = vmatpush1.bf16.msra.mxu0 %v4505_v63 }
 0x72c   : > { %v4509_v26 = vpack.c.bf16 %v3884_v45, %v3868_v13  ;;  %v4507_v57 = vpack.c.bf16 %v3885_v49, %v3869_v6 }
 0x72e   : > { %4508 = vmatprep.subr.bf16.mxu0 %v4507_v57 }
 0x72f   : > { %4510 = vmatpush1.bf16.msra.mxu0 %v4509_v26 }
 0x730   : > { %4009 = vmatprep.subr.mxu0 %v3895_v61 }
 0x733   : > { %4010 = vmatpush1.msra.mxu0 %v3894_v52 }
 0x734   : > { %4022 = vmatmul.mubr.f32.vlgmr.msra.gmra.mrb[4].mxu0 %v3898_v8 }
 0x807   : > { %v4023_v5 = vpop.f32.mrb[4].mxu0 }
 0x808   : > { %v4515_v43 = vadd.f32 %v4023_v5, %v5769_v39  ;;  %v4025_v34 = vpop.f32.mrb[5].mxu0 }
 0x809   : > { %v4516_v40 = vadd.f32 %v4025_v34, %v5773_v15 }
 0x80a   : > { %4245 = vst [vmem:[%s6496_s8 + $0x10] sm:$0xff] %v4515_v43 }
 0x80b   : > { %4246 = vst [vmem:[%s6496_s8 + $0x18] sm:$0xff] %v4516_v40 }
 0x80c PF: > { %s14_s15 = sadd.s32 1, %s4570_s15  }
 0x80d   : > { %p11_p4 = scmp.ge.s32.totalorder %s14_s15, 4  }
 0x80f   :  { %13 = sbr.rel (!%p11_p4) target bundleno = 1 (0x1), region = 97 }

</bundles_post_ra>
